<compile_context>
chip_gen: v7x
topology: tpu7x:2x2x1
jax: 0.10.0
libtpu: 0.0.40
codegen_flags: <defaults>
</compile_context>

<pallas_src>
import math
import functools

import jax
import jax.numpy as jnp
from jax import lax
from jax.experimental import pallas as pl
from jax.experimental.pallas import tpu as pltpu

# --- module hyper-parameters (hidden_size must be a multiple of 64) -------------------
HIDDEN = 128
HEAD_DIM = 64
NUM_HEADS = HIDDEN // HEAD_DIM          # num_attention_heads = hidden_size / 64
DIM_FF = HIDDEN * 4                     # dim_feedforward = 4 * hidden_size
N_EXPERTS = 2                           # N (note-type experts), use_expert=True
NUM_LAYERS = 2                          # num_patient_encoder_layers
BATCH, NUM_NOTE = 2, 8
LN_EPS = 1e-5


def _layernorm(x, g, b):
    mu = jnp.mean(x, axis=-1, keepdims=True)
    var = jnp.mean((x - mu) ** 2, axis=-1, keepdims=True)
    return (x - mu) * lax.rsqrt(var + LN_EPS) * g + b


# ----------------------------- fused Pallas kernel -------------------------------------
def fused_encoder_kernel(x_ref, mask_ref, perm_ref, emw_ref,
                         ln1g_ref, ln1b_ref, wqkv_ref, bqkv_ref,
                         ln2g_ref, ln2b_ref, w1_ref, b1_ref, w2_ref, b2sel_ref,
                         o_ref, *, num_heads, head_dim, hidden, exact_gelu):
    """One encoder layer per grid step; activation carried in the resident o_ref."""
    @pl.when(pl.program_id(0) == 0)
    def _init():                                   # load input only on the first layer
        o_ref[...] = x_ref[...]

    x = o_ref[...]                                 # (M, H) f32, carried across layers
    mask = mask_ref[...]                           # (M, M) block-diag + key mask (add.)

    # ---- x = x + MHA(norm1(x), attn_mask); batch-fused, per-head softmax -------------
    xln = _layernorm(x, ln1g_ref[0], ln1b_ref[0])
    qkv = jnp.dot(xln.astype(jnp.bfloat16), wqkv_ref[0],
                  preferred_element_type=jnp.float32) + bqkv_ref[0]     # (M, 3H) f32
    ctxs = []
    for h in range(num_heads):                     # tiny static head loop (2 heads)
        c = h * head_dim
        q = qkv[:, c:c + head_dim]
        k = qkv[:, hidden + c:hidden + c + head_dim]
        v = qkv[:, 2 * hidden + c:2 * hidden + c + head_dim]
        # NOTE: reference MultiHeadAttention does NOT scale by 1/sqrt(head_dim).
        s = lax.dot_general(q, k, (((1,), (1,)), ((), ())),
                            preferred_element_type=jnp.float32) + mask
        s = s - jnp.max(s, axis=-1, keepdims=True)
        p = jnp.exp(s)
        p = p * pl.reciprocal(jnp.sum(p, axis=-1, keepdims=True), approx=True)
        ctxs.append(jnp.dot(p, v, preferred_element_type=jnp.float32))
    x = x + jnp.concatenate(ctxs, axis=-1)         # one lane-concat, no VMEM scratch

    # ---- x = x + FFNoteExpert(norm2(x), note_type_pos), experts fused ----------------
    xln2 = _layernorm(x, ln2g_ref[0], ln2b_ref[0])
    he = jnp.dot(xln2.astype(jnp.bfloat16), w1_ref[0],
                 preferred_element_type=jnp.float32) + b1_ref[0]        # (M, N*DF)
    if exact_gelu:
        # nn.GELU() default: exact erf formulation
        he = 0.5 * he * (1.0 + lax.erf(he * (1.0 / math.sqrt(2.0))))
    else:
        he = 0.5 * he * (1.0 + jnp.tanh(math.sqrt(2.0 / math.pi)
                                        * (he + 0.044715 * he * he * he)))
    he = he * emw_ref[...]                         # precomputed full-width expert mask
    ff = jnp.dot(he.astype(jnp.bfloat16), w2_ref[0],
                 preferred_element_type=jnp.float32) + b2sel_ref[0]     # (M, H)
    x = x + ff

    # ---- view(-1,H)[note_pos!=0] compaction + order_notes(x, note_pos) ---------------
    # as one row-selection/permutation matmul (zero rows where note_pos == 0).
    o_ref[...] = jnp.dot(perm_ref[...], x, preferred_element_type=jnp.float32)


# ----------------------------- wrapper --------------------------------------------------
def note_patient_encoder_forward(x, note_pos, note_type_pos, params, pe, *,
                                 exact_gelu=True):
    """Mirror of Note_PatientEncoder.forward (use_expert=True, pre_norm=True)."""
    B, T, H = x.shape
    M = B * T
    L = params["wqkv"].shape[0]
    n_experts = params["w1"].shape[1]
    DF = params["w1"].shape[-1]
    num_heads = H // HEAD_DIM
    WF = n_experts * DF                                               # fused FF width

    # glue: sinusoidal positional encoding, flatten to (B*T, H)
    xf = (x + pe[:T][None]).reshape(M, H).astype(jnp.float32)

    # glue: cheap index math done once outside the kernel (fused by jit anyway)
    npos = note_pos.reshape(-1).astype(jnp.int32)                     # (M,)
    valid = npos != 0
    rank = jnp.cumsum(valid.astype(jnp.int32)) - 1                    # compaction rank
    ntp = note_type_pos.reshape(-1).astype(jnp.int32)                 # compacted order
    expert_of_row = jnp.where(valid,
                              jnp.take(ntp, jnp.clip(rank, 0, ntp.shape[0] - 1)),
                              -1)
    onehot = (expert_of_row[:, None] ==
              jnp.arange(n_experts, dtype=jnp.int32)[None, :]).astype(jnp.float32)  # (M,N)
    # full-width expert mask over [expert0 slab | expert1 slab | ...]
    emask_wide = jnp.broadcast_to(onehot[:, :, None], (M, n_experts, DF)).reshape(M, WF)

    # combined (M, M) additive attention mask: block-diagonal over batches, with the
    # reference's (1 - (note_pos != 0)) * -10000 key mask inside each batch block.
    bid = jnp.arange(M, dtype=jnp.int32) // T
    same_batch = bid[:, None] == bid[None, :]
    mask_full = jnp.where(same_batch & valid[None, :], 0.0,
                          jnp.where(same_batch, -10000.0, -1e9)).astype(jnp.float32)

    # perm[r, s] = 1 iff output row r gathers the valid flattened row s with
    # rank[s] == note_pos[r]-1; rows with note_pos[r]==0 become zeros (order_notes pad).
    perm = ((npos[:, None] - 1 == rank[None, :]) & valid[None, :]).astype(jnp.float32)

    # packed / bf16 weights (MXU operands only; all non-matmul math stays f32)
    wqkv = params["wqkv"].astype(jnp.bfloat16)                        # (L, H, 3H)
    bqkv = params["bqkv"]                                             # (L, 1, 3H)
    w1_cat = jnp.concatenate([params["w1"][:, e] for e in range(n_experts)],
                             axis=-1).astype(jnp.bfloat16)            # (L, H, N*DF)
    b1_cat = jnp.concatenate([params["b1"][:, e] for e in range(n_experts)],
                             axis=-1)                                 # (L, 1, N*DF)
    w2_stack = jnp.concatenate([params["w2"][:, e] for e in range(n_experts)],
                               axis=1).astype(jnp.bfloat16)           # (L, N*DF, H)
    b2_sel = jnp.einsum('mn,lnh->lmh', onehot, params["b2"][:, :, 0, :])  # (L, M, H)

    kernel = functools.partial(fused_encoder_kernel, num_heads=num_heads,
                               head_dim=HEAD_DIM, hidden=H, exact_gelu=exact_gelu)

    flops = L * (2 * M * H * 3 * H                      # QKV
                 + num_heads * 4 * M * M * HEAD_DIM     # scores + context
                 + 2 * M * H * WF + 2 * M * WF * H      # fused FF
                 + 2 * M * M * H)                       # permutation
    transcendentals = L * (num_heads * M * M + M * WF + 4 * M)
    bytes_accessed = ((wqkv.size + w1_cat.size + w2_stack.size) * 2
                      + (xf.size + mask_full.size + perm.size + emask_wide.size
                         + b2_sel.size + bqkv.size + b1_cat.size + 4 * L * H + M * H) * 4)

    out = pl.pallas_call(
        kernel,
        out_shape=jax.ShapeDtypeStruct((M, H), jnp.float32),
        grid_spec=pltpu.PrefetchScalarGridSpec(
            num_scalar_prefetch=0,
            grid=(L,),
            in_specs=[
                pl.BlockSpec((M, H), lambda l: (0, 0)),            # xf (layer-invariant)
                pl.BlockSpec((M, M), lambda l: (0, 0)),            # combined attn mask
                pl.BlockSpec((M, M), lambda l: (0, 0)),            # permutation
                pl.BlockSpec((M, WF), lambda l: (0, 0)),           # expert row mask
                pl.BlockSpec((1, 1, H), lambda l: (l, 0, 0)),      # ln1_g
                pl.BlockSpec((1, 1, H), lambda l: (l, 0, 0)),      # ln1_b
                pl.BlockSpec((1, H, 3 * H), lambda l: (l, 0, 0)),  # wqkv (bf16)
                pl.BlockSpec((1, 1, 3 * H), lambda l: (l, 0, 0)),  # bqkv
                pl.BlockSpec((1, 1, H), lambda l: (l, 0, 0)),      # ln2_g
                pl.BlockSpec((1, 1, H), lambda l: (l, 0, 0)),      # ln2_b
                pl.BlockSpec((1, H, WF), lambda l: (l, 0, 0)),     # w1_cat (bf16)
                pl.BlockSpec((1, 1, WF), lambda l: (l, 0, 0)),     # b1_cat
                pl.BlockSpec((1, WF, H), lambda l: (l, 0, 0)),     # w2_stack (bf16)
                pl.BlockSpec((1, M, H), lambda l: (l, 0, 0)),      # per-row b2 select
            ],
            out_specs=pl.BlockSpec((M, H), lambda l: (0, 0)),      # resident carry
        ),
        compiler_params=pltpu.CompilerParams(dimension_semantics=("arbitrary",)),
        cost_estimate=pl.CostEstimate(flops=flops, transcendentals=transcendentals,
                                      bytes_accessed=bytes_accessed),
    )(xf, mask_full, perm, emask_wide,
      params["ln1_g"], params["ln1_b"], wqkv, bqkv,
      params["ln2_g"], params["ln2_b"],
      w1_cat, b1_cat, w2_stack, b2_sel)
    return out.reshape(B, T, H)


# ----------------------------- parameters / buffers -------------------------------------
def make_pe(max_len, d_model):
    position = jnp.arange(max_len, dtype=jnp.float32)[:, None]
    div_term = jnp.exp(jnp.arange(0, d_model, 2, dtype=jnp.float32)
                       * (-math.log(10000.0) / d_model))
    ang = position * div_term
    pe = jnp.zeros((max_len, d_model), jnp.float32)
    pe = pe.at[:, 0::2].set(jnp.sin(ang))
    pe = pe.at[:, 1::2].set(jnp.cos(ang))
    return pe


def init_params(key):
    """Weights stacked over layers; Q/K/V fused into one (L, H, 3H) weight."""
    L = NUM_LAYERS

    def nrm(k, shape, std=0.02):
        return jax.random.normal(k, shape, jnp.float32) * std

    k1, k2, k3, k4, k5 = jax.random.split(key, 5)
    wq = nrm(k1, (L, HIDDEN, HIDDEN))
    wk = nrm(k2, (L, HIDDEN, HIDDEN))
    wv = nrm(k3, (L, HIDDEN, HIDDEN))
    return dict(
        ln1_g=jnp.ones((L, 1, HIDDEN), jnp.float32),
        ln1_b=jnp.zeros((L, 1, HIDDEN), jnp.float32),
        ln2_g=jnp.ones((L, 1, HIDDEN), jnp.float32),
        ln2_b=jnp.zeros((L, 1, HIDDEN), jnp.float32),
        wqkv=jnp.concatenate([wq, wk, wv], axis=-1),          # (L, H, 3H)
        bqkv=jnp.zeros((L, 1, 3 * HIDDEN), jnp.float32),      # Linear biases init to 0
        w1=nrm(k4, (L, N_EXPERTS, HIDDEN, DIM_FF)),
        b1=jnp.zeros((L, N_EXPERTS, 1, DIM_FF), jnp.float32),
        w2=nrm(k5, (L, N_EXPERTS, DIM_FF, HIDDEN)),
        b2=jnp.zeros((L, N_EXPERTS, 1, HIDDEN), jnp.float32),
    )


if __name__ == "__main__":
    key = jax.random.PRNGKey(0)
    kx, kt, kp = jax.random.split(key, 3)
    x = jax.random.normal(kx, (BATCH, NUM_NOTE, HIDDEN), jnp.float32)
    # all notes valid; note_pos holds the (1-based) compacted index of each note
    note_pos = jnp.arange(1, BATCH * NUM_NOTE + 1, dtype=jnp.int32).reshape(BATCH, NUM_NOTE)
    note_type_pos = jax.random.randint(kt, (BATCH * NUM_NOTE,), 0, N_EXPERTS,
                                       dtype=jnp.int32)
    params = init_params(kp)
    pe = make_pe(2048, HIDDEN)

    fwd = jax.jit(functools.partial(note_patient_encoder_forward, exact_gelu=True))
    try:
        out = jax.block_until_ready(fwd(x, note_pos, note_type_pos, params, pe))
    except Exception:
        # TODO(synk): exact-erf GELU failed to lower in Mosaic on this jax; tanh fallback.
        fwd = jax.jit(functools.partial(note_patient_encoder_forward, exact_gelu=False))
        out = jax.block_until_ready(fwd(x, note_pos, note_type_pos, params, pe))

    assert out.shape == (BATCH, NUM_NOTE, HIDDEN)
    assert bool(jnp.all(jnp.isfinite(out)))
    print("KERNEL_OK")
</pallas_src>

<mosaic_0001>
module attributes {stable_mosaic.version = 11 : i64} {
  func.func @fused_encoder_kernel(%arg0: i32, %arg1: memref<16x128xf32, #tpu.memory_space<vmem>>, %arg2: memref<16x16xf32, #tpu.memory_space<vmem>>, %arg3: memref<16x16xf32, #tpu.memory_space<vmem>>, %arg4: memref<16x1024xf32, #tpu.memory_space<vmem>>, %arg5: memref<1x1x128xf32, #tpu.memory_space<vmem>>, %arg6: memref<1x1x128xf32, #tpu.memory_space<vmem>>, %arg7: memref<1x128x384xbf16, #tpu.memory_space<vmem>>, %arg8: memref<1x1x384xf32, #tpu.memory_space<vmem>>, %arg9: memref<1x1x128xf32, #tpu.memory_space<vmem>>, %arg10: memref<1x1x128xf32, #tpu.memory_space<vmem>>, %arg11: memref<1x128x1024xbf16, #tpu.memory_space<vmem>>, %arg12: memref<1x1x1024xf32, #tpu.memory_space<vmem>>, %arg13: memref<1x1024x128xbf16, #tpu.memory_space<vmem>>, %arg14: memref<1x16x128xf32, #tpu.memory_space<vmem>>, %arg15: memref<16x128xf32, #tpu.memory_space<vmem>>) attributes {dimension_semantics = [#tpu.dimension_semantics<arbitrary>], iteration_bounds = array<i64: 2>, scalar_prefetch = 0 : i64, scratch_operands = 0 : i64, tpu.core_type = #tpu.core_type<tc>, window_params = [{pipeline_mode = #tpu.pipeline_mode<synchronous>, transform_indices = @transform_0, window_bounds = array<i64: 16, 128>}, {pipeline_mode = #tpu.pipeline_mode<synchronous>, transform_indices = @transform_1, window_bounds = array<i64: 16, 16>}, {pipeline_mode = #tpu.pipeline_mode<synchronous>, transform_indices = @transform_2, window_bounds = array<i64: 16, 16>}, {pipeline_mode = #tpu.pipeline_mode<synchronous>, transform_indices = @transform_3, window_bounds = array<i64: 16, 1024>}, {transform_indices = @transform_4, window_bounds = array<i64: 1, 1, 128>}, {transform_indices = @transform_5, window_bounds = array<i64: 1, 1, 128>}, {transform_indices = @transform_6, window_bounds = array<i64: 1, 128, 384>}, {transform_indices = @transform_7, window_bounds = array<i64: 1, 1, 384>}, {transform_indices = @transform_8, window_bounds = array<i64: 1, 1, 128>}, {transform_indices = @transform_9, window_bounds = array<i64: 1, 1, 128>}, {transform_indices = @transform_10, window_bounds = array<i64: 1, 128, 1024>}, {transform_indices = @transform_11, window_bounds = array<i64: 1, 1, 1024>}, {transform_indices = @transform_12, window_bounds = array<i64: 1, 1024, 128>}, {transform_indices = @transform_13, window_bounds = array<i64: 1, 16, 128>}, {pipeline_mode = #tpu.pipeline_mode<synchronous>, transform_indices = @transform_14, window_bounds = array<i64: 16, 128>}]} {
    %c0_i32 = arith.constant 0 : i32
    %0 = arith.cmpi eq, %arg0, %c0_i32 : i32
    %1 = arith.extui %0 : i1 to i32
    %c0_i32_0 = arith.constant 0 : i32
    %2 = arith.cmpi ne, %1, %c0_i32_0 : i32
    scf.if %2 {
      %c0_64 = arith.constant 0 : index
      %c0_65 = arith.constant 0 : index
      %128 = vector.load %arg1[%c0_64, %c0_65] : memref<16x128xf32, #tpu.memory_space<vmem>>, vector<16x128xf32>
      %c0_66 = arith.constant 0 : index
      %c0_67 = arith.constant 0 : index
      %129 = vector.load %arg15[%c0_66, %c0_67] : memref<16x128xf32, #tpu.memory_space<vmem>>, vector<16x128xf32>
      tpu.vector_store %arg15[%c0_66, %c0_67], %128 {strides = array<i32>} : memref<16x128xf32, #tpu.memory_space<vmem>>, vector<16x128xf32>,
    } else {
    }
    %c0 = arith.constant 0 : index
    %c0_1 = arith.constant 0 : index
    %3 = vector.load %arg15[%c0, %c0_1] : memref<16x128xf32, #tpu.memory_space<vmem>>, vector<16x128xf32>
    %c0_2 = arith.constant 0 : index
    %c0_3 = arith.constant 0 : index
    %4 = vector.load %arg2[%c0_2, %c0_3] : memref<16x16xf32, #tpu.memory_space<vmem>>, vector<16x16xf32>
    %c0_4 = arith.constant 0 : index
    %c0_5 = arith.constant 0 : index
    %c0_6 = arith.constant 0 : index
    %5 = vector.load %arg5[%c0_4, %c0_5, %c0_6] : memref<1x1x128xf32, #tpu.memory_space<vmem>>, vector<1x1x128xf32>
    %6 = vector.shape_cast %5 : vector<1x1x128xf32> to vector<1x128xf32>
    %c0_7 = arith.constant 0 : index
    %c0_8 = arith.constant 0 : index
    %c0_9 = arith.constant 0 : index
    %7 = vector.load %arg6[%c0_7, %c0_8, %c0_9] : memref<1x1x128xf32, #tpu.memory_space<vmem>>, vector<1x1x128xf32>
    %8 = vector.shape_cast %7 : vector<1x1x128xf32> to vector<1x128xf32>
    %cst = arith.constant dense<0.000000e+00> : vector<16xf32>
    %9 = vector.multi_reduction <add>, %3, %cst [1] : vector<16x128xf32> to vector<16xf32>
    %10 = vector.shape_cast %9 : vector<16xf32> to vector<16x1xf32>
    %cst_10 = arith.constant 1.280000e+02 : f32
    %11 = vector.broadcast %cst_10 : f32 to vector<16x1xf32>
    %12 = arith.divf %10, %11 : vector<16x1xf32>
    %13 = vector.broadcast %12 : vector<16x1xf32> to vector<16x128xf32>
    %14 = arith.subf %3, %13 : vector<16x128xf32>
    %15 = arith.mulf %14, %14 : vector<16x128xf32>
    %cst_11 = arith.constant dense<0.000000e+00> : vector<16xf32>
    %16 = vector.multi_reduction <add>, %15, %cst_11 [1] : vector<16x128xf32> to vector<16xf32>
    %17 = vector.shape_cast %16 : vector<16xf32> to vector<16x1xf32>
    %cst_12 = arith.constant 1.280000e+02 : f32
    %18 = vector.broadcast %cst_12 : f32 to vector<16x1xf32>
    %19 = arith.divf %17, %18 : vector<16x1xf32>
    %20 = vector.broadcast %12 : vector<16x1xf32> to vector<16x128xf32>
    %21 = arith.subf %3, %20 : vector<16x128xf32>
    %cst_13 = arith.constant 9.99999974E-6 : f32
    %22 = vector.broadcast %cst_13 : f32 to vector<16x1xf32>
    %23 = arith.addf %19, %22 : vector<16x1xf32>
    %24 = math.rsqrt %23 : vector<16x1xf32>
    %25 = vector.broadcast %24 : vector<16x1xf32> to vector<16x128xf32>
    %26 = arith.mulf %21, %25 : vector<16x128xf32>
    %27 = vector.broadcast %6 : vector<1x128xf32> to vector<16x128xf32>
    %28 = arith.mulf %26, %27 : vector<16x128xf32>
    %29 = vector.broadcast %8 : vector<1x128xf32> to vector<16x128xf32>
    %30 = arith.addf %28, %29 : vector<16x128xf32>
    %31 = arith.truncf %30 : vector<16x128xf32> to vector<16x128xbf16>
    %c0_14 = arith.constant 0 : index
    %c0_15 = arith.constant 0 : index
    %c0_16 = arith.constant 0 : index
    %32 = vector.load %arg7[%c0_14, %c0_15, %c0_16] : memref<1x128x384xbf16, #tpu.memory_space<vmem>>, vector<1x128x384xbf16>
    %33 = vector.shape_cast %32 : vector<1x128x384xbf16> to vector<128x384xbf16>
    %cst_17 = arith.constant dense<0.000000e+00> : vector<16x384xf32>
    %34 = tpu.matmul %31, %33, %cst_17 {dimension_numbers = #tpu.dot_dimension_numbers<[1], [0], [0], [1], [0, 0, 1, 1], [], []>} : vector<16x128xbf16>, vector<128x384xbf16>, vector<16x384xf32> -> vector<16x384xf32>
    %c0_18 = arith.constant 0 : index
    %c0_19 = arith.constant 0 : index
    %c0_20 = arith.constant 0 : index
    %35 = vector.load %arg8[%c0_18, %c0_19, %c0_20] : memref<1x1x384xf32, #tpu.memory_space<vmem>>, vector<1x1x384xf32>
    %36 = vector.shape_cast %35 : vector<1x1x384xf32> to vector<1x384xf32>
    %37 = vector.broadcast %36 : vector<1x384xf32> to vector<16x384xf32>
    %38 = arith.addf %34, %37 : vector<16x384xf32>
    %39 = vector.extract_strided_slice %38 {offsets = [0, 0], sizes = [16, 64], strides = [1, 1]} : vector<16x384xf32> to vector<16x64xf32>
    %40 = vector.extract_strided_slice %38 {offsets = [0, 128], sizes = [16, 64], strides = [1, 1]} : vector<16x384xf32> to vector<16x64xf32>
    %41 = vector.extract_strided_slice %38 {offsets = [0, 256], sizes = [16, 64], strides = [1, 1]} : vector<16x384xf32> to vector<16x64xf32>
    %cst_21 = arith.constant dense<0.000000e+00> : vector<16x16xf32>
    %42 = tpu.matmul %39, %40, %cst_21 {dimension_numbers = #tpu.dot_dimension_numbers<[1], [1], [0], [0], [0, 0, 1, 0], [], []>} : vector<16x64xf32>, vector<16x64xf32>, vector<16x16xf32> -> vector<16x16xf32>
    %43 = arith.addf %42, %4 : vector<16x16xf32>
    %cst_22 = arith.constant dense<0xFF800000> : vector<16xf32>
    %44 = vector.multi_reduction <maximumf>, %43, %cst_22 [1] : vector<16x16xf32> to vector<16xf32>
    %45 = vector.shape_cast %44 : vector<16xf32> to vector<16x1xf32>
    %46 = vector.broadcast %45 : vector<16x1xf32> to vector<16x16xf32>
    %47 = arith.subf %43, %46 : vector<16x16xf32>
    %48 = math.exp %47 : vector<16x16xf32>
    %cst_23 = arith.constant dense<0.000000e+00> : vector<16xf32>
    %49 = vector.multi_reduction <add>, %48, %cst_23 [1] : vector<16x16xf32> to vector<16xf32>
    %50 = vector.shape_cast %49 : vector<16xf32> to vector<16x1xf32>
    %51 = tpu.reciprocal %50 {approx = true} : vector<16x1xf32> -> vector<16x1xf32>
    %52 = vector.broadcast %51 : vector<16x1xf32> to vector<16x16xf32>
    %53 = arith.mulf %48, %52 : vector<16x16xf32>
    %cst_24 = arith.constant dense<0.000000e+00> : vector<16x64xf32>
    %54 = tpu.matmul %53, %41, %cst_24 {dimension_numbers = #tpu.dot_dimension_numbers<[1], [0], [0], [1], [0, 0, 1, 1], [], []>} : vector<16x16xf32>, vector<16x64xf32>, vector<16x64xf32> -> vector<16x64xf32>
    %55 = vector.extract_strided_slice %38 {offsets = [0, 64], sizes = [16, 64], strides = [1, 1]} : vector<16x384xf32> to vector<16x64xf32>
    %56 = vector.extract_strided_slice %38 {offsets = [0, 192], sizes = [16, 64], strides = [1, 1]} : vector<16x384xf32> to vector<16x64xf32>
    %57 = vector.extract_strided_slice %38 {offsets = [0, 320], sizes = [16, 64], strides = [1, 1]} : vector<16x384xf32> to vector<16x64xf32>
    %cst_25 = arith.constant dense<0.000000e+00> : vector<16x16xf32>
    %58 = tpu.matmul %55, %56, %cst_25 {dimension_numbers = #tpu.dot_dimension_numbers<[1], [1], [0], [0], [0, 0, 1, 0], [], []>} : vector<16x64xf32>, vector<16x64xf32>, vector<16x16xf32> -> vector<16x16xf32>
    %59 = arith.addf %58, %4 : vector<16x16xf32>
    %cst_26 = arith.constant dense<0xFF800000> : vector<16xf32>
    %60 = vector.multi_reduction <maximumf>, %59, %cst_26 [1] : vector<16x16xf32> to vector<16xf32>
    %61 = vector.shape_cast %60 : vector<16xf32> to vector<16x1xf32>
    %62 = vector.broadcast %61 : vector<16x1xf32> to vector<16x16xf32>
    %63 = arith.subf %59, %62 : vector<16x16xf32>
    %64 = math.exp %63 : vector<16x16xf32>
    %cst_27 = arith.constant dense<0.000000e+00> : vector<16xf32>
    %65 = vector.multi_reduction <add>, %64, %cst_27 [1] : vector<16x16xf32> to vector<16xf32>
    %66 = vector.shape_cast %65 : vector<16xf32> to vector<16x1xf32>
    %67 = tpu.reciprocal %66 {approx = true} : vector<16x1xf32> -> vector<16x1xf32>
    %68 = vector.broadcast %67 : vector<16x1xf32> to vector<16x16xf32>
    %69 = arith.mulf %64, %68 : vector<16x16xf32>
    %cst_28 = arith.constant dense<0.000000e+00> : vector<16x64xf32>
    %70 = tpu.matmul %69, %57, %cst_28 {dimension_numbers = #tpu.dot_dimension_numbers<[1], [0], [0], [1], [0, 0, 1, 1], [], []>} : vector<16x16xf32>, vector<16x64xf32>, vector<16x64xf32> -> vector<16x64xf32>
    %71 = tpu.concatenate %54, %70 in 1 : vector<16x64xf32>, vector<16x64xf32> -> vector<16x128xf32>
    %72 = arith.addf %3, %71 : vector<16x128xf32>
    %c0_29 = arith.constant 0 : index
    %c0_30 = arith.constant 0 : index
    %c0_31 = arith.constant 0 : index
    %73 = vector.load %arg9[%c0_29, %c0_30, %c0_31] : memref<1x1x128xf32, #tpu.memory_space<vmem>>, vector<1x1x128xf32>
    %74 = vector.shape_cast %73 : vector<1x1x128xf32> to vector<1x128xf32>
    %c0_32 = arith.constant 0 : index
    %c0_33 = arith.constant 0 : index
    %c0_34 = arith.constant 0 : index
    %75 = vector.load %arg10[%c0_32, %c0_33, %c0_34] : memref<1x1x128xf32, #tpu.memory_space<vmem>>, vector<1x1x128xf32>
    %76 = vector.shape_cast %75 : vector<1x1x128xf32> to vector<1x128xf32>
    %cst_35 = arith.constant dense<0.000000e+00> : vector<16xf32>
    %77 = vector.multi_reduction <add>, %72, %cst_35 [1] : vector<16x128xf32> to vector<16xf32>
    %78 = vector.shape_cast %77 : vector<16xf32> to vector<16x1xf32>
    %cst_36 = arith.constant 1.280000e+02 : f32
    %79 = vector.broadcast %cst_36 : f32 to vector<16x1xf32>
    %80 = arith.divf %78, %79 : vector<16x1xf32>
    %81 = vector.broadcast %80 : vector<16x1xf32> to vector<16x128xf32>
    %82 = arith.subf %72, %81 : vector<16x128xf32>
    %83 = arith.mulf %82, %82 : vector<16x128xf32>
    %cst_37 = arith.constant dense<0.000000e+00> : vector<16xf32>
    %84 = vector.multi_reduction <add>, %83, %cst_37 [1] : vector<16x128xf32> to vector<16xf32>
    %85 = vector.shape_cast %84 : vector<16xf32> to vector<16x1xf32>
    %cst_38 = arith.constant 1.280000e+02 : f32
    %86 = vector.broadcast %cst_38 : f32 to vector<16x1xf32>
    %87 = arith.divf %85, %86 : vector<16x1xf32>
    %88 = vector.broadcast %80 : vector<16x1xf32> to vector<16x128xf32>
    %89 = arith.subf %72, %88 : vector<16x128xf32>
    %cst_39 = arith.constant 9.99999974E-6 : f32
    %90 = vector.broadcast %cst_39 : f32 to vector<16x1xf32>
    %91 = arith.addf %87, %90 : vector<16x1xf32>
    %92 = math.rsqrt %91 : vector<16x1xf32>
    %93 = vector.broadcast %92 : vector<16x1xf32> to vector<16x128xf32>
    %94 = arith.mulf %89, %93 : vector<16x128xf32>
    %95 = vector.broadcast %74 : vector<1x128xf32> to vector<16x128xf32>
    %96 = arith.mulf %94, %95 : vector<16x128xf32>
    %97 = vector.broadcast %76 : vector<1x128xf32> to vector<16x128xf32>
    %98 = arith.addf %96, %97 : vector<16x128xf32>
    %99 = arith.truncf %98 : vector<16x128xf32> to vector<16x128xbf16>
    %c0_40 = arith.constant 0 : index
    %c0_41 = arith.constant 0 : index
    %c0_42 = arith.constant 0 : index
    %100 = vector.load %arg11[%c0_40, %c0_41, %c0_42] : memref<1x128x1024xbf16, #tpu.memory_space<vmem>>, vector<1x128x1024xbf16>
    %101 = vector.shape_cast %100 : vector<1x128x1024xbf16> to vector<128x1024xbf16>
    %cst_43 = arith.constant dense<0.000000e+00> : vector<16x1024xf32>
    %102 = tpu.matmul %99, %101, %cst_43 {dimension_numbers = #tpu.dot_dimension_numbers<[1], [0], [0], [1], [0, 0, 1, 1], [], []>} : vector<16x128xbf16>, vector<128x1024xbf16>, vector<16x1024xf32> -> vector<16x1024xf32>
    %c0_44 = arith.constant 0 : index
    %c0_45 = arith.constant 0 : index
    %c0_46 = arith.constant 0 : index
    %103 = vector.load %arg12[%c0_44, %c0_45, %c0_46] : memref<1x1x1024xf32, #tpu.memory_space<vmem>>, vector<1x1x1024xf32>
    %104 = vector.shape_cast %103 : vector<1x1x1024xf32> to vector<1x1024xf32>
    %105 = vector.broadcast %104 : vector<1x1024xf32> to vector<16x1024xf32>
    %106 = arith.addf %102, %105 : vector<16x1024xf32>
    %cst_47 = arith.constant 5.000000e-01 : f32
    %107 = vector.broadcast %cst_47 : f32 to vector<16x1024xf32>
    %108 = arith.mulf %107, %106 : vector<16x1024xf32>
    %cst_48 = arith.constant 0.707106769 : f32
    %109 = vector.broadcast %cst_48 : f32 to vector<16x1024xf32>
    %110 = arith.mulf %106, %109 : vector<16x1024xf32>
    %111 = math.erf %110 : vector<16x1024xf32>
    %cst_49 = arith.constant 1.000000e+00 : f32
    %112 = vector.broadcast %cst_49 : f32 to vector<16x1024xf32>
    %113 = arith.addf %112, %111 : vector<16x1024xf32>
    %114 = arith.mulf %108, %113 : vector<16x1024xf32>
    %c0_50 = arith.constant 0 : index
    %c0_51 = arith.constant 0 : index
    %115 = vector.load %arg4[%c0_50, %c0_51] : memref<16x1024xf32, #tpu.memory_space<vmem>>, vector<16x1024xf32>
    %116 = arith.mulf %114, %115 : vector<16x1024xf32>
    %117 = arith.truncf %116 : vector<16x1024xf32> to vector<16x1024xbf16>
    %c0_52 = arith.constant 0 : index
    %c0_53 = arith.constant 0 : index
    %c0_54 = arith.constant 0 : index
    %118 = vector.load %arg13[%c0_52, %c0_53, %c0_54] : memref<1x1024x128xbf16, #tpu.memory_space<vmem>>, vector<1x1024x128xbf16>
    %119 = vector.shape_cast %118 : vector<1x1024x128xbf16> to vector<1024x128xbf16>
    %cst_55 = arith.constant dense<0.000000e+00> : vector<16x128xf32>
    %120 = tpu.matmul %117, %119, %cst_55 {dimension_numbers = #tpu.dot_dimension_numbers<[1], [0], [0], [1], [0, 0, 1, 1], [], []>} : vector<16x1024xbf16>, vector<1024x128xbf16>, vector<16x128xf32> -> vector<16x128xf32>
    %c0_56 = arith.constant 0 : index
    %c0_57 = arith.constant 0 : index
    %c0_58 = arith.constant 0 : index
    %121 = vector.load %arg14[%c0_56, %c0_57, %c0_58] : memref<1x16x128xf32, #tpu.memory_space<vmem>>, vector<1x16x128xf32>
    %122 = vector.shape_cast %121 : vector<1x16x128xf32> to vector<16x128xf32>
    %123 = arith.addf %120, %122 : vector<16x128xf32>
    %124 = arith.addf %72, %123 : vector<16x128xf32>
    %c0_59 = arith.constant 0 : index
    %c0_60 = arith.constant 0 : index
    %125 = vector.load %arg3[%c0_59, %c0_60] : memref<16x16xf32, #tpu.memory_space<vmem>>, vector<16x16xf32>
    %cst_61 = arith.constant dense<0.000000e+00> : vector<16x128xf32>
    %126 = tpu.matmul %125, %124, %cst_61 {dimension_numbers = #tpu.dot_dimension_numbers<[1], [0], [0], [1], [0, 0, 1, 1], [], []>} : vector<16x16xf32>, vector<16x128xf32>, vector<16x128xf32> -> vector<16x128xf32>
    %c0_62 = arith.constant 0 : index
    %c0_63 = arith.constant 0 : index
    %127 = vector.load %arg15[%c0_62, %c0_63] : memref<16x128xf32, #tpu.memory_space<vmem>>, vector<16x128xf32>
    tpu.vector_store %arg15[%c0_62, %c0_63], %126 {strides = array<i32>} : memref<16x128xf32, #tpu.memory_space<vmem>>, vector<16x128xf32>,
    return
  }
  func.func @transform_0(%arg0: i32) -> (i32, i32) {
    %c0_i32 = arith.constant 0 : i32
    %c0_i32_0 = arith.constant 0 : i32
    %c0_i32_1 = arith.constant 0 : i32
    return %c0_i32, %c0_i32_0 : i32, i32
  }
  func.func @transform_1(%arg0: i32) -> (i32, i32) {
    %c0_i32 = arith.constant 0 : i32
    %c0_i32_0 = arith.constant 0 : i32
    %c0_i32_1 = arith.constant 0 : i32
    return %c0_i32, %c0_i32_0 : i32, i32
  }
  func.func @transform_2(%arg0: i32) -> (i32, i32) {
    %c0_i32 = arith.constant 0 : i32
    %c0_i32_0 = arith.constant 0 : i32
    %c0_i32_1 = arith.constant 0 : i32
    return %c0_i32, %c0_i32_0 : i32, i32
  }
  func.func @transform_3(%arg0: i32) -> (i32, i32) {
    %c0_i32 = arith.constant 0 : i32
    %c0_i32_0 = arith.constant 0 : i32
    %c0_i32_1 = arith.constant 0 : i32
    return %c0_i32, %c0_i32_0 : i32, i32
  }
  func.func @transform_4(%arg0: i32) -> (i32, i32, i32) {
    %c0_i32 = arith.constant 0 : i32
    %c0_i32_0 = arith.constant 0 : i32
    %c0_i32_1 = arith.constant 0 : i32
    return %arg0, %c0_i32, %c0_i32_0 : i32, i32, i32
  }
  func.func @transform_5(%arg0: i32) -> (i32, i32, i32) {
    %c0_i32 = arith.constant 0 : i32
    %c0_i32_0 = arith.constant 0 : i32
    %c0_i32_1 = arith.constant 0 : i32
    return %arg0, %c0_i32, %c0_i32_0 : i32, i32, i32
  }
  func.func @transform_6(%arg0: i32) -> (i32, i32, i32) {
    %c0_i32 = arith.constant 0 : i32
    %c0_i32_0 = arith.constant 0 : i32
    %c0_i32_1 = arith.constant 0 : i32
    return %arg0, %c0_i32, %c0_i32_0 : i32, i32, i32
  }
  func.func @transform_7(%arg0: i32) -> (i32, i32, i32) {
    %c0_i32 = arith.constant 0 : i32
    %c0_i32_0 = arith.constant 0 : i32
    %c0_i32_1 = arith.constant 0 : i32
    return %arg0, %c0_i32, %c0_i32_0 : i32, i32, i32
  }
  func.func @transform_8(%arg0: i32) -> (i32, i32, i32) {
    %c0_i32 = arith.constant 0 : i32
    %c0_i32_0 = arith.constant 0 : i32
    %c0_i32_1 = arith.constant 0 : i32
    return %arg0, %c0_i32, %c0_i32_0 : i32, i32, i32
  }
  func.func @transform_9(%arg0: i32) -> (i32, i32, i32) {
    %c0_i32 = arith.constant 0 : i32
    %c0_i32_0 = arith.constant 0 : i32
    %c0_i32_1 = arith.constant 0 : i32
    return %arg0, %c0_i32, %c0_i32_0 : i32, i32, i32
  }
  func.func @transform_10(%arg0: i32) -> (i32, i32, i32) {
    %c0_i32 = arith.constant 0 : i32
    %c0_i32_0 = arith.constant 0 : i32
    %c0_i32_1 = arith.constant 0 : i32
    return %arg0, %c0_i32, %c0_i32_0 : i32, i32, i32
  }
  func.func @transform_11(%arg0: i32) -> (i32, i32, i32) {
    %c0_i32 = arith.constant 0 : i32
    %c0_i32_0 = arith.constant 0 : i32
    %c0_i32_1 = arith.constant 0 : i32
    return %arg0, %c0_i32, %c0_i32_0 : i32, i32, i32
  }
  func.func @transform_12(%arg0: i32) -> (i32, i32, i32) {
    %c0_i32 = arith.constant 0 : i32
    %c0_i32_0 = arith.constant 0 : i32
    %c0_i32_1 = arith.constant 0 : i32
    return %arg0, %c0_i32, %c0_i32_0 : i32, i32, i32
  }
  func.func @transform_13(%arg0: i32) -> (i32, i32, i32) {
    %c0_i32 = arith.constant 0 : i32
    %c0_i32_0 = arith.constant 0 : i32
    %c0_i32_1 = arith.constant 0 : i32
    return %arg0, %c0_i32, %c0_i32_0 : i32, i32, i32
  }
  func.func @transform_14(%arg0: i32) -> (i32, i32) {
    %c0_i32 = arith.constant 0 : i32
    %c0_i32_0 = arith.constant 0 : i32
    %c0_i32_1 = arith.constant 0 : i32
    return %c0_i32, %c0_i32_0 : i32, i32
  }
}

module attributes {stable_mosaic.version = 11 : i64} {
  func.func @fused_encoder_kernel(%arg0: i32, %arg1: memref<16x128xf32, #tpu.memory_space<vmem>>, %arg2: memref<16x16xf32, #tpu.memory_space<vmem>>, %arg3: memref<16x16xf32, #tpu.memory_space<vmem>>, %arg4: memref<16x1024xf32, #tpu.memory_space<vmem>>, %arg5: memref<1x1x128xf32, #tpu.memory_space<vmem>>, %arg6: memref<1x1x128xf32, #tpu.memory_space<vmem>>, %arg7: memref<1x128x384xbf16, #tpu.memory_space<vmem>>, %arg8: memref<1x1x384xf32, #tpu.memory_space<vmem>>, %arg9: memref<1x1x128xf32, #tpu.memory_space<vmem>>, %arg10: memref<1x1x128xf32, #tpu.memory_space<vmem>>, %arg11: memref<1x128x1024xbf16, #tpu.memory_space<vmem>>, %arg12: memref<1x1x1024xf32, #tpu.memory_space<vmem>>, %arg13: memref<1x1024x128xbf16, #tpu.memory_space<vmem>>, %arg14: memref<1x16x128xf32, #tpu.memory_space<vmem>>, %arg15: memref<16x128xf32, #tpu.memory_space<vmem>>) attributes {dimension_semantics = [#tpu.dimension_semantics<arbitrary>], iteration_bounds = array<i64: 2>, scalar_prefetch = 0 : i64, scratch_operands = 0 : i64, tpu.core_type = #tpu.core_type<tc>, window_params = [{pipeline_mode = #tpu.pipeline_mode<synchronous>, transform_indices = @transform_0, window_bounds = array<i64: 16, 128>}, {pipeline_mode = #tpu.pipeline_mode<synchronous>, transform_indices = @transform_1, window_bounds = array<i64: 16, 16>}, {pipeline_mode = #tpu.pipeline_mode<synchronous>, transform_indices = @transform_2, window_bounds = array<i64: 16, 16>}, {pipeline_mode = #tpu.pipeline_mode<synchronous>, transform_indices = @transform_3, window_bounds = array<i64: 16, 1024>}, {transform_indices = @transform_4, window_bounds = array<i64: 1, 1, 128>}, {transform_indices = @transform_5, window_bounds = array<i64: 1, 1, 128>}, {transform_indices = @transform_6, window_bounds = array<i64: 1, 128, 384>}, {transform_indices = @transform_7, window_bounds = array<i64: 1, 1, 384>}, {transform_indices = @transform_8, window_bounds = array<i64: 1, 1, 128>}, {transform_indices = @transform_9, window_bounds = array<i64: 1, 1, 128>}, {transform_indices = @transform_10, window_bounds = array<i64: 1, 128, 1024>}, {transform_indices = @transform_11, window_bounds = array<i64: 1, 1, 1024>}, {transform_indices = @transform_12, window_bounds = array<i64: 1, 1024, 128>}, {transform_indices = @transform_13, window_bounds = array<i64: 1, 16, 128>}, {pipeline_mode = #tpu.pipeline_mode<synchronous>, transform_indices = @transform_14, window_bounds = array<i64: 16, 128>}]} {
    %c0_i32 = arith.constant 0 : i32
    %0 = arith.cmpi eq, %arg0, %c0_i32 : i32
    %1 = arith.extui %0 : i1 to i32
    %c0_i32_0 = arith.constant 0 : i32
    %2 = arith.cmpi ne, %1, %c0_i32_0 : i32
    scf.if %2 {
      %c0_65 = arith.constant 0 : index
      %c0_66 = arith.constant 0 : index
      %133 = vector.load %arg1[%c0_65, %c0_66] : memref<16x128xf32, #tpu.memory_space<vmem>>, vector<16x128xf32>
      %c0_67 = arith.constant 0 : index
      %c0_68 = arith.constant 0 : index
      %134 = vector.load %arg15[%c0_67, %c0_68] : memref<16x128xf32, #tpu.memory_space<vmem>>, vector<16x128xf32>
      tpu.vector_store %arg15[%c0_67, %c0_68], %133 {strides = array<i32>} : memref<16x128xf32, #tpu.memory_space<vmem>>, vector<16x128xf32>,
    } else {
    }
    %c0 = arith.constant 0 : index
    %c0_1 = arith.constant 0 : index
    %3 = vector.load %arg15[%c0, %c0_1] : memref<16x128xf32, #tpu.memory_space<vmem>>, vector<16x128xf32>
    %c0_2 = arith.constant 0 : index
    %c0_3 = arith.constant 0 : index
    %4 = vector.load %arg2[%c0_2, %c0_3] : memref<16x16xf32, #tpu.memory_space<vmem>>, vector<16x16xf32>
    %c0_4 = arith.constant 0 : index
    %c0_5 = arith.constant 0 : index
    %c0_6 = arith.constant 0 : index
    %5 = vector.load %arg5[%c0_4, %c0_5, %c0_6] : memref<1x1x128xf32, #tpu.memory_space<vmem>>, vector<1x1x128xf32>
    %6 = vector.shape_cast %5 : vector<1x1x128xf32> to vector<1x128xf32>
    %c0_7 = arith.constant 0 : index
    %c0_8 = arith.constant 0 : index
    %c0_9 = arith.constant 0 : index
    %7 = vector.load %arg6[%c0_7, %c0_8, %c0_9] : memref<1x1x128xf32, #tpu.memory_space<vmem>>, vector<1x1x128xf32>
    %8 = vector.shape_cast %7 : vector<1x1x128xf32> to vector<1x128xf32>
    %cst = arith.constant dense<0.000000e+00> : vector<16xf32>
    %9 = vector.multi_reduction <add>, %3, %cst [1] : vector<16x128xf32> to vector<16xf32>
    %10 = vector.shape_cast %9 : vector<16xf32> to vector<16x1xf32>
    %cst_10 = arith.constant 1.280000e+02 : f32
    %11 = vector.broadcast %cst_10 : f32 to vector<16x1xf32>
    %12 = arith.divf %10, %11 : vector<16x1xf32>
    %13 = vector.broadcast %12 : vector<16x1xf32> to vector<16x128xf32>
    %14 = arith.subf %3, %13 : vector<16x128xf32>
    %15 = arith.mulf %14, %14 : vector<16x128xf32>
    %cst_11 = arith.constant dense<0.000000e+00> : vector<16xf32>
    %16 = vector.multi_reduction <add>, %15, %cst_11 [1] : vector<16x128xf32> to vector<16xf32>
    %17 = vector.shape_cast %16 : vector<16xf32> to vector<16x1xf32>
    %cst_12 = arith.constant 1.280000e+02 : f32
    %18 = vector.broadcast %cst_12 : f32 to vector<16x1xf32>
    %19 = arith.divf %17, %18 : vector<16x1xf32>
    %20 = vector.broadcast %12 : vector<16x1xf32> to vector<16x128xf32>
    %21 = arith.subf %3, %20 : vector<16x128xf32>
    %cst_13 = arith.constant 9.99999974E-6 : f32
    %22 = vector.broadcast %cst_13 : f32 to vector<16x1xf32>
    %23 = arith.addf %19, %22 : vector<16x1xf32>
    %24 = math.rsqrt %23 : vector<16x1xf32>
    %25 = vector.broadcast %24 : vector<16x1xf32> to vector<16x128xf32>
    %26 = arith.mulf %21, %25 : vector<16x128xf32>
    %27 = vector.broadcast %6 : vector<1x128xf32> to vector<16x128xf32>
    %28 = arith.mulf %26, %27 : vector<16x128xf32>
    %29 = vector.broadcast %8 : vector<1x128xf32> to vector<16x128xf32>
    %30 = arith.addf %28, %29 : vector<16x128xf32>
    %31 = arith.truncf %30 : vector<16x128xf32> to vector<16x128xbf16>
    %c0_14 = arith.constant 0 : index
    %c0_15 = arith.constant 0 : index
    %c0_16 = arith.constant 0 : index
    %32 = vector.load %arg7[%c0_14, %c0_15, %c0_16] : memref<1x128x384xbf16, #tpu.memory_space<vmem>>, vector<1x128x384xbf16>
    %33 = vector.shape_cast %32 : vector<1x128x384xbf16> to vector<128x384xbf16>
    %cst_17 = arith.constant dense<0.000000e+00> : vector<16x384xf32>
    %34 = tpu.matmul %31, %33, %cst_17 {dimension_numbers = #tpu.dot_dimension_numbers<[1], [0], [0], [1], [0, 0, 1, 1], [], []>} : vector<16x128xbf16>, vector<128x384xbf16>, vector<16x384xf32> -> vector<16x384xf32>
    %c0_18 = arith.constant 0 : index
    %c0_19 = arith.constant 0 : index
    %c0_20 = arith.constant 0 : index
    %35 = vector.load %arg8[%c0_18, %c0_19, %c0_20] : memref<1x1x384xf32, #tpu.memory_space<vmem>>, vector<1x1x384xf32>
    %36 = vector.shape_cast %35 : vector<1x1x384xf32> to vector<1x384xf32>
    %37 = vector.broadcast %36 : vector<1x384xf32> to vector<16x384xf32>
    %38 = arith.addf %34, %37 : vector<16x384xf32>
    %39 = vector.extract_strided_slice %38 {offsets = [0, 0], sizes = [16, 64], strides = [1, 1]} : vector<16x384xf32> to vector<16x64xf32>
    %40 = vector.extract_strided_slice %38 {offsets = [0, 128], sizes = [16, 64], strides = [1, 1]} : vector<16x384xf32> to vector<16x64xf32>
    %41 = vector.extract_strided_slice %38 {offsets = [0, 256], sizes = [16, 64], strides = [1, 1]} : vector<16x384xf32> to vector<16x64xf32>
    %cst_21 = arith.constant dense<0.000000e+00> : vector<16x16xf32>
    %42 = tpu.matmul %39, %40, %cst_21 {dimension_numbers = #tpu.dot_dimension_numbers<[1], [1], [0], [0], [0, 0, 1, 0], [], []>} : vector<16x64xf32>, vector<16x64xf32>, vector<16x16xf32> -> vector<16x16xf32>
    %43 = arith.addf %42, %4 : vector<16x16xf32>
    %cst_22 = arith.constant dense<0xFF800000> : vector<16xf32>
    %44 = vector.multi_reduction <maximumf>, %43, %cst_22 [1] : vector<16x16xf32> to vector<16xf32>
    %45 = vector.shape_cast %44 : vector<16xf32> to vector<16x1xf32>
    %46 = vector.broadcast %45 : vector<16x1xf32> to vector<16x16xf32>
    %47 = arith.subf %43, %46 : vector<16x16xf32>
    %48 = math.exp %47 : vector<16x16xf32>
    %cst_23 = arith.constant dense<0.000000e+00> : vector<16xf32>
    %49 = vector.multi_reduction <add>, %48, %cst_23 [1] : vector<16x16xf32> to vector<16xf32>
    %50 = vector.shape_cast %49 : vector<16xf32> to vector<16x1xf32>
    %51 = tpu.reciprocal %50 {approx = true} : vector<16x1xf32> -> vector<16x1xf32>
    %52 = vector.broadcast %51 : vector<16x1xf32> to vector<16x16xf32>
    %53 = arith.mulf %48, %52 : vector<16x16xf32>
    %cst_24 = arith.constant dense<0.000000e+00> : vector<16x64xf32>
    %54 = tpu.matmul %53, %41, %cst_24 {dimension_numbers = #tpu.dot_dimension_numbers<[1], [0], [0], [1], [0, 0, 1, 1], [], []>} : vector<16x16xf32>, vector<16x64xf32>, vector<16x64xf32> -> vector<16x64xf32>
    %55 = vector.extract_strided_slice %38 {offsets = [0, 64], sizes = [16, 64], strides = [1, 1]} : vector<16x384xf32> to vector<16x64xf32>
    %56 = vector.extract_strided_slice %38 {offsets = [0, 192], sizes = [16, 64], strides = [1, 1]} : vector<16x384xf32> to vector<16x64xf32>
    %57 = vector.extract_strided_slice %38 {offsets = [0, 320], sizes = [16, 64], strides = [1, 1]} : vector<16x384xf32> to vector<16x64xf32>
    %cst_25 = arith.constant dense<0.000000e+00> : vector<16x16xf32>
    %58 = tpu.matmul %55, %56, %cst_25 {dimension_numbers = #tpu.dot_dimension_numbers<[1], [1], [0], [0], [0, 0, 1, 0], [], []>} : vector<16x64xf32>, vector<16x64xf32>, vector<16x16xf32> -> vector<16x16xf32>
    %59 = arith.addf %58, %4 : vector<16x16xf32>
    %cst_26 = arith.constant dense<0xFF800000> : vector<16xf32>
    %60 = vector.multi_reduction <maximumf>, %59, %cst_26 [1] : vector<16x16xf32> to vector<16xf32>
    %61 = vector.shape_cast %60 : vector<16xf32> to vector<16x1xf32>
    %62 = vector.broadcast %61 : vector<16x1xf32> to vector<16x16xf32>
    %63 = arith.subf %59, %62 : vector<16x16xf32>
    %64 = math.exp %63 : vector<16x16xf32>
    %cst_27 = arith.constant dense<0.000000e+00> : vector<16xf32>
    %65 = vector.multi_reduction <add>, %64, %cst_27 [1] : vector<16x16xf32> to vector<16xf32>
    %66 = vector.shape_cast %65 : vector<16xf32> to vector<16x1xf32>
    %67 = tpu.reciprocal %66 {approx = true} : vector<16x1xf32> -> vector<16x1xf32>
    %68 = vector.broadcast %67 : vector<16x1xf32> to vector<16x16xf32>
    %69 = arith.mulf %64, %68 : vector<16x16xf32>
    %cst_28 = arith.constant dense<0.000000e+00> : vector<16x64xf32>
    %70 = tpu.matmul %69, %57, %cst_28 {dimension_numbers = #tpu.dot_dimension_numbers<[1], [0], [0], [1], [0, 0, 1, 1], [], []>} : vector<16x16xf32>, vector<16x64xf32>, vector<16x64xf32> -> vector<16x64xf32>
    %71 = tpu.concatenate %54, %70 in 1 : vector<16x64xf32>, vector<16x64xf32> -> vector<16x128xf32>
    %72 = arith.addf %3, %71 : vector<16x128xf32>
    %c0_29 = arith.constant 0 : index
    %c0_30 = arith.constant 0 : index
    %c0_31 = arith.constant 0 : index
    %73 = vector.load %arg9[%c0_29, %c0_30, %c0_31] : memref<1x1x128xf32, #tpu.memory_space<vmem>>, vector<1x1x128xf32>
    %74 = vector.shape_cast %73 : vector<1x1x128xf32> to vector<1x128xf32>
    %c0_32 = arith.constant 0 : index
    %c0_33 = arith.constant 0 : index
    %c0_34 = arith.constant 0 : index
    %75 = vector.load %arg10[%c0_32, %c0_33, %c0_34] : memref<1x1x128xf32, #tpu.memory_space<vmem>>, vector<1x1x128xf32>
    %76 = vector.shape_cast %75 : vector<1x1x128xf32> to vector<1x128xf32>
    %cst_35 = arith.constant dense<0.000000e+00> : vector<16xf32>
    %77 = vector.multi_reduction <add>, %72, %cst_35 [1] : vector<16x128xf32> to vector<16xf32>
    %78 = vector.shape_cast %77 : vector<16xf32> to vector<16x1xf32>
    %cst_36 = arith.constant 1.280000e+02 : f32
    %79 = vector.broadcast %cst_36 : f32 to vector<16x1xf32>
    %80 = arith.divf %78, %79 : vector<16x1xf32>
    %81 = vector.broadcast %80 : vector<16x1xf32> to vector<16x128xf32>
    %82 = arith.subf %72, %81 : vector<16x128xf32>
    %83 = arith.mulf %82, %82 : vector<16x128xf32>
    %cst_37 = arith.constant dense<0.000000e+00> : vector<16xf32>
    %84 = vector.multi_reduction <add>, %83, %cst_37 [1] : vector<16x128xf32> to vector<16xf32>
    %85 = vector.shape_cast %84 : vector<16xf32> to vector<16x1xf32>
    %cst_38 = arith.constant 1.280000e+02 : f32
    %86 = vector.broadcast %cst_38 : f32 to vector<16x1xf32>
    %87 = arith.divf %85, %86 : vector<16x1xf32>
    %88 = vector.broadcast %80 : vector<16x1xf32> to vector<16x128xf32>
    %89 = arith.subf %72, %88 : vector<16x128xf32>
    %cst_39 = arith.constant 9.99999974E-6 : f32
    %90 = vector.broadcast %cst_39 : f32 to vector<16x1xf32>
    %91 = arith.addf %87, %90 : vector<16x1xf32>
    %92 = math.rsqrt %91 : vector<16x1xf32>
    %93 = vector.broadcast %92 : vector<16x1xf32> to vector<16x128xf32>
    %94 = arith.mulf %89, %93 : vector<16x128xf32>
    %95 = vector.broadcast %74 : vector<1x128xf32> to vector<16x128xf32>
    %96 = arith.mulf %94, %95 : vector<16x128xf32>
    %97 = vector.broadcast %76 : vector<1x128xf32> to vector<16x128xf32>
    %98 = arith.addf %96, %97 : vector<16x128xf32>
    %99 = arith.truncf %98 : vector<16x128xf32> to vector<16x128xbf16>
    %c0_40 = arith.constant 0 : index
    %c0_41 = arith.constant 0 : index
    %c0_42 = arith.constant 0 : index
    %100 = vector.load %arg11[%c0_40, %c0_41, %c0_42] : memref<1x128x1024xbf16, #tpu.memory_space<vmem>>, vector<1x128x1024xbf16>
    %101 = vector.shape_cast %100 : vector<1x128x1024xbf16> to vector<128x1024xbf16>
    %cst_43 = arith.constant dense<0.000000e+00> : vector<16x1024xf32>
    %102 = tpu.matmul %99, %101, %cst_43 {dimension_numbers = #tpu.dot_dimension_numbers<[1], [0], [0], [1], [0, 0, 1, 1], [], []>} : vector<16x128xbf16>, vector<128x1024xbf16>, vector<16x1024xf32> -> vector<16x1024xf32>
    %c0_44 = arith.constant 0 : index
    %c0_45 = arith.constant 0 : index
    %c0_46 = arith.constant 0 : index
    %103 = vector.load %arg12[%c0_44, %c0_45, %c0_46] : memref<1x1x1024xf32, #tpu.memory_space<vmem>>, vector<1x1x1024xf32>
    %104 = vector.shape_cast %103 : vector<1x1x1024xf32> to vector<1x1024xf32>
    %105 = vector.broadcast %104 : vector<1x1024xf32> to vector<16x1024xf32>
    %106 = arith.addf %102, %105 : vector<16x1024xf32>
    %cst_47 = arith.constant 5.000000e-01 : f32
    %107 = vector.broadcast %cst_47 : f32 to vector<16x1024xf32>
    %108 = arith.mulf %107, %106 : vector<16x1024xf32>
    %cst_48 = arith.constant 4.471500e-02 : f32
    %109 = vector.broadcast %cst_48 : f32 to vector<16x1024xf32>
    %110 = arith.mulf %109, %106 : vector<16x1024xf32>
    %111 = arith.mulf %110, %106 : vector<16x1024xf32>
    %112 = arith.mulf %111, %106 : vector<16x1024xf32>
    %113 = arith.addf %106, %112 : vector<16x1024xf32>
    %cst_49 = arith.constant 0.797884583 : f32
    %114 = vector.broadcast %cst_49 : f32 to vector<16x1024xf32>
    %115 = arith.mulf %114, %113 : vector<16x1024xf32>
    %116 = math.tanh %115 : vector<16x1024xf32>
    %cst_50 = arith.constant 1.000000e+00 : f32
    %117 = vector.broadcast %cst_50 : f32 to vector<16x1024xf32>
    %118 = arith.addf %117, %116 : vector<16x1024xf32>
    %119 = arith.mulf %108, %118 : vector<16x1024xf32>
    %c0_51 = arith.constant 0 : index
    %c0_52 = arith.constant 0 : index
    %120 = vector.load %arg4[%c0_51, %c0_52] : memref<16x1024xf32, #tpu.memory_space<vmem>>, vector<16x1024xf32>
    %121 = arith.mulf %119, %120 : vector<16x1024xf32>
    %122 = arith.truncf %121 : vector<16x1024xf32> to vector<16x1024xbf16>
    %c0_53 = arith.constant 0 : index
    %c0_54 = arith.constant 0 : index
    %c0_55 = arith.constant 0 : index
    %123 = vector.load %arg13[%c0_53, %c0_54, %c0_55] : memref<1x1024x128xbf16, #tpu.memory_space<vmem>>, vector<1x1024x128xbf16>
    %124 = vector.shape_cast %123 : vector<1x1024x128xbf16> to vector<1024x128xbf16>
    %cst_56 = arith.constant dense<0.000000e+00> : vector<16x128xf32>
    %125 = tpu.matmul %122, %124, %cst_56 {dimension_numbers = #tpu.dot_dimension_numbers<[1], [0], [0], [1], [0, 0, 1, 1], [], []>} : vector<16x1024xbf16>, vector<1024x128xbf16>, vector<16x128xf32> -> vector<16x128xf32>
    %c0_57 = arith.constant 0 : index
    %c0_58 = arith.constant 0 : index
    %c0_59 = arith.constant 0 : index
    %126 = vector.load %arg14[%c0_57, %c0_58, %c0_59] : memref<1x16x128xf32, #tpu.memory_space<vmem>>, vector<1x16x128xf32>
    %127 = vector.shape_cast %126 : vector<1x16x128xf32> to vector<16x128xf32>
    %128 = arith.addf %125, %127 : vector<16x128xf32>
    %129 = arith.addf %72, %128 : vector<16x128xf32>
    %c0_60 = arith.constant 0 : index
    %c0_61 = arith.constant 0 : index
    %130 = vector.load %arg3[%c0_60, %c0_61] : memref<16x16xf32, #tpu.memory_space<vmem>>, vector<16x16xf32>
    %cst_62 = arith.constant dense<0.000000e+00> : vector<16x128xf32>
    %131 = tpu.matmul %130, %129, %cst_62 {dimension_numbers = #tpu.dot_dimension_numbers<[1], [0], [0], [1], [0, 0, 1, 1], [], []>} : vector<16x16xf32>, vector<16x128xf32>, vector<16x128xf32> -> vector<16x128xf32>
    %c0_63 = arith.constant 0 : index
    %c0_64 = arith.constant 0 : index
    %132 = vector.load %arg15[%c0_63, %c0_64] : memref<16x128xf32, #tpu.memory_space<vmem>>, vector<16x128xf32>
    tpu.vector_store %arg15[%c0_63, %c0_64], %131 {strides = array<i32>} : memref<16x128xf32, #tpu.memory_space<vmem>>, vector<16x128xf32>,
    return
  }
  func.func @transform_0(%arg0: i32) -> (i32, i32) {
    %c0_i32 = arith.constant 0 : i32
    %c0_i32_0 = arith.constant 0 : i32
    %c0_i32_1 = arith.constant 0 : i32
    return %c0_i32, %c0_i32_0 : i32, i32
  }
  func.func @transform_1(%arg0: i32) -> (i32, i32) {
    %c0_i32 = arith.constant 0 : i32
    %c0_i32_0 = arith.constant 0 : i32
    %c0_i32_1 = arith.constant 0 : i32
    return %c0_i32, %c0_i32_0 : i32, i32
  }
  func.func @transform_2(%arg0: i32) -> (i32, i32) {
    %c0_i32 = arith.constant 0 : i32
    %c0_i32_0 = arith.constant 0 : i32
    %c0_i32_1 = arith.constant 0 : i32
    return %c0_i32, %c0_i32_0 : i32, i32
  }
  func.func @transform_3(%arg0: i32) -> (i32, i32) {
    %c0_i32 = arith.constant 0 : i32
    %c0_i32_0 = arith.constant 0 : i32
    %c0_i32_1 = arith.constant 0 : i32
    return %c0_i32, %c0_i32_0 : i32, i32
  }
  func.func @transform_4(%arg0: i32) -> (i32, i32, i32) {
    %c0_i32 = arith.constant 0 : i32
    %c0_i32_0 = arith.constant 0 : i32
    %c0_i32_1 = arith.constant 0 : i32
    return %arg0, %c0_i32, %c0_i32_0 : i32, i32, i32
  }
  func.func @transform_5(%arg0: i32) -> (i32, i32, i32) {
    %c0_i32 = arith.constant 0 : i32
    %c0_i32_0 = arith.constant 0 : i32
    %c0_i32_1 = arith.constant 0 : i32
    return %arg0, %c0_i32, %c0_i32_0 : i32, i32, i32
  }
  func.func @transform_6(%arg0: i32) -> (i32, i32, i32) {
    %c0_i32 = arith.constant 0 : i32
    %c0_i32_0 = arith.constant 0 : i32
    %c0_i32_1 = arith.constant 0 : i32
    return %arg0, %c0_i32, %c0_i32_0 : i32, i32, i32
  }
  func.func @transform_7(%arg0: i32) -> (i32, i32, i32) {
    %c0_i32 = arith.constant 0 : i32
    %c0_i32_0 = arith.constant 0 : i32
    %c0_i32_1 = arith.constant 0 : i32
    return %arg0, %c0_i32, %c0_i32_0 : i32, i32, i32
  }
  func.func @transform_8(%arg0: i32) -> (i32, i32, i32) {
    %c0_i32 = arith.constant 0 : i32
    %c0_i32_0 = arith.constant 0 : i32
    %c0_i32_1 = arith.constant 0 : i32
    return %arg0, %c0_i32, %c0_i32_0 : i32, i32, i32
  }
  func.func @transform_9(%arg0: i32) -> (i32, i32, i32) {
    %c0_i32 = arith.constant 0 : i32
    %c0_i32_0 = arith.constant 0 : i32
    %c0_i32_1 = arith.constant 0 : i32
    return %arg0, %c0_i32, %c0_i32_0 : i32, i32, i32
  }
  func.func @transform_10(%arg0: i32) -> (i32, i32, i32) {
    %c0_i32 = arith.constant 0 : i32
    %c0_i32_0 = arith.constant 0 : i32
    %c0_i32_1 = arith.constant 0 : i32
    return %arg0, %c0_i32, %c0_i32_0 : i32, i32, i32
  }
  func.func @transform_11(%arg0: i32) -> (i32, i32, i32) {
    %c0_i32 = arith.constant 0 : i32
    %c0_i32_0 = arith.constant 0 : i32
    %c0_i32_1 = arith.constant 0 : i32
    return %arg0, %c0_i32, %c0_i32_0 : i32, i32, i32
  }
  func.func @transform_12(%arg0: i32) -> (i32, i32, i32) {
    %c0_i32 = arith.constant 0 : i32
    %c0_i32_0 = arith.constant 0 : i32
    %c0_i32_1 = arith.constant 0 : i32
    return %arg0, %c0_i32, %c0_i32_0 : i32, i32, i32
  }
  func.func @transform_13(%arg0: i32) -> (i32, i32, i32) {
    %c0_i32 = arith.constant 0 : i32
    %c0_i32_0 = arith.constant 0 : i32
    %c0_i32_1 = arith.constant 0 : i32
    return %arg0, %c0_i32, %c0_i32_0 : i32, i32, i32
  }
  func.func @transform_14(%arg0: i32) -> (i32, i32) {
    %c0_i32 = arith.constant 0 : i32
    %c0_i32_0 = arith.constant 0 : i32
    %c0_i32_1 = arith.constant 0 : i32
    return %c0_i32, %c0_i32_0 : i32, i32
  }
}

</mosaic_0001>

<bundles_post_ra>
// kernel: note_patient_encoder_forward.1
= control target key start
LH: loop header
LB: loop body
LE: loop exit
PB: predicated region body
PF: predicated region fallthrough
CT: control target
= control target key end

     0   :  { %s4178_s0 = inlined_call_operand.vmem [shape: f32[16,128], index: 0, kind: input, shape index: {}]   ;;  %s4179_s1 = inlined_call_operand.vmem [shape: f32[16,16], index: 1, kind: input, shape index: {}]   ;;  %s4180_s2 = inlined_call_operand.vmem [shape: f32[16,16], index: 2, kind: input, shape index: {}]   ;;  %s4181_s3 = inlined_call_operand.vmem [shape: f32[16,1024], index: 3, kind: input, shape index: {}]   ;;  %s4182_s4 = inlined_call_operand.vmem [shape: f32[2,1,128], index: 4, kind: input, shape index: {}]   ;;  %s4183_s5 = inlined_call_operand.vmem [shape: f32[2,1,128], index: 5, kind: input, shape index: {}]   ;;  %s4184_s6 = inlined_call_operand.vmem [shape: bf16[2,128,384], index: 6, kind: input, shape index: {}]   ;;  %s4185_s7 = inlined_call_operand.vmem [shape: f32[2,1,384], index: 7, kind: input, shape index: {}]   ;;  %s4186_s8 = inlined_call_operand.vmem [shape: f32[2,1,128], index: 8, kind: input, shape index: {}]   ;;  %s4187_s9 = inlined_call_operand.vmem [shape: f32[2,1,128], index: 9, kind: input, shape index: {}]   ;;  %s4188_s10 = inlined_call_operand.vmem [shape: bf16[2,128,1024], index: 10, kind: input, shape index: {}]   ;;  %s4189_s11 = inlined_call_operand.vmem [shape: f32[2,1,1024], index: 11, kind: input, shape index: {}]   ;;  %s4190_s12 = inlined_call_operand.vmem [shape: bf16[2,1024,128], index: 12, kind: input, shape index: {}]   ;;  %s4191_s13 = inlined_call_operand.vmem [shape: f32[2,16,128], index: 13, kind: input, shape index: {}]   ;;  %s4192_s14 = inlined_call_operand.hbm [shape: f32[16,128], index: 14, kind: output, shape index: {}]  }
   0x1   :  { %4197 = sst [smem:[#allocation6_spill]] %s4180_s2 }
   0x2   :  { %4198 = sst [smem:[#allocation7_spill]] %s4181_s3 }
   0x3   :  { %4199 = sst [smem:[#allocation8_spill]] %s4192_s14 }
   0x4   :  { %19 = vsyncpa [#allocation3], 0  ;;  %s3685_s29 = smov 0  }
   0x5 LB: > { %4200 = sst [smem:[#allocation5_spill]] %s3601_s29  ;;  %s3691_s30 = sadd.s32 4294967295, %s3601_s29   ;;  %s3601_s29 = sphi %s3685_s29, %s25_s29  }
   0x6   : > { %p2997_p0 = scmp.ge.s32.totalorder %s3601_s29, 1  ;;  %p488_p1 = scmp.lt.s32.totalorder %s3601_s29, 3 }
   0x8   : > { %p489_p2 = pnand %p2997_p0, %p488_p1 }
   0x9   : > { %p564_p3 = scmp.lt.s32.totalorder (!%p489_p2), %s3691_s30, 1  ;;  %p3006_p4 = scmp.ne.s32.totalorder (!%p489_p2), %s3691_s30, 0 }
   0xa   : > { %492 = sbr.rel (%p489_p2) target bundleno = 2605 (0xa2d), region = 76 }
  0x11   : > { %s3697_s15 = scalar_select %p564_p3, %s3691_s30, 1 }
  0x12   : > { %608 = sbr.rel (%p3006_p4) target bundleno = 25 (0x19), region = 80  ;;  %v609_v0 = vld [vmem:[%s4178_s0] sm:$0xff] (!%p3006_p4)  ;;  %v610_v1 = vld [vmem:[%s4178_s0 + $0x8] sm:$0xff] (!%p3006_p4) }
  0x13   : > { %s3380_s22 = smul.u32 192, %s3697_s15  ;;  %s3181_s18 = sshll.u32 %s3697_s15, 9  ;;  %611 = vst [vmem:[#allocation2] sm:$0xff] (!%p3006_p4), %v609_v0  ;;  %612 = vst [vmem:[#allocation2 + $0x8] sm:$0xff] (!%p3006_p4), %v610_v1 }
  0x14   : > { %s3381_s26 = smul.u32 3, %s3697_s15  ;;  %s3731_s23 = scalar_lea.vmem %s4188_s10, %s3181_s18 }
  0x15   : > { %s3720_s14 = scalar_lea.vmem %s4184_s6, %s3380_s22  ;;  %s3001_s24 = sshll.u32 %s3697_s15, 3 }
  0x16   : > { %s3726_s19 = scalar_lea.vmem %s4185_s7, %s3381_s26  ;;  %s3737_s28 = scalar_lea.vmem %s4190_s12, %s3181_s18 }
  0x17   : > { %s3742_s17 = scalar_lea.vmem %s4189_s11, %s3001_s24  ;;  %s3183_s16 = sshll.u32 %s3697_s15, 4 }
  0x18   : > { %s3748_s26 = scalar_lea.vmem %s4191_s13, %s3183_s16 }
  0x19 PF: > { %v3413_v4 = vld [vmem:[%s3720_s14 + $0x4] ss:$12 sps:$4 sm:$0xff]   ;;  %v3415_v5 = vld [vmem:[%s3720_s14] ss:$12 sps:$4 sm:$0xff]   ;;  %v3603_v6 = vmov 0.0   ;;  %v3604_v32 = vmov 0   ;;  %s4201_s24 = scalar_lea.vmem %s4182_s4, %s3697_s15  ;;  %s4202_s22 = scalar_lea.vmem %s4183_s5, %s3697_s15  ;;  %v693_v55 = vlaneseq }
  0x1a   : > { %v3757_v2 = vld [vmem:[#allocation2] sm:$0xff]  ;;  %v3759_v3 = vld [vmem:[#allocation2 + $0x8] sm:$0xff]  ;;  %3301 = vmatprep.subr.bf16.mxu1 %v3603_v6  ;;  %836 = vmatprep.subr.bf16.mxu0 %v3413_v4  ;;  %v3423_v20 = vld [vmem:[%s3720_s14 + $0x30] ss:$12 sps:$4 sm:$0xff]   ;;  %vm3605_vm0 = vmmov 0   ;;  %vm920_vm1 = vcmask 523264   ;;  %s4203_s16 = scalar_lea.vmem %s4186_s8, %s3697_s15  ;;  %s4204_s27 = scalar_lea.vmem %s4187_s9, %s3697_s15 }
  0x1b   : > { %619 = vadd.xlane.f32.xlu0 %v3757_v2  ;;  %v3416_v7 = vld [vmem:[%s3720_s14 + $0x8] ss:$12 sps:$4 sm:$0xff]   ;;  %837 = vmatpush1.bf16.msra.mxu0 %v3415_v5  ;;  %v3419_v17 = vld [vmem:[%s3720_s14 + $0x18] ss:$12 sps:$4 sm:$0xff]   ;;  %v3420_v18 = vld [vmem:[%s3720_s14 + $0x20] ss:$12 sps:$4 sm:$0xff]  }
  0x1c   : > { %v3417_v8 = vld [vmem:[%s3720_s14 + $0x1c] ss:$12 sps:$4 sm:$0xff]   ;;  %3302 = vmatpush3.bf16.msra.mxu1 %v3416_v7  ;;  %v3421_v19 = vld [vmem:[%s3720_s14 + $0x34] ss:$12 sps:$4 sm:$0xff]   ;;  %v3424_v21 = vld [vmem:[%s3720_s14 + $0x38] ss:$12 sps:$4 sm:$0xff]   ;;  %868 = vmatprep.mubr.bf16.mxu0 %v3604_v32 }
  0x1d   : > { %838 = vmatprep.subr.bf16.mxu0 %v3417_v8  ;;  %3303 = vmatprep.subr.bf16.mxu1 %v3603_v6  ;;  %v3425_v22 = vld [vmem:[%s3720_s14 + $0x4c] ss:$12 sps:$4 sm:$0xff]   ;;  %v3427_v23 = vld [vmem:[%s3720_s14 + $0x48] ss:$12 sps:$4 sm:$0xff]   ;;  %v3428_v24 = vld [vmem:[%s3720_s14 + $0x50] ss:$12 sps:$4 sm:$0xff]  }
  0x1e   : > { %v3429_v25 = vld [vmem:[%s3720_s14 + $0x64] ss:$12 sps:$4 sm:$0xff]   ;;  %v3431_v26 = vld [vmem:[%s3720_s14 + $0x60] ss:$12 sps:$4 sm:$0xff]   ;;  %v3432_v27 = vld [vmem:[%s3720_s14 + $0x68] ss:$12 sps:$4 sm:$0xff]   ;;  %3317 = vmatprep.mubr.msk.bf16.mxu1 %vm3605_vm0, %v3603_v6 }
  0x1f   : > { %621 = vadd.xlane.f32.xlu0 %v3759_v3  ;;  %839 = vmatpush1.bf16.msra.mxu0 %v3419_v17  ;;  %v3433_v28 = vld [vmem:[%s3720_s14 + $0x7c] ss:$12 sps:$4 sm:$0xff]   ;;  %v3435_v29 = vld [vmem:[%s3720_s14 + $0x78] ss:$12 sps:$4 sm:$0xff]   ;;  %v3436_v30 = vld [vmem:[%s3720_s14 + $0x80] ss:$12 sps:$4 sm:$0xff]  }
  0x20   : > { %3304 = vmatpush3.bf16.msra.mxu1 %v3420_v18  ;;  %840 = vmatprep.subr.bf16.mxu0 %v3421_v19  ;;  %v3437_v31 = vld [vmem:[%s3720_s14 + $0x94] ss:$12 sps:$4 sm:$0xff]   ;;  %v3439_v33 = vld [vmem:[%s3720_s14 + $0x90] ss:$12 sps:$4 sm:$0xff]   ;;  %v3440_v34 = vld [vmem:[%s3720_s14 + $0x98] ss:$12 sps:$4 sm:$0xff]  }
  0x21   : > { %3305 = vmatprep.subr.bf16.mxu1 %v3603_v6  ;;  %v3441_v35 = vld [vmem:[%s3720_s14 + $0xac] ss:$12 sps:$4 sm:$0xff]   ;;  %v3443_v36 = vld [vmem:[%s3720_s14 + $0xa8] ss:$12 sps:$4 sm:$0xff]   ;;  %v3444_v37 = vld [vmem:[%s3720_s14 + $0xb0] ss:$12 sps:$4 sm:$0xff]  }
  0x22   : > { %v3007_v46 = vld [vmem:[%s4201_s24] ss:$0 sm:$0xff]  ;;  %v3819_v56 = vshrl.u32 %v693_v55, 7  ;;  %vm3357_vm2 = vmpackc.low %vm920_vm1, %vm920_vm1  ;;  %vm1008_vm3 = vcmask 130048   ;;  %s3607_s2 = smov [#allocation2]   ;;  %p3386_p5 = scmp.eq.s32.totalorder %s3691_s30, 1 }
  0x23   : > { %841 = vmatpush1.bf16.msra.mxu0 %v3423_v20  ;;  %v3008_v50 = vld [vmem:[%s4202_s22] ss:$0 sm:$0xff]  ;;  %s2856_s3 = sshll.u32 %s3607_s2, 4  ;;  %s2857_s3 = int_to_ptr.vmem [resolvable:$true] %s2856_s3 }
  0x24   : > { %3306 = vmatpush3.bf16.msra.mxu1 %v3424_v21  ;;  %842 = vmatprep.subr.bf16.mxu0 %v3425_v22  ;;  %v695_v57 = vsub.s32 0, %v3819_v56  ;;  %v691_v58 = vld [vmem:[%s3726_s19] sm:$0x7]  ;;  %v703_v59 = vsub.s32 2, %v3819_v56  ;;  %v699_v60 = vsub.s32 1, %v3819_v56  ;;  %s3606_s19 = smov 64   ;;  %p3572_p9 = scmp.lt.s32.totalorder %s2857_s3, %s2857_s3 }
  0x25   : > { %3307 = vmatprep.subr.bf16.mxu1 %v3603_v6  ;;  %s3565_s21 = scalar_lea.vmem %s2857_s3, 256 }
  0x26   : > { %v696_v61 = vrot.slane %v691_v58, %v695_v57  ;;  %v704_v62 = vrot.slane %v691_v58, %v703_v59  ;;  %v700_v1 = vrot.slane %v691_v58, %v699_v60  ;;  %p3566_p6 = scmp.ne.s32.totalorder %s2857_s3, %s3565_s21  ;;  %p3573_p10 = scmp.lt.s32.totalorder %s3565_s21, %s3565_s21 }
  0x27   : > { %843 = vmatpush1.bf16.msra.mxu0 %v3427_v23 }
  0x28   : > { %3308 = vmatpush3.bf16.msra.mxu1 %v3428_v24  ;;  %844 = vmatprep.subr.bf16.mxu0 %v3429_v25  ;;  %p3567_p7 = pnand %p3566_p6, %p3386_p5  ;;  %p3574_p11 = por %p3573_p10, %p3572_p9 }
  0x29   : > { %3309 = vmatprep.subr.bf16.mxu1 %v3603_v6 }
  0x2a   : > { %p3568_p8 = pneg %p3567_p7 }
  0x2b   : > { %845 = vmatpush1.bf16.msra.mxu0 %v3431_v26  ;;  %v616_v26 = vld [vmem:[%s4179_s1 + $0x8] sm:$0xff] }
  0x2c   : > { %3310 = vmatpush3.bf16.msra.mxu1 %v3432_v27  ;;  %846 = vmatprep.subr.bf16.mxu0 %v3433_v28  ;;  %v615_v27 = vld [vmem:[%s4179_s1] sm:$0xff]  ;;  %p3575_p12 = pnand %p3574_p11, %p3568_p8 }
  0x2d   : > { %3311 = vmatprep.subr.bf16.mxu1 %v3603_v6 }
  0x2f   : > { %847 = vmatpush1.bf16.msra.mxu0 %v3435_v29 }
  0x30   : > { %3312 = vmatpush3.bf16.msra.mxu1 %v3436_v30  ;;  %848 = vmatprep.subr.bf16.mxu0 %v3437_v31 }
  0x31   : > { %3313 = vmatprep.subr.bf16.mxu1 %v3603_v6 }
  0x33   : > { %849 = vmatpush1.bf16.msra.mxu0 %v3439_v33 }
  0x34   : > { %3314 = vmatpush3.bf16.msra.mxu1 %v3440_v34  ;;  %850 = vmatprep.subr.bf16.mxu0 %v3441_v35 }
  0x35   : > { %3315 = vmatprep.subr.bf16.mxu1 %v3603_v6 }
  0x37   : > { %851 = vmatpush1.bf16.msra.mxu0 %v3443_v36 }
  0x38   : > { %3316 = vmatpush3.bf16.msra.mxu1 %v3444_v37 }
  0xa8   : > { %v620_v9 = vpop.xlane.xlu0 %619 }
  0xa9   : > { %v624_v10 = vmul.f32 0.0078125, %v620_v9 }
  0xab   : > { %v3770_v11 = vsub.f32 %v3757_v2, %v624_v10 }
  0xac   : > { %v622_v12 = vpop.xlane.xlu0 %621 }
  0xad   : > { %v625_v13 = vmul.f32 0.0078125, %v622_v12  ;;  %v628_v14 = vmul.f32 %v3770_v11, %v3770_v11 }
  0xaf   : > { %v3775_v15 = vsub.f32 %v3759_v3, %v625_v13  ;;  %630 = vadd.xlane.f32.xlu1 %v628_v14 }
  0xb1   : > { %v629_v16 = vmul.f32 %v3775_v15, %v3775_v15 }
  0xb3   : > { %632 = vadd.xlane.f32.xlu1 %v629_v16 }
 0x13c   : > { %v631_v38 = vpop.xlane.xlu1 %630 }
 0x13d   : > { %v634_v39 = vmul.f32 0.0078125, %v631_v38 }
 0x13f   : > { %v636_v40 = vadd.f32 1e-05, %v634_v39 }
 0x140   : > { %v633_v41 = vpop.xlane.xlu1 %632 }
 0x141   : > { %3509 = vrsqrt.f32 %v636_v40  ;;  %v635_v42 = vmul.f32 0.0078125, %v633_v41 }
 0x143   : > { %v637_v43 = vadd.f32 1e-05, %v635_v42 }
 0x145   : > { %3511 = vrsqrt.f32 %v637_v43 }
 0x14b   : > { %v3510_v44 = vpop.eup %3509 }
 0x14c   : > { %v640_v45 = vmul.f32 %v3510_v44, %v3770_v11 }
 0x14e   : > { %v648_v49 = vmul.f32 %v3007_v46, %v640_v45 }
 0x14f   : > { %v3512_v47 = vpop.eup %3511 }
 0x150   : > { %v641_v48 = vmul.f32 %v3512_v47, %v3775_v15  ;;  %v656_v52 = vadd.f32 %v3008_v50, %v648_v49 }
 0x152   : > { %v649_v51 = vmul.f32 %v3007_v46, %v641_v48 }
 0x154   : > { %v657_v53 = vadd.f32 %v3008_v50, %v649_v51 }
 0x156   : > { %v658_v54 = vpack.c.bf16 %v657_v53, %v656_v52 }
 0x158   : > { %869 = vmatmul.mubr.bf16.vlgmr.msra.gmra.mrb[0].mxu0 %v658_v54  ;;  %3318 = vmatmul.mubr.bf16.vlgmr.msra.gmra.mrb[0].mxu1 %v658_v54 }
 0x22b   : > { %v870_v63 = vpop.f32.mrb[0].mxu0  ;;  %v913_v0 = vpop.f32.mrb[0].mxu1 }
 0x22c   : > { %v871_v4 = vadd.f32 %v870_v63, %v696_v61  ;;  %v872_v5 = vpop.f32.mrb[1].mxu0  ;;  %v3319_v6 = vpop.f32.mrb[1].mxu1  ;;  %v3831_v9 = vadd.f32 %v913_v0, %v704_v62 }
 0x22d   : > { %v874_v7 = vpop.f32.mrb[2].mxu0  ;;  %v916_v8 = vpop.f32.mrb[2].mxu1  ;;  %v873_v13 = vadd.f32 %v872_v5, %v700_v1 }
 0x22e   : > { %v3833_v10 = vadd.f32 %v916_v8, %v704_v62  ;;  %v876_v11 = vpop.f32.mrb[3].mxu0  ;;  %v3320_v12 = vpop.f32.mrb[3].mxu1  ;;  %1112 = vrot.lane.b32.xlu1 %v871_v4, %s3606_s19  ;;  %3325 = vmatprep.mubr.msk.f32.mxu0 %vm920_vm1, %v871_v4  ;;  %v875_v15 = vadd.f32 %v874_v7, %v696_v61 }
 0x22f   : > { %v877_v14 = vadd.f32 %v876_v11, %v700_v1 }
 0x230   : > { %v3408_v16 = vpack.i.bf16 %v3833_v10, %v3831_v9  ;;  %v3362_v17 = vpack.c.bf16 %v3833_v10, %v3831_v9 }
 0x231   : > { %v3403_v18 = vpack.i.bf16 %v877_v14, %v873_v13  ;;  %v3356_v19 = vpack.c.bf16 %v877_v14, %v873_v13 }
 0x232   : > { %3363 = vmatprep.subr.bf16.mxu1 %v3362_v17  ;;  %1114 = vrot.lane.b32.xlu1 %v875_v15, %s3606_s19 }
 0x233   : > { %3365 = vmatpush3.bf16.msra.mxu1 %v3362_v17  ;;  %3404 = vrot.lane.b32.xlu0 %v3403_v18, %s3606_s19 }
 0x234   : > { %3358 = vmatprep.subr.msk.bf16.mxu0 %vm3357_vm2, %v3356_v19 }
 0x235   : > { %3361 = vmatpush3.bf16.xpose.msk.msra.mxu0 %vm3357_vm2, %v3356_v19 }
 0x23c   : > { %3326 = vmatmul.mubr.msk.f32.vlgmr.msra.gmra.mrb[4].mxu0 %vm920_vm1, %v875_v15 }
 0x2a0   : > { %v1113_v20 = vpop.permute.xlu1 %1112 }
 0x2a1   : > { %3339 = vmatprep.mubr.msk.f32.mxu0 %vm920_vm1, %v1113_v20 }
 0x2a4   : > { %v1115_v25 = vpop.permute.xlu1 %1114 }
 0x2a5   : > { %v3405_v21 = vpop.permute.xlu0 %3404 }
 0x2a6   : > { %v3407_v22 = vunpack.i.h.bf16 %v3405_v21  ;;  %v3406_v23 = vunpack.i.l.bf16 %v3405_v21 }
 0x2a8   : > { %v3366_v24 = vpack.c.bf16 %v3407_v22, %v3406_v23 }
 0x2aa   : > { %3368 = vmatprep.subr.msk.bf16.mxu0 %vm3357_vm2, %v3366_v24 }
 0x2ab   : > { %3371 = vmatpush3.bf16.xpose.msk.msra.mxu0 %vm3357_vm2, %v3366_v24 }
 0x2b2   : > { %3340 = vmatmul.mubr.msk.f32.vlgmr.msra.gmra.mrb[6].mxu0 %vm920_vm1, %v1115_v25 }
 0x2b3   : > { %1868 = vmatprep.mubr.bf16.mxu0 %v3604_v32 }
 0x30f   : > { %v3327_v28 = vpop.f32.mrb[4].mxu0 }
 0x310   : > { %v1005_v29 = vadd.f32 %v3327_v28, %v616_v26  ;;  %v999_v30 = vpop.f32.mrb[5].mxu0 }
 0x311   : > { %v1000_v31 = vadd.f32 %v999_v30, %v615_v27  ;;  %v1371_v30 = vld [vmem:[%s3731_s23 + $0x20] sm:$0xff] }
 0x312   : > { %v1012_v33 = vsel %vm1008_vm3, %v1005_v29, -inf }
 0x313   : > { %1013 = vmax.xlane.f32.xlu0 %v1012_v33  ;;  %v1009_v34 = vsel %vm1008_vm3, %v1000_v31, -inf }
 0x314   : > { %1010 = vmax.xlane.f32.xlu1 %v1009_v34  ;;  %v1372_v34 = vld [vmem:[%s3731_s23 + $0x28] sm:$0xff] }
 0x385   : > { %v3341_v35 = vpop.f32.mrb[6].mxu0 }
 0x386   : > { %v1194_v36 = vpop.f32.mrb[7].mxu0  ;;  %v1200_v38 = vadd.f32 %v3341_v35, %v616_v26  ;;  %v1375_v35 = vld [vmem:[%s3731_s23 + $0x40] sm:$0xff] }
 0x387   : > { %v1195_v37 = vadd.f32 %v1194_v36, %v615_v27  ;;  %v1379_v36 = vld [vmem:[%s3731_s23 + $0x60] sm:$0xff] }
 0x388   : > { %v1206_v40 = vsel %vm1008_vm3, %v1200_v38, -inf }
 0x389   : > { %v1203_v39 = vsel %vm1008_vm3, %v1195_v37, -inf }
 0x38a   : > { %1204 = vmax.xlane.f32.xlu0 %v1203_v39  ;;  %v1376_v39 = vld [vmem:[%s3731_s23 + $0x48] sm:$0xff] }
 0x38e   : > { %1207 = vmax.xlane.f32.xlu0 %v1206_v40  ;;  %v1380_v40 = vld [vmem:[%s3731_s23 + $0x68] sm:$0xff] }
 0x3a0   : > { %v1014_v41 = vpop.xlane.xlu0 %1013 }
 0x3a1   : > { %v1016_v42 = vsub.f32 %v1005_v29, %v1014_v41  ;;  %v1011_v43 = vpop.xlane.xlu1 %1010  ;;  %v1367_v29 = vld [vmem:[%s3731_s23] sm:$0xff] }
 0x3a2   : > { %v1015_v44 = vsub.f32 %v1000_v31, %v1011_v43  ;;  %v1368_v31 = vld [vmem:[%s3731_s23 + $0x8] sm:$0xff]  ;;  %v3048_v33 = vcombine.high %v1367_v29, %v1371_v30  ;;  %v1383_v41 = vld [vmem:[%s3731_s23 + $0x80] sm:$0xff] }
 0x3a3   : > { %v1019_v45 = vmul.f32 1.442695, %v1016_v42  ;;  %v3058_v42 = vcombine.high %v1376_v39, %v1380_v40  ;;  %v1387_v43 = vld [vmem:[%s3731_s23 + $0xa0] sm:$0xff] }
 0x3a4   : > { %v1017_v46 = vmul.f32 1.442695, %v1015_v44  ;;  %v1384_v44 = vld [vmem:[%s3731_s23 + $0x88] sm:$0xff] }
 0x3a5   : > { %3513 = vpow2.f32 %v1019_v45  ;;  %v1388_v45 = vld [vmem:[%s3731_s23 + $0xa8] sm:$0xff] }
 0x3a6   : > { %3515 = vpow2.f32 %v1017_v46  ;;  %v3055_v46 = vcombine.low %v1375_v35, %v1379_v36 }
 0x3af   : > { %v3514_v47 = vpop.eup %3513 }
 0x3b0   : > { %v3516_v48 = vpop.eup %3515  ;;  %v1024_v49 = vsel %vm1008_vm3, %v3514_v47, 0.0 }
 0x3b1   : > { %1025 = vadd.xlane.f32.xlu0 %v1024_v49  ;;  %v1021_v50 = vsel %vm1008_vm3, %v3516_v48, 0.0  ;;  %v3066_v49 = vcombine.high %v1384_v44, %v1388_v45 }
 0x3b2   : > { %1022 = vadd.xlane.f32.xlu1 %v1021_v50  ;;  %v3063_v50 = vcombine.low %v1383_v41, %v1387_v43 }
 0x417   : > { %v1205_v51 = vpop.xlane.xlu0 %1204 }
 0x418   : > { %v1209_v52 = vsub.f32 %v1195_v37, %v1205_v51  ;;  %v3049_v37 = vcombine.low %v1368_v31, %v1372_v34  ;;  %v3065_v51 = vcombine.low %v1384_v44, %v1388_v45 }
 0x41a   : > { %v1211_v53 = vmul.f32 1.442695, %v1209_v52 }
 0x41b   : > { %v1208_v54 = vpop.xlane.xlu0 %1207 }
 0x41c   : > { %3517 = vpow2.f32 %v1211_v53  ;;  %v1210_v55 = vsub.f32 %v1200_v38, %v1208_v54  ;;  %v3050_v38 = vcombine.high %v1368_v31, %v1372_v34 }
 0x41e   : > { %v1213_v58 = vmul.f32 1.442695, %v1210_v55  ;;  %1836 = vmatprep.subr.bf16.mxu0 %v3050_v38  ;;  %v1424_v38 = vld [vmem:[%s3731_s23 + $0x1c8] sm:$0xff] }
 0x41f   : > { %1837 = vmatpush1.bf16.msra.mxu0 %v3049_v37  ;;  %v1427_v37 = vld [vmem:[%s3731_s23 + $0x1e0] sm:$0xff] }
 0x420   : > { %3519 = vpow2.f32 %v1213_v58  ;;  %1838 = vmatprep.subr.bf16.mxu0 %v3058_v42  ;;  %v1373_v42 = vld [vmem:[%s3731_s23 + $0x30] sm:$0xff] }
 0x426   : > { %v3518_v61 = vpop.eup %3517 }
 0x427   : > { %v1215_v62 = vsel %vm1008_vm3, %v3518_v61, 0.0 }
 0x428   : > { %1216 = vadd.xlane.f32.xlu1 %v1215_v62 }
 0x42a   : > { %v3520_v63 = vpop.eup %3519 }
 0x42b   : > { %v1218_v0 = vsel %vm1008_vm3, %v3520_v63, 0.0 }
 0x42c   : > { %1219 = vadd.xlane.f32.xlu0 %v1218_v0  ;;  %v1391_v0 = vld [vmem:[%s3731_s23 + $0xc0] sm:$0xff] }
 0x439   : > { %3409 = vrot.lane.b32.xlu1 %v3408_v16, %s3606_s19 }
 0x43e   : > { %v1026_v1 = vpop.xlane.xlu0 %1025 }
 0x43f   : > { %3521 = vrcp.f32 %v1026_v1  ;;  %v1023_v4 = vpop.xlane.xlu1 %1022  ;;  %v1395_v1 = vld [vmem:[%s3731_s23 + $0xe0] sm:$0xff] }
 0x440   : > { %3523 = vrcp.f32 %v1023_v4  ;;  %v1392_v4 = vld [vmem:[%s3731_s23 + $0xc8] sm:$0xff] }
 0x449   : > { %v3522_v5 = vpop.eup %3521 }
 0x44a   : > { %v3524_v6 = vpop.eup %3523  ;;  %v1030_v8 = vmul.f32 %v3522_v5, %v3514_v47  ;;  %v3057_v47 = vcombine.low %v1376_v39, %v1380_v40  ;;  %v3072_v5 = vcombine.high %v1391_v0, %v1395_v1  ;;  %v1428_v40 = vld [vmem:[%s3731_s23 + $0x1e8] sm:$0xff] }
 0x44b   : > { %v1029_v7 = vmul.f32 %v3524_v6, %v3516_v48  ;;  %v3064_v48 = vcombine.high %v1383_v41, %v1387_v43  ;;  %v1396_v6 = vld [vmem:[%s3731_s23 + $0xe8] sm:$0xff]  ;;  %v1369_v41 = vld [vmem:[%s3731_s23 + $0x10] sm:$0xff]  ;;  %v3105_v43 = vcombine.low %v1424_v38, %v1428_v40  ;;  %v3106_v44 = vcombine.high %v1424_v38, %v1428_v40 }
 0x44c   : > { %1839 = vmatpush1.bf16.msra.mxu0 %v3057_v47  ;;  %v3051_v45 = vcombine.low %v1369_v41, %v1373_v42  ;;  %v1370_v47 = vld [vmem:[%s3731_s23 + $0x18] sm:$0xff]  ;;  %v1409_v40 = vld [vmem:[%s3731_s23 + $0x150] sm:$0xff] }
 0x44d   : > { %3332 = vmatprep.mubr.msk.f32.mxu1 %vm1008_vm3, %v1029_v7  ;;  %1840 = vmatprep.subr.bf16.mxu0 %v3066_v49  ;;  %v3071_v7 = vcombine.low %v1391_v0, %v1395_v1  ;;  %v3045_v0 = vld [vmem:[%s4203_s16] ss:$0 sm:$0xff] }
 0x44e   : > { %3333 = vmatmul.mubr.msk.f32.vlgmr.msra.gmra.mrb[4].mxu1 %vm1008_vm3, %v1030_v8  ;;  %v3073_v8 = vcombine.low %v1392_v4, %v1396_v6 }
 0x450   : > { %1841 = vmatpush1.bf16.msra.mxu0 %v3065_v51 }
 0x4b5   : > { %v1217_v11 = vpop.xlane.xlu1 %1216 }
 0x4b6   : > { %3525 = vrcp.f32 %v1217_v11  ;;  %v3074_v11 = vcombine.high %v1392_v4, %v1396_v6  ;;  %v3046_v6 = vld [vmem:[%s4204_s27] ss:$0 sm:$0xff] }
 0x4b8   : > { %1842 = vmatprep.subr.bf16.mxu0 %v3074_v11  ;;  %v1377_v11 = vld [vmem:[%s3731_s23 + $0x50] sm:$0xff] }
 0x4b9   : > { %v1220_v12 = vpop.xlane.xlu0 %1219  ;;  %v3410_v13 = vpop.permute.xlu1 %3409  ;;  %1843 = vmatpush1.bf16.msra.mxu0 %v3073_v8 }
 0x4ba   : > { %3527 = vrcp.f32 %v1220_v12  ;;  %v3412_v14 = vunpack.i.h.bf16 %v3410_v13  ;;  %v3411_v9 = vunpack.i.l.bf16 %v3410_v13  ;;  %v1399_v12 = vld [vmem:[%s3731_s23 + $0x100] sm:$0xff] }
 0x4bb   : > { %v1403_v13 = vld [vmem:[%s3731_s23 + $0x120] sm:$0xff] }
 0x4bc   : > { %v3372_v10 = vpack.c.bf16 %v3412_v14, %v3411_v9  ;;  %v1400_v14 = vld [vmem:[%s3731_s23 + $0x108] sm:$0xff]  ;;  %v3080_v9 = vcombine.high %v1399_v12, %v1403_v13 }
 0x4be   : > { %3373 = vmatprep.subr.bf16.mxu1 %v3372_v10 }
 0x4bf   : > { %3375 = vmatpush3.bf16.msra.mxu1 %v3372_v10  ;;  %v1404_v10 = vld [vmem:[%s3731_s23 + $0x128] sm:$0xff] }
 0x4c0   : > { %v3526_v15 = vpop.eup %3525  ;;  %1793 = vmatprep.subr.bf16.mxu1 %v3048_v33 }
 0x4c1   : > { %v1223_v16 = vmul.f32 %v3526_v15, %v3518_v61  ;;  %v3079_v15 = vcombine.low %v1399_v12, %v1403_v13  ;;  %v1381_v13 = vld [vmem:[%s3731_s23 + $0x70] sm:$0xff] }
 0x4c3   : > { %3346 = vmatprep.mubr.msk.f32.mxu1 %vm1008_vm3, %v1223_v16  ;;  %v3081_v16 = vcombine.low %v1400_v14, %v1404_v10 }
 0x4c4   : > { %v3528_v17 = vpop.eup %3527 }
 0x4c5   : > { %v1224_v18 = vmul.f32 %v3528_v17, %v3520_v63  ;;  %v3082_v17 = vcombine.high %v1400_v14, %v1404_v10  ;;  %v1378_v14 = vld [vmem:[%s3731_s23 + $0x58] sm:$0xff] }
 0x4c7   : > { %3347 = vmatmul.mubr.msk.f32.vlgmr.msra.gmra.mrb[6].mxu1 %vm1008_vm3, %v1224_v18  ;;  %1844 = vmatprep.subr.bf16.mxu0 %v3082_v17  ;;  %v1407_v18 = vld [vmem:[%s3731_s23 + $0x140] sm:$0xff]  ;;  %v1389_v17 = vld [vmem:[%s3731_s23 + $0xb0] sm:$0xff] }
 0x4c8   : > { %1825 = vmatprep.mubr.bf16.mxu1 %v3604_v32  ;;  %1845 = vmatpush1.bf16.msra.mxu0 %v3081_v16 }
 0x521   : > { %v3334_v19 = vpop.f32.mrb[4].mxu1 }
 0x522   : > { %v1103_v20 = vpop.f32.mrb[5].mxu1 }
 0x59a   : > { %v3348_v21 = vpop.f32.mrb[6].mxu1 }
 0x59b   : > { %1318 = vrot.lane.b32.xlu1 %v3348_v21, %s3606_s19  ;;  %v1305_v22 = vpop.f32.mrb[7].mxu1 }
 0x59c   : > { %1316 = vrot.lane.b32.xlu0 %v1305_v22, %s3606_s19  ;;  %v1412_v22 = vld [vmem:[%s3731_s23 + $0x168] sm:$0xff] }
 0x60d   : > { %v1319_v23 = vpop.permute.xlu1 %1318 }
 0x60e   : > { %v1323_v24 = vsel %vm920_vm1, %v3334_v19, %v1319_v23  ;;  %v1317_v25 = vpop.permute.xlu0 %1316  ;;  %v1411_v19 = vld [vmem:[%s3731_s23 + $0x160] sm:$0xff] }
 0x60f   : > { %v3876_v26 = vadd.f32 %v1323_v24, %v3759_v3  ;;  %v1322_v27 = vsel %vm920_vm1, %v1103_v20, %v1317_v25  ;;  %v3047_v3 = vcombine.low %v1367_v29, %v1371_v30  ;;  %v1408_v20 = vld [vmem:[%s3731_s23 + $0x148] sm:$0xff]  ;;  %v3088_v21 = vcombine.high %v1407_v18, %v1411_v19  ;;  %v1419_v29 = vld [vmem:[%s3731_s23 + $0x1a0] sm:$0xff] }
 0x610   : > { %v3880_v28 = vadd.f32 %v1322_v27, %v3757_v2  ;;  %v3056_v2 = vcombine.high %v1375_v35, %v1379_v36  ;;  %v3087_v23 = vcombine.low %v1407_v18, %v1411_v19  ;;  %v3089_v24 = vcombine.low %v1408_v20, %v1412_v22  ;;  %v1415_v27 = vld [vmem:[%s3731_s23 + $0x180] sm:$0xff]  ;;  %v1416_v30 = vld [vmem:[%s3731_s23 + $0x188] sm:$0xff]  ;;  %v1386_v18 = vld [vmem:[%s3731_s23 + $0x98] sm:$0xff] }
 0x611   : > { %1330 = vadd.xlane.f32.xlu0 %v3876_v26  ;;  %1794 = vmatpush1.bf16.msra.mxu1 %v3047_v3  ;;  %v3090_v25 = vcombine.high %v1408_v20, %v1412_v22  ;;  %v3096_v31 = vcombine.high %v1415_v27, %v1419_v29  ;;  %v1420_v3 = vld [vmem:[%s3731_s23 + $0x1a8] sm:$0xff]  ;;  %v3095_v33 = vcombine.low %v1415_v27, %v1419_v29  ;;  %v1423_v36 = vld [vmem:[%s3731_s23 + $0x1c0] sm:$0xff]  ;;  %v1390_v19 = vld [vmem:[%s3731_s23 + $0xb8] sm:$0xff] }
 0x612   : > { %1328 = vadd.xlane.f32.xlu1 %v3880_v28  ;;  %1795 = vmatprep.subr.bf16.mxu1 %v3056_v2  ;;  %v3097_v34 = vcombine.low %v1416_v30, %v1420_v3  ;;  %v3098_v35 = vcombine.high %v1416_v30, %v1420_v3  ;;  %v3103_v2 = vcombine.low %v1423_v36, %v1427_v37  ;;  %v1394_v27 = vld [vmem:[%s3731_s23 + $0xd8] sm:$0xff] }
 0x613   : > { %1846 = vmatprep.subr.bf16.mxu0 %v3090_v25  ;;  %v3104_v39 = vcombine.high %v1423_v36, %v1427_v37  ;;  %v3059_v20 = vcombine.low %v1377_v11, %v1381_v13  ;;  %v1397_v25 = vld [vmem:[%s3731_s23 + $0xf0] sm:$0xff]  ;;  %v1398_v29 = vld [vmem:[%s3731_s23 + $0xf8] sm:$0xff] }
 0x614   : > { %1847 = vmatpush1.bf16.msra.mxu0 %v3089_v24  ;;  %v1393_v24 = vld [vmem:[%s3731_s23 + $0xd0] sm:$0xff]  ;;  %v1402_v36 = vld [vmem:[%s3731_s23 + $0x118] sm:$0xff] }
 0x615   : > { %1796 = vmatpush1.bf16.msra.mxu1 %v3055_v46  ;;  %1848 = vmatprep.subr.bf16.mxu0 %v3098_v35  ;;  %v3052_v46 = vcombine.high %v1369_v41, %v1373_v42  ;;  %v3076_v3 = vcombine.high %v1393_v24, %v1397_v25  ;;  %v1405_v35 = vld [vmem:[%s3731_s23 + $0x130] sm:$0xff]  ;;  %v1406_v37 = vld [vmem:[%s3731_s23 + $0x138] sm:$0xff]  ;;  %v3075_v38 = vcombine.low %v1393_v24, %v1397_v25  ;;  %v3461_v24 = vld [vmem:[%s3737_s28 + $0x60] sm:$0xff]  }
 0x616   : > { %1797 = vmatprep.subr.bf16.mxu1 %v3064_v48  ;;  %v1374_v48 = vld [vmem:[%s3731_s23 + $0x38] sm:$0xff]  ;;  %v1413_v41 = vld [vmem:[%s3731_s23 + $0x170] sm:$0xff]  ;;  %v3462_v25 = vld [vmem:[%s3737_s28 + $0xe0] sm:$0xff]  }
 0x617   : > { %v3053_v49 = vcombine.low %v1370_v47, %v1374_v48  ;;  %v1410_v42 = vld [vmem:[%s3731_s23 + $0x158] sm:$0xff] }
 0x618   : > { %1849 = vmatpush1.bf16.msra.mxu0 %v3097_v34  ;;  %v1401_v34 = vld [vmem:[%s3731_s23 + $0x110] sm:$0xff] }
 0x619   : > { %1798 = vmatpush1.bf16.msra.mxu1 %v3063_v50  ;;  %v3054_v50 = vcombine.high %v1370_v47, %v1374_v48  ;;  %1850 = vmatprep.subr.bf16.mxu0 %v3106_v44  ;;  %v3083_v44 = vcombine.low %v1401_v34, %v1405_v35  ;;  %v1417_v48 = vld [vmem:[%s3731_s23 + $0x190] sm:$0xff] }
 0x61a   : > { %1799 = vmatprep.subr.bf16.mxu1 %v3072_v5 }
 0x61c   : > { %1851 = vmatpush1.bf16.msra.mxu0 %v3105_v43  ;;  %v1414_v43 = vld [vmem:[%s3731_s23 + $0x178] sm:$0xff] }
 0x61d   : > { %1800 = vmatpush1.bf16.msra.mxu1 %v3071_v7  ;;  %1922 = vmatprep.subr.bf16.mxu0 %v3054_v50  ;;  %v3094_v47 = vcombine.high %v1410_v42, %v1414_v43  ;;  %v1418_v50 = vld [vmem:[%s3731_s23 + $0x198] sm:$0xff] }
 0x61e   : > { %1801 = vmatprep.subr.bf16.mxu1 %v3080_v9  ;;  %v1382_v9 = vld [vmem:[%s3731_s23 + $0x78] sm:$0xff] }
 0x61f   : > { %v3062_v16 = vcombine.high %v1378_v14, %v1382_v9 }
 0x621   : > { %1802 = vmatpush1.bf16.msra.mxu1 %v3079_v15 }
 0x622   : > { %1803 = vmatprep.subr.bf16.mxu1 %v3088_v21  ;;  %v3061_v21 = vcombine.low %v1378_v14, %v1382_v9  ;;  %v3447_v14 = vld [vmem:[%s3737_s28] sm:$0xff]  }
 0x623   : > { %v3448_v9 = vld [vmem:[%s3737_s28 + $0x80] sm:$0xff]  }
 0x625   : > { %1804 = vmatpush1.bf16.msra.mxu1 %v3087_v23  ;;  %v3070_v23 = vcombine.high %v1386_v18, %v1390_v19 }
 0x626   : > { %1805 = vmatprep.subr.bf16.mxu1 %v3096_v31  ;;  %v3069_v31 = vcombine.low %v1386_v18, %v1390_v19  ;;  %v3454_v18 = vld [vmem:[%s3737_s28 + $0xd0] sm:$0xff]  }
 0x627   : > { %v3455_v19 = vld [vmem:[%s3737_s28 + $0x10] sm:$0xff]  }
 0x629   : > { %1806 = vmatpush1.bf16.msra.mxu1 %v3095_v33  ;;  %v3078_v33 = vcombine.high %v1394_v27, %v1398_v29 }
 0x62a   : > { %1807 = vmatprep.subr.bf16.mxu1 %v3104_v39  ;;  %v3086_v39 = vcombine.high %v1402_v36, %v1406_v37 }
 0x62d   : > { %1808 = vmatpush1.bf16.msra.mxu1 %v3103_v2  ;;  %v3084_v2 = vcombine.high %v1401_v34, %v1405_v35  ;;  %v3469_v34 = vld [vmem:[%s3737_s28 + $0x70] sm:$0xff]  }
 0x62e   : > { %1879 = vmatprep.subr.bf16.mxu1 %v3052_v46  ;;  %v3092_v46 = vcombine.high %v1409_v40, %v1413_v41  ;;  %v3470_v35 = vld [vmem:[%s3737_s28 + $0xf0] sm:$0xff]  }
 0x69e   : > { %v1331_v52 = vpop.xlane.xlu0 %1330 }
 0x69f   : > { %v1333_v53 = vmul.f32 0.0078125, %v1331_v52  ;;  %v1329_v54 = vpop.xlane.xlu1 %1328 }
 0x6a0   : > { %v1332_v55 = vmul.f32 0.0078125, %v1329_v54 }
 0x6a1   : > { %v3897_v58 = vsub.f32 %v3876_v26, %v1333_v53 }
 0x6a2   : > { %v3900_v61 = vsub.f32 %v3880_v28, %v1332_v55 }
 0x6a3   : > { %v1337_v62 = vmul.f32 %v3897_v58, %v3897_v58 }
 0x6a4   : > { %v1336_v63 = vmul.f32 %v3900_v61, %v3900_v61 }
 0x6a5   : > { %1340 = vadd.xlane.f32.xlu1 %v1337_v62 }
 0x6a6   : > { %1338 = vadd.xlane.f32.xlu0 %v1336_v63 }
 0x732   : > { %v1341_v51 = vpop.xlane.xlu1 %1340 }
 0x733   : > { %v1343_v52 = vmul.f32 0.0078125, %v1341_v51  ;;  %v1339_v53 = vpop.xlane.xlu0 %1338  ;;  %v1422_v51 = vld [vmem:[%s3731_s23 + $0x1b8] sm:$0xff] }
 0x734   : > { %v1342_v54 = vmul.f32 0.0078125, %v1339_v53  ;;  %v3093_v53 = vcombine.low %v1410_v42, %v1414_v43  ;;  %v4013_v42 = vld [vmem:[%s3742_s17] sm:$0xff]  ;;  %v1447_v43 = vsub.s32 3, %v3819_v56  ;;  %s4205_s17 = sld [smem:[#allocation7_spill]] }
 0x735   : > { %v1345_v55 = vadd.f32 1e-05, %v1343_v52  ;;  %v3091_v52 = vcombine.low %v1409_v40, %v1413_v41  ;;  %v3477_v40 = vld [vmem:[%s3737_s28 + $0x140] sm:$0xff]  }
 0x736   : > { %v1344_v62 = vadd.f32 1e-05, %v1342_v54  ;;  %v3478_v41 = vld [vmem:[%s3737_s28 + $0x1c0] sm:$0xff]  }
 0x737   : > { %3529 = vrsqrt.f32 %v1345_v55  ;;  %v3102_v55 = vcombine.high %v1418_v50, %v1422_v51 }
 0x738   : > { %3531 = vrsqrt.f32 %v1344_v62  ;;  %v1425_v62 = vld [vmem:[%s3731_s23 + $0x1d0] sm:$0xff] }
 0x741   : > { %v3530_v63 = vpop.eup %3529 }
 0x742   : > { %v3532_v1 = vpop.eup %3531  ;;  %v1349_v4 = vmul.f32 %v3530_v63, %v3897_v58  ;;  %v3060_v58 = vcombine.high %v1377_v11, %v1381_v13  ;;  %v1429_v63 = vld [vmem:[%s3731_s23 + $0x1f0] sm:$0xff]  ;;  %v3446_v13 = vld [vmem:[%s3737_s28 + $0xc0] sm:$0xff]  }
 0x743   : > { %v1348_v5 = vmul.f32 %v3532_v1, %v3900_v61  ;;  %v1385_v61 = vld [vmem:[%s3731_s23 + $0x90] sm:$0xff]  ;;  %v1430_v1 = vld [vmem:[%s3731_s23 + $0x1f8] sm:$0xff] }
 0x744   : > { %v1357_v7 = vmul.f32 %v3045_v0, %v1349_v4  ;;  %v3068_v22 = vcombine.high %v1385_v61, %v1389_v17  ;;  %v3067_v30 = vcombine.low %v1385_v61, %v1389_v17  ;;  %v3452_v61 = vld [vmem:[%s3737_s28 + $0x88] sm:$0xff]   ;;  %v3453_v17 = vld [vmem:[%s3737_s28 + $0x50] sm:$0xff]  }
 0x745   : > { %v1356_v8 = vmul.f32 %v3045_v0, %v1348_v5  ;;  %v1426_v0 = vld [vmem:[%s3731_s23 + $0x1d8] sm:$0xff]  ;;  %v3101_v5 = vcombine.low %v1418_v50, %v1422_v51 }
 0x746   : > { %v1365_v12 = vadd.f32 %v3046_v6, %v1357_v7  ;;  %v3110_v7 = vcombine.high %v1426_v0, %v1430_v1  ;;  %v3109_v11 = vcombine.low %v1426_v0, %v1430_v1 }
 0x747   : > { %v1364_v10 = vadd.f32 %v3046_v6, %v1356_v8  ;;  %v3108_v6 = vcombine.high %v1425_v62, %v1429_v63  ;;  %v3107_v8 = vcombine.low %v1425_v62, %v1429_v63 }
 0x749   : > { %v3946_v15 = vpack.c.bf16 %v1365_v12, %v1364_v10  ;;  %v3445_v12 = vld [vmem:[%s3737_s28 + $0x40] sm:$0xff]   ;;  %v3449_v10 = vld [vmem:[%s3737_s28 + $0x48] sm:$0xff]  }
 0x74b   : > { %1826 = vmatmul.mubr.bf16.vlgmr.msra.gmra.mrb[8].mxu1 %v3946_v15  ;;  %1869 = vmatmul.mubr.bf16.vlgmr.msra.gmra.mrb[8].mxu0 %v3946_v15 }
 0x74c   : > { %1880 = vmatpush1.bf16.msra.mxu1 %v3051_v45  ;;  %1923 = vmatpush1.bf16.msra.mxu0 %v3053_v49  ;;  %v3085_v45 = vcombine.low %v1402_v36, %v1406_v37  ;;  %v1421_v49 = vld [vmem:[%s3731_s23 + $0x1b0] sm:$0xff] }
 0x74d   : > { %1881 = vmatprep.subr.bf16.mxu1 %v3060_v58  ;;  %1924 = vmatprep.subr.bf16.mxu0 %v3062_v16  ;;  %v3100_v54 = vcombine.high %v1417_v48, %v1421_v49  ;;  %v3099_v4 = vcombine.low %v1417_v48, %v1421_v49  ;;  %v3450_v58 = vld [vmem:[%s3737_s28 + $0xc8] sm:$0xff]   ;;  %v3471_v36 = vld [vmem:[%s3737_s28 + $0x30] sm:$0xff]  }
 0x74e   : > { %1911 = vmatprep.mubr.bf16.mxu1 %v3604_v32  ;;  %1954 = vmatprep.mubr.bf16.mxu0 %v3604_v32  ;;  %v3077_v32 = vcombine.low %v1394_v27, %v1398_v29  ;;  %v3451_v16 = vld [vmem:[%s3737_s28 + $0x8] sm:$0xff]   ;;  %v3463_v27 = vld [vmem:[%s3737_s28 + $0x20] sm:$0xff]   ;;  %v3472_v37 = vld [vmem:[%s3737_s28 + $0xb0] sm:$0xff]  }
 0x74f   : > { %v3464_v29 = vld [vmem:[%s3737_s28 + $0xa0] sm:$0xff]  }
 0x750   : > { %1882 = vmatpush1.bf16.msra.mxu1 %v3059_v20  ;;  %1925 = vmatpush1.bf16.msra.mxu0 %v3061_v21  ;;  %v3456_v20 = vld [vmem:[%s3737_s28 + $0x90] sm:$0xff]   ;;  %v3458_v21 = vld [vmem:[%s3737_s28 + $0xd8] sm:$0xff]  }
 0x751   : > { %1883 = vmatprep.subr.bf16.mxu1 %v3068_v22  ;;  %1926 = vmatprep.subr.bf16.mxu0 %v3070_v23  ;;  %v3459_v22 = vld [vmem:[%s3737_s28 + $0x18] sm:$0xff]  }
 0x752   : > { %v3460_v23 = vld [vmem:[%s3737_s28 + $0x98] sm:$0xff]  }
 0x754   : > { %1884 = vmatpush1.bf16.msra.mxu1 %v3067_v30  ;;  %1927 = vmatpush1.bf16.msra.mxu0 %v3069_v31  ;;  %v3465_v30 = vld [vmem:[%s3737_s28 + $0x68] sm:$0xff]  }
 0x755   : > { %1885 = vmatprep.subr.bf16.mxu1 %v3076_v3  ;;  %1928 = vmatprep.subr.bf16.mxu0 %v3078_v33  ;;  %v3466_v31 = vld [vmem:[%s3737_s28 + $0xe8] sm:$0xff]  }
 0x756   : > { %v3467_v3 = vld [vmem:[%s3737_s28 + $0x28] sm:$0xff]  }
 0x757   : > { %v3468_v33 = vld [vmem:[%s3737_s28 + $0xa8] sm:$0xff]  }
 0x758   : > { %1886 = vmatpush1.bf16.msra.mxu1 %v3075_v38  ;;  %1929 = vmatpush1.bf16.msra.mxu0 %v3077_v32  ;;  %v3473_v38 = vld [vmem:[%s3737_s28 + $0x78] sm:$0xff]  }
 0x759   : > { %1887 = vmatprep.subr.bf16.mxu1 %v3084_v2  ;;  %1930 = vmatprep.subr.bf16.mxu0 %v3086_v39  ;;  %v3474_v32 = vld [vmem:[%s3737_s28 + $0xf8] sm:$0xff]  }
 0x75a   : > { %v3475_v2 = vld [vmem:[%s3737_s28 + $0x38] sm:$0xff]  }
 0x75b   : > { %v3476_v39 = vld [vmem:[%s3737_s28 + $0xb8] sm:$0xff]  }
 0x75c   : > { %1888 = vmatpush1.bf16.msra.mxu1 %v3083_v44  ;;  %1931 = vmatpush1.bf16.msra.mxu0 %v3085_v45  ;;  %v1436_v44 = vrot.slane %v4013_v42, %v695_v57  ;;  %v1444_v45 = vrot.slane %v4013_v42, %v703_v59 }
 0x75d   : > { %1889 = vmatprep.subr.bf16.mxu1 %v3092_v46  ;;  %1932 = vmatprep.subr.bf16.mxu0 %v3094_v47  ;;  %v1440_v46 = vrot.slane %v4013_v42, %v699_v60  ;;  %v1448_v47 = vrot.slane %v4013_v42, %v1447_v43 }
 0x760   : > { %1890 = vmatpush1.bf16.msra.mxu1 %v3091_v52  ;;  %1933 = vmatpush1.bf16.msra.mxu0 %v3093_v53 }
 0x761   : > { %1891 = vmatprep.subr.bf16.mxu1 %v3100_v54  ;;  %1934 = vmatprep.subr.bf16.mxu0 %v3102_v55 }
 0x764   : > { %1892 = vmatpush1.bf16.msra.mxu1 %v3099_v4  ;;  %1935 = vmatpush1.bf16.msra.mxu0 %v3101_v5 }
 0x765   : > { %1893 = vmatprep.subr.bf16.mxu1 %v3108_v6  ;;  %1936 = vmatprep.subr.bf16.mxu0 %v3110_v7 }
 0x768   : > { %1894 = vmatpush1.bf16.msra.mxu1 %v3107_v8  ;;  %1937 = vmatpush1.bf16.msra.mxu0 %v3109_v11 }
 0x769   : > { %3209 = vmatprep.subr.bf16.mxu1 %v3445_v12  ;;  %3231 = vmatprep.subr.bf16.mxu0 %v3446_v13 }
 0x76b   : > { %1912 = vmatmul.mubr.bf16.vlgmr.msra.gmra.mrb[12].mxu1 %v3946_v15  ;;  %1955 = vmatmul.mubr.bf16.vlgmr.msra.gmra.mrb[12].mxu0 %v3946_v15  ;;  %v3457_v15 = vld [vmem:[%s3737_s28 + $0x58] sm:$0xff]  }
 0x76c   : > { %3210 = vmatpush3.bf16.msra.mxu1 %v3447_v14  ;;  %3232 = vmatpush3.bf16.msra.mxu0 %v3448_v9 }
 0x76d   : > { %3211 = vmatprep.subr.bf16.mxu1 %v3449_v10  ;;  %3233 = vmatprep.subr.bf16.mxu0 %v3450_v58 }
 0x770   : > { %3212 = vmatpush3.bf16.msra.mxu1 %v3451_v16  ;;  %3234 = vmatpush3.bf16.msra.mxu0 %v3452_v61 }
 0x771   : > { %3213 = vmatprep.subr.bf16.mxu1 %v3453_v17  ;;  %3235 = vmatprep.subr.bf16.mxu0 %v3454_v18 }
 0x774   : > { %3214 = vmatpush3.bf16.msra.mxu1 %v3455_v19  ;;  %3236 = vmatpush3.bf16.msra.mxu0 %v3456_v20 }
 0x775   : > { %3215 = vmatprep.subr.bf16.mxu1 %v3457_v15  ;;  %3237 = vmatprep.subr.bf16.mxu0 %v3458_v21 }
 0x778   : > { %3216 = vmatpush3.bf16.msra.mxu1 %v3459_v22  ;;  %3238 = vmatpush3.bf16.msra.mxu0 %v3460_v23  ;;  %v1451_v22 = vsub.s32 4, %v3819_v56 }
 0x779   : > { %3217 = vmatprep.subr.bf16.mxu1 %v3461_v24  ;;  %3239 = vmatprep.subr.bf16.mxu0 %v3462_v25 }
 0x77c   : > { %3218 = vmatpush3.bf16.msra.mxu1 %v3463_v27  ;;  %3240 = vmatpush3.bf16.msra.mxu0 %v3464_v29 }
 0x77d   : > { %3219 = vmatprep.subr.bf16.mxu1 %v3465_v30  ;;  %3241 = vmatprep.subr.bf16.mxu0 %v3466_v31  ;;  %v2045_v31 = vld [vmem:[%s4205_s17] sm:$0xff] }
 0x780   : > { %3220 = vmatpush3.bf16.msra.mxu1 %v3467_v3  ;;  %3242 = vmatpush3.bf16.msra.mxu0 %v3468_v33 }
 0x781   : > { %3221 = vmatprep.subr.bf16.mxu1 %v3469_v34  ;;  %3243 = vmatprep.subr.bf16.mxu0 %v3470_v35  ;;  %v2053_v34 = vld [vmem:[%s4205_s17 + $0x40] sm:$0xff] }
 0x784   : > { %3222 = vmatpush3.bf16.msra.mxu1 %v3471_v36  ;;  %3244 = vmatpush3.bf16.msra.mxu0 %v3472_v37 }
 0x785   : > { %3223 = vmatprep.subr.bf16.mxu1 %v3473_v38  ;;  %3245 = vmatprep.subr.bf16.mxu0 %v3474_v32  ;;  %v2047_v38 = vld [vmem:[%s4205_s17 + $0x10] sm:$0xff] }
 0x788   : > { %3224 = vmatpush3.bf16.msra.mxu1 %v3475_v2  ;;  %3246 = vmatpush3.bf16.msra.mxu0 %v3476_v39  ;;  %v2055_v39 = vld [vmem:[%s4205_s17 + $0x50] sm:$0xff] }
 0x789   : > { %3253 = vmatprep.subr.bf16.mxu1 %v3477_v40  ;;  %3275 = vmatprep.subr.bf16.mxu0 %v3478_v41 }
 0x81e   : > { %v1827_v48 = vpop.f32.mrb[8].mxu1  ;;  %v1870_v49 = vpop.f32.mrb[8].mxu0 }
 0x81f   : > { %v1828_v50 = vadd.f32 %v1827_v48, %v1436_v44  ;;  %v1871_v51 = vadd.f32 %v1870_v49, %v1444_v45  ;;  %v1829_v52 = vpop.f32.mrb[9].mxu1  ;;  %v1872_v53 = vpop.f32.mrb[9].mxu0  ;;  %v2054_v48 = vld [vmem:[%s4205_s17 + $0x48] sm:$0xff] }
 0x820   : > { %v1830_v54 = vadd.f32 %v1829_v52, %v1440_v46  ;;  %v1873_v55 = vadd.f32 %v1872_v53, %v1448_v47  ;;  %v1831_v62 = vpop.f32.mrb[10].mxu1  ;;  %v1874_v57 = vpop.f32.mrb[10].mxu0  ;;  %v2048_v52 = vld [vmem:[%s4205_s17 + $0x18] sm:$0xff] }
 0x821   : > { %v1981_v63 = vmul.f32 0.70710677, %v1828_v50  ;;  %v1983_v0 = vmul.f32 0.70710677, %v1871_v51  ;;  %v1832_v4 = vadd.f32 %v1831_v62, %v1436_v44  ;;  %v1875_v5 = vadd.f32 %v1874_v57, %v1444_v45  ;;  %v1833_v60 = vpop.f32.mrb[11].mxu1  ;;  %v1876_v6 = vpop.f32.mrb[11].mxu0 }
 0x822   : > { %v1982_v1 = vmul.f32 0.70710677, %v1830_v54  ;;  %v1984_v59 = vmul.f32 0.70710677, %v1873_v55  ;;  %v1834_v7 = vadd.f32 %v1833_v60, %v1440_v46  ;;  %v1877_v8 = vadd.f32 %v1876_v6, %v1448_v47  ;;  %v2046_v47 = vld [vmem:[%s4205_s17 + $0x8] sm:$0xff]  ;;  %v2056_v53 = vld [vmem:[%s4205_s17 + $0x58] sm:$0xff] }
 0x823   : > { %3533 = verf.f32 %v1981_v63  ;;  %v1989_v11 = vmul.f32 0.70710677, %v1832_v4  ;;  %v1991_v12 = vmul.f32 0.70710677, %v1875_v5  ;;  %v1965_v18 = vmul.f32 0.5, %v1828_v50 }
 0x824   : > { %3535 = verf.f32 %v1983_v0  ;;  %v1990_v13 = vmul.f32 0.70710677, %v1834_v7  ;;  %v1992_v14 = vmul.f32 0.70710677, %v1877_v8  ;;  %v1967_v15 = vmul.f32 0.5, %v1871_v51 }
 0x825   : > { %3537 = verf.f32 %v1982_v1  ;;  %v1966_v25 = vmul.f32 0.5, %v1830_v54  ;;  %v1973_v27 = vmul.f32 0.5, %v1832_v4  ;;  %v1968_v33 = vmul.f32 0.5, %v1873_v55 }
 0x826   : > { %3539 = verf.f32 %v1984_v59  ;;  %v1975_v35 = vmul.f32 0.5, %v1875_v5  ;;  %v1974_v40 = vmul.f32 0.5, %v1834_v7  ;;  %v1976_v45 = vmul.f32 0.5, %v1877_v8  ;;  %v3479_v8 = vld [vmem:[%s3737_s28 + $0x100] sm:$0xff]  }
 0x827   : > { %3541 = verf.f32 %v1989_v11  ;;  %v1459_v54 = vsub.s32 6, %v3819_v56  ;;  %v1455_v63 = vsub.s32 5, %v3819_v56  ;;  %v1463_v4 = vsub.s32 7, %v3819_v56 }
 0x828   : > { %3543 = verf.f32 %v1991_v12  ;;  %v3480_v12 = vld [vmem:[%s3737_s28 + $0x180] sm:$0xff]  }
 0x829   : > { %3545 = verf.f32 %v1990_v13  ;;  %v1452_v13 = vrot.slane %v4013_v42, %v1451_v22  ;;  %v1464_v56 = vrot.slane %v4013_v42, %v1463_v4  ;;  %v3485_v22 = vld [vmem:[%s3737_s28 + $0x150] sm:$0xff]  }
 0x82a   : > { %3547 = verf.f32 %v1992_v14  ;;  %v1460_v14 = vrot.slane %v4013_v42, %v1459_v54 }
 0x82d   : > { %v3534_v9 = vpop.eup %3533 }
 0x82e   : > { %v3536_v10 = vpop.eup %3535  ;;  %v2013_v58 = vadd.f32 1.0, %v3534_v9  ;;  %v3481_v9 = vld [vmem:[%s3737_s28 + $0x148] sm:$0xff]  }
 0x82f   : > { %v3538_v16 = vpop.eup %3537  ;;  %v2015_v61 = vadd.f32 1.0, %v3536_v10  ;;  %v3482_v10 = vld [vmem:[%s3737_s28 + $0x1c8] sm:$0xff]  }
 0x830   : > { %v3540_v17 = vpop.eup %3539  ;;  %v2014_v19 = vadd.f32 1.0, %v3538_v16  ;;  %v2029_v24 = vmul.f32 %v2013_v58, %v1965_v18  ;;  %v1456_v58 = vrot.slane %v4013_v42, %v1455_v63 }
 0x831   : > { %v3542_v20 = vpop.eup %3541  ;;  %v2016_v21 = vadd.f32 1.0, %v3540_v17  ;;  %v2031_v3 = vmul.f32 %v2015_v61, %v1967_v15  ;;  %v3483_v17 = vld [vmem:[%s3737_s28 + $0x108] sm:$0xff]  }
 0x832   : > { %v3544_v23 = vpop.eup %3543  ;;  %v2021_v29 = vadd.f32 1.0, %v3542_v20  ;;  %v2030_v32 = vmul.f32 %v2014_v19, %v1966_v25  ;;  %v2061_v49 = vmul.f32 %v2045_v31, %v2029_v24 }
 0x833   : > { %v3546_v30 = vpop.eup %3545  ;;  %v2023_v36 = vadd.f32 1.0, %v3544_v23  ;;  %v2032_v43 = vmul.f32 %v2016_v21, %v1968_v33  ;;  %v2063_v55 = vmul.f32 %v2047_v38, %v2031_v3  ;;  %v3484_v21 = vld [vmem:[%s3737_s28 + $0x188] sm:$0xff]   ;;  %v3487_v33 = vld [vmem:[%s3737_s28 + $0x110] sm:$0xff]  }
 0x834   : > { %v3548_v37 = vpop.eup %3547  ;;  %v2037_v2 = vmul.f32 %v2021_v29, %v1973_v27  ;;  %v2022_v41 = vadd.f32 1.0, %v3546_v30  ;;  %v2062_v0 = vmul.f32 %v2046_v47, %v2030_v32  ;;  %v3486_v27 = vld [vmem:[%s3737_s28 + $0x1d0] sm:$0xff]   ;;  %v3489_v32 = vld [vmem:[%s3737_s28 + $0x158] sm:$0xff]  }
 0x835   : > { %v2039_v44 = vmul.f32 %v2023_v36, %v1975_v35  ;;  %v2024_v46 = vadd.f32 1.0, %v3548_v37  ;;  %v2064_v5 = vmul.f32 %v2048_v52, %v2032_v43  ;;  %v3488_v38 = vld [vmem:[%s3737_s28 + $0x190] sm:$0xff]   ;;  %v3492_v47 = vld [vmem:[%s3737_s28 + $0x198] sm:$0xff]   ;;  %v3497_v52 = vld [vmem:[%s3737_s28 + $0x168] sm:$0xff]  }
 0x836   : > { %v2069_v50 = vmul.f32 %v2053_v34, %v2037_v2  ;;  %v2038_v51 = vmul.f32 %v2022_v41, %v1974_v40  ;;  %v3490_v40 = vld [vmem:[%s3737_s28 + $0x1d8] sm:$0xff]  }
 0x837   : > { %v2071_v62 = vmul.f32 %v2055_v39, %v2039_v44  ;;  %v2040_v57 = vmul.f32 %v2024_v46, %v1976_v45  ;;  %v3491_v45 = vld [vmem:[%s3737_s28 + $0x118] sm:$0xff]  }
 0x838   : > { %v2070_v1 = vmul.f32 %v2054_v48, %v2038_v51  ;;  %v2077_v59 = vpack.c.bf16 %v2069_v50, %v2061_v49  ;;  %v3493_v48 = vld [vmem:[%s3737_s28 + $0x160] sm:$0xff]  }
 0x839   : > { %v2072_v60 = vmul.f32 %v2056_v53, %v2040_v57  ;;  %v2079_v6 = vpack.c.bf16 %v2071_v62, %v2063_v55  ;;  %v3494_v49 = vld [vmem:[%s3737_s28 + $0x1e0] sm:$0xff]   ;;  %v3498_v53 = vld [vmem:[%s3737_s28 + $0x1e8] sm:$0xff]  }
 0x83a   : > { %v2078_v7 = vpack.c.bf16 %v2070_v1, %v2062_v0  ;;  %v3495_v50 = vld [vmem:[%s3737_s28 + $0x120] sm:$0xff]   ;;  %v3499_v57 = vld [vmem:[%s3737_s28 + $0x128] sm:$0xff]  }
 0x83b   : > { %v2080_v11 = vpack.c.bf16 %v2072_v60, %v2064_v5  ;;  %v3496_v51 = vld [vmem:[%s3737_s28 + $0x1a0] sm:$0xff]   ;;  %v3500_v1 = vld [vmem:[%s3737_s28 + $0x1a8] sm:$0xff]  }
 0x83c   : > { %2631 = vmatprep.mubr.bf16.mxu1 %v2078_v7 }
 0x83d   : > { %2672 = vmatprep.mubr.bf16.mxu0 %v2080_v11  ;;  %2632 = vmatmul.mubr.bf16.vlgmr.msra.gmra.mrb[16].mxu1 %v2077_v59  ;;  %v3501_v59 = vld [vmem:[%s3737_s28 + $0x170] sm:$0xff]  }
 0x83e   : > { %2673 = vmatmul.mubr.bf16.vlgmr.msra.gmra.mrb[16].mxu0 %v2079_v6  ;;  %3254 = vmatpush3.bf16.msra.mxu1 %v3479_v8  ;;  %v1913_v16 = vpop.f32.mrb[12].mxu1  ;;  %v1956_v61 = vpop.f32.mrb[12].mxu0  ;;  %v3502_v6 = vld [vmem:[%s3737_s28 + $0x1f0] sm:$0xff]  }
 0x83f   : > { %3276 = vmatpush3.bf16.msra.mxu0 %v3480_v12  ;;  %v4063_v18 = vadd.f32 %v1913_v16, %v1452_v13  ;;  %v4065_v19 = vadd.f32 %v1956_v61, %v1460_v14  ;;  %3255 = vmatprep.subr.bf16.mxu1 %v3481_v9  ;;  %v1915_v20 = vpop.f32.mrb[13].mxu1  ;;  %v1958_v15 = vpop.f32.mrb[13].mxu0 }
 0x840   : > { %3277 = vmatprep.subr.bf16.mxu0 %v3482_v10  ;;  %v4069_v42 = vadd.f32 %v1915_v20, %v1456_v58  ;;  %v4071_v23 = vadd.f32 %v1958_v15, %v1464_v56  ;;  %v1917_v24 = vpop.f32.mrb[14].mxu1  ;;  %v1960_v25 = vpop.f32.mrb[14].mxu0  ;;  %v3504_v15 = vld [vmem:[%s3737_s28 + $0x1b0] sm:$0xff]  }
 0x841   : > { %v1985_v29 = vmul.f32 0.70710677, %v4063_v18  ;;  %v1987_v30 = vmul.f32 0.70710677, %v4065_v19  ;;  %v1918_v34 = vadd.f32 %v1917_v24, %v1452_v13  ;;  %v4079_v35 = vadd.f32 %v1960_v25, %v1460_v14  ;;  %v1919_v36 = vpop.f32.mrb[15].mxu1  ;;  %v1962_v37 = vpop.f32.mrb[15].mxu0 }
 0x842   : > { %v1986_v31 = vmul.f32 0.70710677, %v4069_v42  ;;  %v1988_v3 = vmul.f32 0.70710677, %v4071_v23  ;;  %3256 = vmatpush3.bf16.msra.mxu1 %v3483_v17  ;;  %v4083_v2 = vadd.f32 %v1919_v36, %v1456_v58  ;;  %v4085_v39 = vadd.f32 %v1962_v37, %v1464_v56  ;;  %v2049_v14 = vld [vmem:[%s4205_s17 + $0x20] sm:$0xff]  ;;  %v3503_v56 = vld [vmem:[%s3737_s28 + $0x130] sm:$0xff]  }
 0x843   : > { %3549 = verf.f32 %v1985_v29  ;;  %3278 = vmatpush3.bf16.msra.mxu0 %v3484_v21  ;;  %3257 = vmatprep.subr.bf16.mxu1 %v3485_v22  ;;  %v1993_v41 = vmul.f32 0.70710677, %v1918_v34  ;;  %v1995_v43 = vmul.f32 0.70710677, %v4079_v35  ;;  %v1969_v5 = vmul.f32 0.5, %v4063_v18  ;;  %v2057_v18 = vld [vmem:[%s4205_s17 + $0x60] sm:$0xff] }
 0x844   : > { %3551 = verf.f32 %v1987_v30  ;;  %3279 = vmatprep.subr.bf16.mxu0 %v3486_v27  ;;  %v1994_v44 = vmul.f32 0.70710677, %v4083_v2  ;;  %v1996_v46 = vmul.f32 0.70710677, %v4085_v39  ;;  %v1971_v8 = vmul.f32 0.5, %v4065_v19  ;;  %v3505_v21 = vld [vmem:[%s3737_s28 + $0x178] sm:$0xff]  }
 0x845   : > { %3553 = verf.f32 %v1986_v31  ;;  %v1970_v9 = vmul.f32 0.5, %v4069_v42  ;;  %v1977_v10 = vmul.f32 0.5, %v1918_v34  ;;  %v1972_v17 = vmul.f32 0.5, %v4071_v23  ;;  %v2051_v42 = vld [vmem:[%s4205_s17 + $0x30] sm:$0xff]  ;;  %v3506_v30 = vld [vmem:[%s3737_s28 + $0x1f8] sm:$0xff]   ;;  %v2058_v36 = vld [vmem:[%s4205_s17 + $0x68] sm:$0xff] }
 0x846   : > { %3555 = verf.f32 %v1988_v3  ;;  %3258 = vmatpush3.bf16.msra.mxu1 %v3487_v33  ;;  %v1979_v19 = vmul.f32 0.5, %v4079_v35  ;;  %v2059_v23 = vld [vmem:[%s4205_s17 + $0x70] sm:$0xff]  ;;  %v1978_v27 = vmul.f32 0.5, %v4083_v2  ;;  %v1980_v33 = vmul.f32 0.5, %v4085_v39  ;;  %v2050_v35 = vld [vmem:[%s4205_s17 + $0x28] sm:$0xff]  ;;  %v3507_v2 = vld [vmem:[%s3737_s28 + $0x138] sm:$0xff]  }
 0x847   : > { %3557 = verf.f32 %v1993_v41  ;;  %3280 = vmatpush3.bf16.msra.mxu0 %v3488_v38  ;;  %3259 = vmatprep.subr.bf16.mxu1 %v3489_v32  ;;  %v2060_v39 = vld [vmem:[%s4205_s17 + $0x78] sm:$0xff] }
 0x848   : > { %3559 = verf.f32 %v1995_v43  ;;  %3281 = vmatprep.subr.bf16.mxu0 %v3490_v40  ;;  %v2052_v40 = vld [vmem:[%s4205_s17 + $0x38] sm:$0xff] }
 0x849   : > { %3561 = verf.f32 %v1994_v44 }
 0x84a   : > { %3563 = verf.f32 %v1996_v46  ;;  %3260 = vmatpush3.bf16.msra.mxu1 %v3491_v45  ;;  %v3508_v45 = vld [vmem:[%s3737_s28 + $0x1b8] sm:$0xff]   ;;  %s4206_s28 = sld [smem:[#allocation6_spill]] }
 0x84b   : > { %3282 = vmatpush3.bf16.msra.mxu0 %v3492_v47  ;;  %3261 = vmatprep.subr.bf16.mxu1 %v3493_v48 }
 0x84c   : > { %3283 = vmatprep.subr.bf16.mxu0 %v3494_v49 }
 0x84d   : > { %v3550_v54 = vpop.eup %3549 }
 0x84e   : > { %v3552_v55 = vpop.eup %3551  ;;  %v2017_v62 = vadd.f32 1.0, %v3550_v54  ;;  %3262 = vmatpush3.bf16.msra.mxu1 %v3495_v50 }
 0x84f   : > { %v3554_v63 = vpop.eup %3553  ;;  %v2019_v0 = vadd.f32 1.0, %v3552_v55  ;;  %3284 = vmatpush3.bf16.msra.mxu0 %v3496_v51  ;;  %3263 = vmatprep.subr.bf16.mxu1 %v3497_v52 }
 0x850   : > { %v3556_v4 = vpop.eup %3555  ;;  %v2018_v60 = vadd.f32 1.0, %v3554_v63  ;;  %3285 = vmatprep.subr.bf16.mxu0 %v3498_v53  ;;  %v2033_v13 = vmul.f32 %v2017_v62, %v1969_v5  ;;  %v2765_v54 = vld [vmem:[%s4206_s28] sm:$0xff] }
 0x851   : > { %v3558_v7 = vpop.eup %3557  ;;  %v2020_v11 = vadd.f32 1.0, %v3556_v4  ;;  %v2035_v61 = vmul.f32 %v2019_v0, %v1971_v8 }
 0x852   : > { %v3560_v12 = vpop.eup %3559  ;;  %v2025_v58 = vadd.f32 1.0, %v3558_v7  ;;  %3264 = vmatpush3.bf16.msra.mxu1 %v3499_v57  ;;  %v2034_v24 = vmul.f32 %v2018_v60, %v1970_v9  ;;  %v2065_v37 = vmul.f32 %v2049_v14, %v2033_v13  ;;  %v2213_v57 = vld [vmem:[%s3748_s26] sm:$0xff]  ;;  %v2214_v60 = vld [vmem:[%s3748_s26 + $0x8] sm:$0xff] }
 0x853   : > { %v3562_v16 = vpop.eup %3561  ;;  %v2027_v20 = vadd.f32 1.0, %v3560_v12  ;;  %3286 = vmatpush3.bf16.msra.mxu0 %v3500_v1  ;;  %3265 = vmatprep.subr.bf16.mxu1 %v3501_v59  ;;  %v2036_v31 = vmul.f32 %v2020_v11, %v1972_v17  ;;  %v2067_v41 = vmul.f32 %v2051_v42, %v2035_v61 }
 0x854   : > { %v3564_v22 = vpop.eup %3563  ;;  %v2041_v25 = vmul.f32 %v2025_v58, %v1977_v10  ;;  %v2026_v29 = vadd.f32 1.0, %v3562_v16  ;;  %3287 = vmatprep.subr.bf16.mxu0 %v3502_v6  ;;  %v2066_v46 = vmul.f32 %v2050_v35, %v2034_v24 }
 0x855   : > { %v2043_v3 = vmul.f32 %v2027_v20, %v1979_v19  ;;  %v2028_v34 = vadd.f32 1.0, %v3564_v22  ;;  %v2068_v49 = vmul.f32 %v2052_v40, %v2036_v31  ;;  %v2766_v31 = vld [vmem:[%s4206_s28 + $0x8] sm:$0xff] }
 0x856   : > { %v2073_v38 = vmul.f32 %v2057_v18, %v2041_v25  ;;  %v2042_v32 = vmul.f32 %v2026_v29, %v1978_v27  ;;  %3266 = vmatpush3.bf16.msra.mxu1 %v3503_v56 }
 0x857   : > { %v2075_v43 = vmul.f32 %v2059_v23, %v2043_v3  ;;  %v2044_v44 = vmul.f32 %v2028_v34, %v1980_v33  ;;  %3288 = vmatpush3.bf16.msra.mxu0 %v3504_v15  ;;  %3267 = vmatprep.subr.bf16.mxu1 %v3505_v21 }
 0x858   : > { %3289 = vmatprep.subr.bf16.mxu0 %v3506_v30  ;;  %v2074_v47 = vmul.f32 %v2058_v36, %v2042_v32  ;;  %v2081_v48 = vpack.c.bf16 %v2073_v38, %v2065_v37 }
 0x859   : > { %v2076_v50 = vmul.f32 %v2060_v39, %v2044_v44  ;;  %v2083_v51 = vpack.c.bf16 %v2075_v43, %v2067_v41 }
 0x85a   : > { %3268 = vmatpush3.bf16.msra.mxu1 %v3507_v2  ;;  %v2082_v52 = vpack.c.bf16 %v2074_v47, %v2066_v46 }
 0x85b   : > { %3290 = vmatpush3.bf16.msra.mxu0 %v3508_v45  ;;  %v2084_v53 = vpack.c.bf16 %v2076_v50, %v2068_v49 }
 0x85c   : > { %2713 = vmatprep.mubr.bf16.mxu1 %v2082_v52 }
 0x85d   : > { %2754 = vmatprep.mubr.bf16.mxu0 %v2084_v53  ;;  %2714 = vmatmul.mubr.bf16.vlgmr.msra.gmra.mrb[20].mxu1 %v2081_v48 }
 0x85e   : > { %2755 = vmatmul.mubr.bf16.vlgmr.msra.gmra.mrb[20].mxu0 %v2083_v51  ;;  %3353 = vmatprep.mubr.msk.f32.mxu1 %vm1008_vm3, %v2765_v54 }
 0x910   : > { %v3225_v55 = vpop.f32.mrb[16].mxu1 }
 0x911   : > { %v3247_v62 = vpop.f32.mrb[16].mxu0  ;;  %v3226_v63 = vpop.f32.mrb[17].mxu1 }
 0x912   : > { %v3227_v0 = vadd.f32 %v3226_v63, %v3225_v55  ;;  %v3248_v1 = vpop.f32.mrb[17].mxu0  ;;  %v3228_v59 = vpop.f32.mrb[18].mxu1 }
 0x913   : > { %v3249_v4 = vadd.f32 %v3248_v1, %v3247_v62  ;;  %v3250_v5 = vpop.f32.mrb[18].mxu0  ;;  %v3229_v6 = vpop.f32.mrb[19].mxu1 }
 0x914   : > { %v2634_v7 = vadd.f32 %v3227_v0, %v2213_v57  ;;  %v3230_v8 = vadd.f32 %v3229_v6, %v3228_v59  ;;  %v3251_v11 = vpop.f32.mrb[19].mxu0 }
 0x915   : > { %v3252_v12 = vadd.f32 %v3251_v11, %v3250_v5 }
 0x916   : > { %v2675_v13 = vadd.f32 %v3249_v4, %v2634_v7  ;;  %v2637_v14 = vadd.f32 %v3230_v8, %v2214_v60 }
 0x918   : > { %v2678_v9 = vadd.f32 %v3252_v12, %v2637_v14 }
 0x930   : > { %v3269_v10 = vpop.f32.mrb[20].mxu1 }
 0x931   : > { %v3291_v58 = vpop.f32.mrb[20].mxu0  ;;  %v3270_v56 = vpop.f32.mrb[21].mxu1 }
 0x932   : > { %v3271_v16 = vadd.f32 %v3270_v56, %v3269_v10  ;;  %v3292_v61 = vpop.f32.mrb[21].mxu0  ;;  %v3272_v17 = vpop.f32.mrb[22].mxu1 }
 0x933   : > { %v3293_v18 = vadd.f32 %v3292_v61, %v3291_v58  ;;  %v3294_v19 = vpop.f32.mrb[22].mxu0  ;;  %v3273_v20 = vpop.f32.mrb[23].mxu1 }
 0x934   : > { %v2716_v15 = vadd.f32 %v3271_v16, %v2675_v13  ;;  %v3274_v21 = vadd.f32 %v3273_v20, %v3272_v17  ;;  %v3295_v22 = vpop.f32.mrb[23].mxu0 }
 0x935   : > { %v3296_v42 = vadd.f32 %v3295_v22, %v3294_v19 }
 0x936   : > { %v2757_v24 = vadd.f32 %v3293_v18, %v2716_v15  ;;  %v2719_v25 = vadd.f32 %v3274_v21, %v2678_v9 }
 0x938   : > { %v2760_v23 = vadd.f32 %v3296_v42, %v2719_v25  ;;  %v2763_v27 = vadd.f32 %v2757_v24, %v3880_v28 }
 0x93a   : > { %v2764_v29 = vadd.f32 %v2760_v23, %v3876_v26 }
 0x93c   : > { %v3376_v30 = vpack.c.bf16 %v2764_v29, %v2763_v27 }
 0x93e   : > { %3377 = vmatprep.subr.bf16.mxu1 %v3376_v30 }
 0x93f   : > { %3379 = vmatpush3.bf16.msra.mxu1 %v3376_v30 }
 0x942   : > { %3354 = vmatmul.mubr.msk.f32.vlgmr.msra.gmra.mrb[24].mxu1 %vm1008_vm3, %v2766_v31 }
 0xa15   : > { %v3355_v3 = vpop.f32.mrb[24].mxu1 }
 0xa16   : > { %2849 = vst [vmem:[#allocation2 + $0x8] sm:$0xff] %v3355_v3  ;;  %v2839_v33 = vpop.f32.mrb[25].mxu1 }
 0xa17   : > { %2848 = vst [vmem:[#allocation2] sm:$0xff] %v2839_v33 }
 0xa18   : > { %3578 = shalt.err (!%p3575_p12)
}
 0xa19   : > { %s4207_s25 = sld [smem:[#allocation8_spill]] }
 0xa1f   : > { %s3579_s16 = scalar_lea.hbm %s4207_s25, 256 }
 0xa20   : > { %p3580_p13 = scmp.ne.s32.totalorder %s4207_s25, %s3579_s16  ;;  %p3585_p2 = scmp.lt.u32.totalorder %s3579_s16, %s4207_s25 }
 0xa22   : > { %p3581_p0 = pnand %p3580_p13, %p3386_p5 }
 0xa24   : > { %p3582_p1 = pneg %p3581_p0 }
 0xa26   : > { %p3587_p3 = pnand %p3585_p2, %p3582_p1 }
 0xa28   : > { %3590 = shalt.err (!%p3587_p3)
}
 0xa29   : > { %s3608_s23 = smov 128   ;;  %s3609_s29 = smov 8  }
 0xa2a   : > { %3383 = dma.vmem_to_hbm [thread:$0]  (%p3386_p5), %s2857_s3, 256, %s4207_s25, [#allocation3], %s3608_s23, %s3608_s23, %s3609_s29  }
 0xa2b   : > { %3596 = dma.done.wait (%p3386_p5), [#allocation3], 256  }
 0xa2c   : > { %3598 = vsyncadd (%p3386_p5), [#allocation3], 4294967040 }
 0xa2d PF: > { %s4208_s19 = sld [smem:[#allocation5_spill]] }
 0xa33   : > { %s25_s29 = sadd.s32 1, %s4208_s19  }
 0xa34   : > { %p22_p4 = scmp.ge.s32.totalorder %s25_s29, 4  }
 0xa36   :  { %24 = sbr.rel (!%p22_p4) target bundleno = 5 (0x5), region = 134 }
 0xa3d   :  { %2872 = vsyncpa [#allocation3], 1 }
 0xa3e   :  { %2874 = vsyncpa [#allocation3 + $0x1], 1 }

// kernel: note_patient_encoder_forward.1
= control target key start
LH: loop header
LB: loop body
LE: loop exit
PB: predicated region body
PF: predicated region fallthrough
CT: control target
= control target key end

     0   :  { %s4338_s0 = inlined_call_operand.vmem [shape: f32[16,128], index: 0, kind: input, shape index: {}]   ;;  %s4339_s1 = inlined_call_operand.vmem [shape: f32[16,16], index: 1, kind: input, shape index: {}]   ;;  %s4340_s2 = inlined_call_operand.vmem [shape: f32[16,16], index: 2, kind: input, shape index: {}]   ;;  %s4341_s3 = inlined_call_operand.vmem [shape: f32[16,1024], index: 3, kind: input, shape index: {}]   ;;  %s4342_s4 = inlined_call_operand.vmem [shape: f32[2,1,128], index: 4, kind: input, shape index: {}]   ;;  %s4343_s5 = inlined_call_operand.vmem [shape: f32[2,1,128], index: 5, kind: input, shape index: {}]   ;;  %s4344_s6 = inlined_call_operand.vmem [shape: bf16[2,128,384], index: 6, kind: input, shape index: {}]   ;;  %s4345_s7 = inlined_call_operand.vmem [shape: f32[2,1,384], index: 7, kind: input, shape index: {}]   ;;  %s4346_s8 = inlined_call_operand.vmem [shape: f32[2,1,128], index: 8, kind: input, shape index: {}]   ;;  %s4347_s9 = inlined_call_operand.vmem [shape: f32[2,1,128], index: 9, kind: input, shape index: {}]   ;;  %s4348_s10 = inlined_call_operand.vmem [shape: bf16[2,128,1024], index: 10, kind: input, shape index: {}]   ;;  %s4349_s11 = inlined_call_operand.vmem [shape: f32[2,1,1024], index: 11, kind: input, shape index: {}]   ;;  %s4350_s12 = inlined_call_operand.vmem [shape: bf16[2,1024,128], index: 12, kind: input, shape index: {}]   ;;  %s4351_s13 = inlined_call_operand.vmem [shape: f32[2,16,128], index: 13, kind: input, shape index: {}]   ;;  %s4352_s14 = inlined_call_operand.hbm [shape: f32[16,128], index: 14, kind: output, shape index: {}]  }
   0x1   :  { %4357 = sst [smem:[#allocation6_spill]] %s4340_s2 }
   0x2   :  { %4358 = sst [smem:[#allocation7_spill]] %s4341_s3 }
   0x3   :  { %4359 = sst [smem:[#allocation8_spill]] %s4352_s14 }
   0x4   :  { %19 = vsyncpa [#allocation3], 0  ;;  %s3749_s29 = smov 0  }
   0x5 LB: > { %4360 = sst [smem:[#allocation5_spill]] %s3665_s29  ;;  %s3755_s30 = sadd.s32 4294967295, %s3665_s29   ;;  %s3665_s29 = sphi %s3749_s29, %s25_s29  }
   0x6   : > { %p3061_p0 = scmp.ge.s32.totalorder %s3665_s29, 1  ;;  %p488_p1 = scmp.lt.s32.totalorder %s3665_s29, 3 }
   0x8   : > { %p489_p2 = pnand %p3061_p0, %p488_p1 }
   0x9   : > { %p564_p3 = scmp.lt.s32.totalorder (!%p489_p2), %s3755_s30, 1  ;;  %p3070_p4 = scmp.ne.s32.totalorder (!%p489_p2), %s3755_s30, 0 }
   0xa   : > { %492 = sbr.rel (%p489_p2) target bundleno = 2621 (0xa3d), region = 76 }
  0x11   : > { %s3761_s15 = scalar_select %p564_p3, %s3755_s30, 1 }
  0x12   : > { %608 = sbr.rel (%p3070_p4) target bundleno = 25 (0x19), region = 80  ;;  %v609_v0 = vld [vmem:[%s4338_s0] sm:$0xff] (!%p3070_p4)  ;;  %v610_v1 = vld [vmem:[%s4338_s0 + $0x8] sm:$0xff] (!%p3070_p4) }
  0x13   : > { %s3444_s22 = smul.u32 192, %s3761_s15  ;;  %s3245_s18 = sshll.u32 %s3761_s15, 9  ;;  %611 = vst [vmem:[#allocation2] sm:$0xff] (!%p3070_p4), %v609_v0  ;;  %612 = vst [vmem:[#allocation2 + $0x8] sm:$0xff] (!%p3070_p4), %v610_v1 }
  0x14   : > { %s3445_s26 = smul.u32 3, %s3761_s15  ;;  %s3795_s23 = scalar_lea.vmem %s4348_s10, %s3245_s18 }
  0x15   : > { %s3784_s14 = scalar_lea.vmem %s4344_s6, %s3444_s22  ;;  %s3065_s24 = sshll.u32 %s3761_s15, 3 }
  0x16   : > { %s3790_s19 = scalar_lea.vmem %s4345_s7, %s3445_s26  ;;  %s3801_s28 = scalar_lea.vmem %s4350_s12, %s3245_s18 }
  0x17   : > { %s3806_s17 = scalar_lea.vmem %s4349_s11, %s3065_s24  ;;  %s3247_s16 = sshll.u32 %s3761_s15, 4 }
  0x18   : > { %s3812_s26 = scalar_lea.vmem %s4351_s13, %s3247_s16 }
  0x19 PF: > { %v3477_v4 = vld [vmem:[%s3784_s14 + $0x4] ss:$12 sps:$4 sm:$0xff]   ;;  %v3479_v5 = vld [vmem:[%s3784_s14] ss:$12 sps:$4 sm:$0xff]   ;;  %v3667_v6 = vmov 0.0   ;;  %v3668_v32 = vmov 0   ;;  %s4361_s24 = scalar_lea.vmem %s4342_s4, %s3761_s15  ;;  %s4362_s22 = scalar_lea.vmem %s4343_s5, %s3761_s15  ;;  %v693_v55 = vlaneseq }
  0x1a   : > { %v3821_v2 = vld [vmem:[#allocation2] sm:$0xff]  ;;  %v3823_v3 = vld [vmem:[#allocation2 + $0x8] sm:$0xff]  ;;  %3365 = vmatprep.subr.bf16.mxu1 %v3667_v6  ;;  %836 = vmatprep.subr.bf16.mxu0 %v3477_v4  ;;  %v3487_v20 = vld [vmem:[%s3784_s14 + $0x30] ss:$12 sps:$4 sm:$0xff]   ;;  %vm3669_vm0 = vmmov 0   ;;  %vm920_vm1 = vcmask 523264   ;;  %s4363_s16 = scalar_lea.vmem %s4346_s8, %s3761_s15  ;;  %s4364_s27 = scalar_lea.vmem %s4347_s9, %s3761_s15 }
  0x1b   : > { %619 = vadd.xlane.f32.xlu0 %v3821_v2  ;;  %v3480_v7 = vld [vmem:[%s3784_s14 + $0x8] ss:$12 sps:$4 sm:$0xff]   ;;  %837 = vmatpush1.bf16.msra.mxu0 %v3479_v5  ;;  %v3483_v17 = vld [vmem:[%s3784_s14 + $0x18] ss:$12 sps:$4 sm:$0xff]   ;;  %v3484_v18 = vld [vmem:[%s3784_s14 + $0x20] ss:$12 sps:$4 sm:$0xff]  }
  0x1c   : > { %v3481_v8 = vld [vmem:[%s3784_s14 + $0x1c] ss:$12 sps:$4 sm:$0xff]   ;;  %3366 = vmatpush3.bf16.msra.mxu1 %v3480_v7  ;;  %v3485_v19 = vld [vmem:[%s3784_s14 + $0x34] ss:$12 sps:$4 sm:$0xff]   ;;  %v3488_v21 = vld [vmem:[%s3784_s14 + $0x38] ss:$12 sps:$4 sm:$0xff]   ;;  %868 = vmatprep.mubr.bf16.mxu0 %v3668_v32 }
  0x1d   : > { %838 = vmatprep.subr.bf16.mxu0 %v3481_v8  ;;  %3367 = vmatprep.subr.bf16.mxu1 %v3667_v6  ;;  %v3489_v22 = vld [vmem:[%s3784_s14 + $0x4c] ss:$12 sps:$4 sm:$0xff]   ;;  %v3491_v23 = vld [vmem:[%s3784_s14 + $0x48] ss:$12 sps:$4 sm:$0xff]   ;;  %v3492_v24 = vld [vmem:[%s3784_s14 + $0x50] ss:$12 sps:$4 sm:$0xff]  }
  0x1e   : > { %v3493_v25 = vld [vmem:[%s3784_s14 + $0x64] ss:$12 sps:$4 sm:$0xff]   ;;  %v3495_v26 = vld [vmem:[%s3784_s14 + $0x60] ss:$12 sps:$4 sm:$0xff]   ;;  %v3496_v27 = vld [vmem:[%s3784_s14 + $0x68] ss:$12 sps:$4 sm:$0xff]   ;;  %3381 = vmatprep.mubr.msk.bf16.mxu1 %vm3669_vm0, %v3667_v6 }
  0x1f   : > { %621 = vadd.xlane.f32.xlu0 %v3823_v3  ;;  %839 = vmatpush1.bf16.msra.mxu0 %v3483_v17  ;;  %v3497_v28 = vld [vmem:[%s3784_s14 + $0x7c] ss:$12 sps:$4 sm:$0xff]   ;;  %v3499_v29 = vld [vmem:[%s3784_s14 + $0x78] ss:$12 sps:$4 sm:$0xff]   ;;  %v3500_v30 = vld [vmem:[%s3784_s14 + $0x80] ss:$12 sps:$4 sm:$0xff]  }
  0x20   : > { %3368 = vmatpush3.bf16.msra.mxu1 %v3484_v18  ;;  %840 = vmatprep.subr.bf16.mxu0 %v3485_v19  ;;  %v3501_v31 = vld [vmem:[%s3784_s14 + $0x94] ss:$12 sps:$4 sm:$0xff]   ;;  %v3503_v33 = vld [vmem:[%s3784_s14 + $0x90] ss:$12 sps:$4 sm:$0xff]   ;;  %v3504_v34 = vld [vmem:[%s3784_s14 + $0x98] ss:$12 sps:$4 sm:$0xff]  }
  0x21   : > { %3369 = vmatprep.subr.bf16.mxu1 %v3667_v6  ;;  %v3505_v35 = vld [vmem:[%s3784_s14 + $0xac] ss:$12 sps:$4 sm:$0xff]   ;;  %v3507_v36 = vld [vmem:[%s3784_s14 + $0xa8] ss:$12 sps:$4 sm:$0xff]   ;;  %v3508_v37 = vld [vmem:[%s3784_s14 + $0xb0] ss:$12 sps:$4 sm:$0xff]  }
  0x22   : > { %v3071_v46 = vld [vmem:[%s4361_s24] ss:$0 sm:$0xff]  ;;  %v3883_v56 = vshrl.u32 %v693_v55, 7  ;;  %vm3421_vm2 = vmpackc.low %vm920_vm1, %vm920_vm1  ;;  %vm1008_vm3 = vcmask 130048   ;;  %s3671_s2 = smov [#allocation2]   ;;  %p3450_p5 = scmp.eq.s32.totalorder %s3755_s30, 1 }
  0x23   : > { %841 = vmatpush1.bf16.msra.mxu0 %v3487_v20  ;;  %v3072_v50 = vld [vmem:[%s4362_s22] ss:$0 sm:$0xff]  ;;  %s2920_s3 = sshll.u32 %s3671_s2, 4  ;;  %s2921_s3 = int_to_ptr.vmem [resolvable:$true] %s2920_s3 }
  0x24   : > { %3370 = vmatpush3.bf16.msra.mxu1 %v3488_v21  ;;  %842 = vmatprep.subr.bf16.mxu0 %v3489_v22  ;;  %v695_v57 = vsub.s32 0, %v3883_v56  ;;  %v691_v58 = vld [vmem:[%s3790_s19] sm:$0x7]  ;;  %v703_v59 = vsub.s32 2, %v3883_v56  ;;  %v699_v60 = vsub.s32 1, %v3883_v56  ;;  %s3670_s19 = smov 64   ;;  %p3636_p9 = scmp.lt.s32.totalorder %s2921_s3, %s2921_s3 }
  0x25   : > { %3371 = vmatprep.subr.bf16.mxu1 %v3667_v6  ;;  %s3629_s21 = scalar_lea.vmem %s2921_s3, 256 }
  0x26   : > { %v696_v61 = vrot.slane %v691_v58, %v695_v57  ;;  %v704_v62 = vrot.slane %v691_v58, %v703_v59  ;;  %v700_v1 = vrot.slane %v691_v58, %v699_v60  ;;  %p3630_p6 = scmp.ne.s32.totalorder %s2921_s3, %s3629_s21  ;;  %p3637_p10 = scmp.lt.s32.totalorder %s3629_s21, %s3629_s21 }
  0x27   : > { %843 = vmatpush1.bf16.msra.mxu0 %v3491_v23 }
  0x28   : > { %3372 = vmatpush3.bf16.msra.mxu1 %v3492_v24  ;;  %844 = vmatprep.subr.bf16.mxu0 %v3493_v25  ;;  %p3631_p7 = pnand %p3630_p6, %p3450_p5  ;;  %p3638_p11 = por %p3637_p10, %p3636_p9 }
  0x29   : > { %3373 = vmatprep.subr.bf16.mxu1 %v3667_v6 }
  0x2a   : > { %p3632_p8 = pneg %p3631_p7 }
  0x2b   : > { %845 = vmatpush1.bf16.msra.mxu0 %v3495_v26  ;;  %v616_v26 = vld [vmem:[%s4339_s1 + $0x8] sm:$0xff] }
  0x2c   : > { %3374 = vmatpush3.bf16.msra.mxu1 %v3496_v27  ;;  %846 = vmatprep.subr.bf16.mxu0 %v3497_v28  ;;  %v615_v27 = vld [vmem:[%s4339_s1] sm:$0xff]  ;;  %p3639_p12 = pnand %p3638_p11, %p3632_p8 }
  0x2d   : > { %3375 = vmatprep.subr.bf16.mxu1 %v3667_v6 }
  0x2f   : > { %847 = vmatpush1.bf16.msra.mxu0 %v3499_v29 }
  0x30   : > { %3376 = vmatpush3.bf16.msra.mxu1 %v3500_v30  ;;  %848 = vmatprep.subr.bf16.mxu0 %v3501_v31 }
  0x31   : > { %3377 = vmatprep.subr.bf16.mxu1 %v3667_v6 }
  0x33   : > { %849 = vmatpush1.bf16.msra.mxu0 %v3503_v33 }
  0x34   : > { %3378 = vmatpush3.bf16.msra.mxu1 %v3504_v34  ;;  %850 = vmatprep.subr.bf16.mxu0 %v3505_v35 }
  0x35   : > { %3379 = vmatprep.subr.bf16.mxu1 %v3667_v6 }
  0x37   : > { %851 = vmatpush1.bf16.msra.mxu0 %v3507_v36 }
  0x38   : > { %3380 = vmatpush3.bf16.msra.mxu1 %v3508_v37 }
  0xa8   : > { %v620_v9 = vpop.xlane.xlu0 %619 }
  0xa9   : > { %v624_v10 = vmul.f32 0.0078125, %v620_v9 }
  0xab   : > { %v3834_v11 = vsub.f32 %v3821_v2, %v624_v10 }
  0xac   : > { %v622_v12 = vpop.xlane.xlu0 %621 }
  0xad   : > { %v625_v13 = vmul.f32 0.0078125, %v622_v12  ;;  %v628_v14 = vmul.f32 %v3834_v11, %v3834_v11 }
  0xaf   : > { %v3839_v15 = vsub.f32 %v3823_v3, %v625_v13  ;;  %630 = vadd.xlane.f32.xlu1 %v628_v14 }
  0xb1   : > { %v629_v16 = vmul.f32 %v3839_v15, %v3839_v15 }
  0xb3   : > { %632 = vadd.xlane.f32.xlu1 %v629_v16 }
 0x13c   : > { %v631_v38 = vpop.xlane.xlu1 %630 }
 0x13d   : > { %v634_v39 = vmul.f32 0.0078125, %v631_v38 }
 0x13f   : > { %v636_v40 = vadd.f32 1e-05, %v634_v39 }
 0x140   : > { %v633_v41 = vpop.xlane.xlu1 %632 }
 0x141   : > { %3573 = vrsqrt.f32 %v636_v40  ;;  %v635_v42 = vmul.f32 0.0078125, %v633_v41 }
 0x143   : > { %v637_v43 = vadd.f32 1e-05, %v635_v42 }
 0x145   : > { %3575 = vrsqrt.f32 %v637_v43 }
 0x14b   : > { %v3574_v44 = vpop.eup %3573 }
 0x14c   : > { %v640_v45 = vmul.f32 %v3574_v44, %v3834_v11 }
 0x14e   : > { %v648_v49 = vmul.f32 %v3071_v46, %v640_v45 }
 0x14f   : > { %v3576_v47 = vpop.eup %3575 }
 0x150   : > { %v641_v48 = vmul.f32 %v3576_v47, %v3839_v15  ;;  %v656_v52 = vadd.f32 %v3072_v50, %v648_v49 }
 0x152   : > { %v649_v51 = vmul.f32 %v3071_v46, %v641_v48 }
 0x154   : > { %v657_v53 = vadd.f32 %v3072_v50, %v649_v51 }
 0x156   : > { %v658_v54 = vpack.c.bf16 %v657_v53, %v656_v52 }
 0x158   : > { %869 = vmatmul.mubr.bf16.vlgmr.msra.gmra.mrb[0].mxu0 %v658_v54  ;;  %3382 = vmatmul.mubr.bf16.vlgmr.msra.gmra.mrb[0].mxu1 %v658_v54 }
 0x22b   : > { %v870_v63 = vpop.f32.mrb[0].mxu0  ;;  %v913_v0 = vpop.f32.mrb[0].mxu1 }
 0x22c   : > { %v871_v4 = vadd.f32 %v870_v63, %v696_v61  ;;  %v872_v5 = vpop.f32.mrb[1].mxu0  ;;  %v3383_v6 = vpop.f32.mrb[1].mxu1  ;;  %v3895_v9 = vadd.f32 %v913_v0, %v704_v62 }
 0x22d   : > { %v874_v7 = vpop.f32.mrb[2].mxu0  ;;  %v916_v8 = vpop.f32.mrb[2].mxu1  ;;  %v873_v13 = vadd.f32 %v872_v5, %v700_v1 }
 0x22e   : > { %v3897_v10 = vadd.f32 %v916_v8, %v704_v62  ;;  %v876_v11 = vpop.f32.mrb[3].mxu0  ;;  %v3384_v12 = vpop.f32.mrb[3].mxu1  ;;  %1112 = vrot.lane.b32.xlu1 %v871_v4, %s3670_s19  ;;  %3389 = vmatprep.mubr.msk.f32.mxu0 %vm920_vm1, %v871_v4  ;;  %v875_v15 = vadd.f32 %v874_v7, %v696_v61 }
 0x22f   : > { %v877_v14 = vadd.f32 %v876_v11, %v700_v1 }
 0x230   : > { %v3472_v16 = vpack.i.bf16 %v3897_v10, %v3895_v9  ;;  %v3426_v17 = vpack.c.bf16 %v3897_v10, %v3895_v9 }
 0x231   : > { %v3467_v18 = vpack.i.bf16 %v877_v14, %v873_v13  ;;  %v3420_v19 = vpack.c.bf16 %v877_v14, %v873_v13 }
 0x232   : > { %3427 = vmatprep.subr.bf16.mxu1 %v3426_v17  ;;  %1114 = vrot.lane.b32.xlu1 %v875_v15, %s3670_s19 }
 0x233   : > { %3429 = vmatpush3.bf16.msra.mxu1 %v3426_v17  ;;  %3468 = vrot.lane.b32.xlu0 %v3467_v18, %s3670_s19 }
 0x234   : > { %3422 = vmatprep.subr.msk.bf16.mxu0 %vm3421_vm2, %v3420_v19 }
 0x235   : > { %3425 = vmatpush3.bf16.xpose.msk.msra.mxu0 %vm3421_vm2, %v3420_v19 }
 0x23c   : > { %3390 = vmatmul.mubr.msk.f32.vlgmr.msra.gmra.mrb[4].mxu0 %vm920_vm1, %v875_v15 }
 0x2a0   : > { %v1113_v20 = vpop.permute.xlu1 %1112 }
 0x2a1   : > { %3403 = vmatprep.mubr.msk.f32.mxu0 %vm920_vm1, %v1113_v20 }
 0x2a4   : > { %v1115_v25 = vpop.permute.xlu1 %1114 }
 0x2a5   : > { %v3469_v21 = vpop.permute.xlu0 %3468 }
 0x2a6   : > { %v3471_v22 = vunpack.i.h.bf16 %v3469_v21  ;;  %v3470_v23 = vunpack.i.l.bf16 %v3469_v21 }
 0x2a8   : > { %v3430_v24 = vpack.c.bf16 %v3471_v22, %v3470_v23 }
 0x2aa   : > { %3432 = vmatprep.subr.msk.bf16.mxu0 %vm3421_vm2, %v3430_v24 }
 0x2ab   : > { %3435 = vmatpush3.bf16.xpose.msk.msra.mxu0 %vm3421_vm2, %v3430_v24 }
 0x2b2   : > { %3404 = vmatmul.mubr.msk.f32.vlgmr.msra.gmra.mrb[6].mxu0 %vm920_vm1, %v1115_v25 }
 0x2b3   : > { %1868 = vmatprep.mubr.bf16.mxu0 %v3668_v32 }
 0x30f   : > { %v3391_v28 = vpop.f32.mrb[4].mxu0 }
 0x310   : > { %v1005_v29 = vadd.f32 %v3391_v28, %v616_v26  ;;  %v999_v30 = vpop.f32.mrb[5].mxu0 }
 0x311   : > { %v1000_v31 = vadd.f32 %v999_v30, %v615_v27  ;;  %v1371_v30 = vld [vmem:[%s3795_s23 + $0x20] sm:$0xff] }
 0x312   : > { %v1012_v33 = vsel %vm1008_vm3, %v1005_v29, -inf }
 0x313   : > { %1013 = vmax.xlane.f32.xlu0 %v1012_v33  ;;  %v1009_v34 = vsel %vm1008_vm3, %v1000_v31, -inf }
 0x314   : > { %1010 = vmax.xlane.f32.xlu1 %v1009_v34  ;;  %v1372_v34 = vld [vmem:[%s3795_s23 + $0x28] sm:$0xff] }
 0x385   : > { %v3405_v35 = vpop.f32.mrb[6].mxu0 }
 0x386   : > { %v1194_v36 = vpop.f32.mrb[7].mxu0  ;;  %v1200_v38 = vadd.f32 %v3405_v35, %v616_v26  ;;  %v1375_v35 = vld [vmem:[%s3795_s23 + $0x40] sm:$0xff] }
 0x387   : > { %v1195_v37 = vadd.f32 %v1194_v36, %v615_v27  ;;  %v1379_v36 = vld [vmem:[%s3795_s23 + $0x60] sm:$0xff] }
 0x388   : > { %v1206_v40 = vsel %vm1008_vm3, %v1200_v38, -inf }
 0x389   : > { %v1203_v39 = vsel %vm1008_vm3, %v1195_v37, -inf }
 0x38a   : > { %1204 = vmax.xlane.f32.xlu0 %v1203_v39  ;;  %v1376_v39 = vld [vmem:[%s3795_s23 + $0x48] sm:$0xff] }
 0x38e   : > { %1207 = vmax.xlane.f32.xlu0 %v1206_v40  ;;  %v1380_v40 = vld [vmem:[%s3795_s23 + $0x68] sm:$0xff] }
 0x3a0   : > { %v1014_v41 = vpop.xlane.xlu0 %1013 }
 0x3a1   : > { %v1016_v42 = vsub.f32 %v1005_v29, %v1014_v41  ;;  %v1011_v43 = vpop.xlane.xlu1 %1010  ;;  %v1367_v29 = vld [vmem:[%s3795_s23] sm:$0xff] }
 0x3a2   : > { %v1015_v44 = vsub.f32 %v1000_v31, %v1011_v43  ;;  %v1368_v31 = vld [vmem:[%s3795_s23 + $0x8] sm:$0xff]  ;;  %v3112_v33 = vcombine.high %v1367_v29, %v1371_v30  ;;  %v1383_v41 = vld [vmem:[%s3795_s23 + $0x80] sm:$0xff] }
 0x3a3   : > { %v1019_v45 = vmul.f32 1.442695, %v1016_v42  ;;  %v3122_v42 = vcombine.high %v1376_v39, %v1380_v40  ;;  %v1387_v43 = vld [vmem:[%s3795_s23 + $0xa0] sm:$0xff] }
 0x3a4   : > { %v1017_v46 = vmul.f32 1.442695, %v1015_v44  ;;  %v1384_v44 = vld [vmem:[%s3795_s23 + $0x88] sm:$0xff] }
 0x3a5   : > { %3577 = vpow2.f32 %v1019_v45  ;;  %v1388_v45 = vld [vmem:[%s3795_s23 + $0xa8] sm:$0xff] }
 0x3a6   : > { %3579 = vpow2.f32 %v1017_v46  ;;  %v3119_v46 = vcombine.low %v1375_v35, %v1379_v36 }
 0x3af   : > { %v3578_v47 = vpop.eup %3577 }
 0x3b0   : > { %v3580_v48 = vpop.eup %3579  ;;  %v1024_v49 = vsel %vm1008_vm3, %v3578_v47, 0.0 }
 0x3b1   : > { %1025 = vadd.xlane.f32.xlu0 %v1024_v49  ;;  %v1021_v50 = vsel %vm1008_vm3, %v3580_v48, 0.0  ;;  %v3130_v49 = vcombine.high %v1384_v44, %v1388_v45 }
 0x3b2   : > { %1022 = vadd.xlane.f32.xlu1 %v1021_v50  ;;  %v3127_v50 = vcombine.low %v1383_v41, %v1387_v43 }
 0x417   : > { %v1205_v51 = vpop.xlane.xlu0 %1204 }
 0x418   : > { %v1209_v52 = vsub.f32 %v1195_v37, %v1205_v51  ;;  %v3113_v37 = vcombine.low %v1368_v31, %v1372_v34  ;;  %v3129_v51 = vcombine.low %v1384_v44, %v1388_v45 }
 0x41a   : > { %v1211_v53 = vmul.f32 1.442695, %v1209_v52 }
 0x41b   : > { %v1208_v54 = vpop.xlane.xlu0 %1207 }
 0x41c   : > { %3581 = vpow2.f32 %v1211_v53  ;;  %v1210_v55 = vsub.f32 %v1200_v38, %v1208_v54  ;;  %v3114_v38 = vcombine.high %v1368_v31, %v1372_v34 }
 0x41e   : > { %v1213_v58 = vmul.f32 1.442695, %v1210_v55  ;;  %1836 = vmatprep.subr.bf16.mxu0 %v3114_v38  ;;  %v1424_v38 = vld [vmem:[%s3795_s23 + $0x1c8] sm:$0xff] }
 0x41f   : > { %1837 = vmatpush1.bf16.msra.mxu0 %v3113_v37  ;;  %v1427_v37 = vld [vmem:[%s3795_s23 + $0x1e0] sm:$0xff] }
 0x420   : > { %3583 = vpow2.f32 %v1213_v58  ;;  %1838 = vmatprep.subr.bf16.mxu0 %v3122_v42  ;;  %v1373_v42 = vld [vmem:[%s3795_s23 + $0x30] sm:$0xff] }
 0x426   : > { %v3582_v61 = vpop.eup %3581 }
 0x427   : > { %v1215_v62 = vsel %vm1008_vm3, %v3582_v61, 0.0 }
 0x428   : > { %1216 = vadd.xlane.f32.xlu1 %v1215_v62 }
 0x42a   : > { %v3584_v63 = vpop.eup %3583 }
 0x42b   : > { %v1218_v0 = vsel %vm1008_vm3, %v3584_v63, 0.0 }
 0x42c   : > { %1219 = vadd.xlane.f32.xlu0 %v1218_v0  ;;  %v1391_v0 = vld [vmem:[%s3795_s23 + $0xc0] sm:$0xff] }
 0x439   : > { %3473 = vrot.lane.b32.xlu1 %v3472_v16, %s3670_s19 }
 0x43e   : > { %v1026_v1 = vpop.xlane.xlu0 %1025 }
 0x43f   : > { %3585 = vrcp.f32 %v1026_v1  ;;  %v1023_v4 = vpop.xlane.xlu1 %1022  ;;  %v1395_v1 = vld [vmem:[%s3795_s23 + $0xe0] sm:$0xff] }
 0x440   : > { %3587 = vrcp.f32 %v1023_v4  ;;  %v1392_v4 = vld [vmem:[%s3795_s23 + $0xc8] sm:$0xff] }
 0x449   : > { %v3586_v5 = vpop.eup %3585 }
 0x44a   : > { %v3588_v6 = vpop.eup %3587  ;;  %v1030_v8 = vmul.f32 %v3586_v5, %v3578_v47  ;;  %v3121_v47 = vcombine.low %v1376_v39, %v1380_v40  ;;  %v3136_v5 = vcombine.high %v1391_v0, %v1395_v1  ;;  %v1428_v40 = vld [vmem:[%s3795_s23 + $0x1e8] sm:$0xff] }
 0x44b   : > { %v1029_v7 = vmul.f32 %v3588_v6, %v3580_v48  ;;  %v3128_v48 = vcombine.high %v1383_v41, %v1387_v43  ;;  %v1396_v6 = vld [vmem:[%s3795_s23 + $0xe8] sm:$0xff]  ;;  %v1369_v41 = vld [vmem:[%s3795_s23 + $0x10] sm:$0xff]  ;;  %v3169_v43 = vcombine.low %v1424_v38, %v1428_v40  ;;  %v3170_v44 = vcombine.high %v1424_v38, %v1428_v40 }
 0x44c   : > { %1839 = vmatpush1.bf16.msra.mxu0 %v3121_v47  ;;  %v3115_v45 = vcombine.low %v1369_v41, %v1373_v42  ;;  %v1370_v47 = vld [vmem:[%s3795_s23 + $0x18] sm:$0xff]  ;;  %v1409_v40 = vld [vmem:[%s3795_s23 + $0x150] sm:$0xff] }
 0x44d   : > { %3396 = vmatprep.mubr.msk.f32.mxu1 %vm1008_vm3, %v1029_v7  ;;  %1840 = vmatprep.subr.bf16.mxu0 %v3130_v49  ;;  %v3135_v7 = vcombine.low %v1391_v0, %v1395_v1  ;;  %v3109_v0 = vld [vmem:[%s4363_s16] ss:$0 sm:$0xff] }
 0x44e   : > { %3397 = vmatmul.mubr.msk.f32.vlgmr.msra.gmra.mrb[4].mxu1 %vm1008_vm3, %v1030_v8  ;;  %v3137_v8 = vcombine.low %v1392_v4, %v1396_v6 }
 0x450   : > { %1841 = vmatpush1.bf16.msra.mxu0 %v3129_v51 }
 0x4b5   : > { %v1217_v11 = vpop.xlane.xlu1 %1216 }
 0x4b6   : > { %3589 = vrcp.f32 %v1217_v11  ;;  %v3138_v11 = vcombine.high %v1392_v4, %v1396_v6  ;;  %v3110_v6 = vld [vmem:[%s4364_s27] ss:$0 sm:$0xff] }
 0x4b8   : > { %1842 = vmatprep.subr.bf16.mxu0 %v3138_v11  ;;  %v1377_v11 = vld [vmem:[%s3795_s23 + $0x50] sm:$0xff] }
 0x4b9   : > { %v1220_v12 = vpop.xlane.xlu0 %1219  ;;  %v3474_v13 = vpop.permute.xlu1 %3473  ;;  %1843 = vmatpush1.bf16.msra.mxu0 %v3137_v8 }
 0x4ba   : > { %3591 = vrcp.f32 %v1220_v12  ;;  %v3476_v14 = vunpack.i.h.bf16 %v3474_v13  ;;  %v3475_v9 = vunpack.i.l.bf16 %v3474_v13  ;;  %v1399_v12 = vld [vmem:[%s3795_s23 + $0x100] sm:$0xff] }
 0x4bb   : > { %v1403_v13 = vld [vmem:[%s3795_s23 + $0x120] sm:$0xff] }
 0x4bc   : > { %v3436_v10 = vpack.c.bf16 %v3476_v14, %v3475_v9  ;;  %v1400_v14 = vld [vmem:[%s3795_s23 + $0x108] sm:$0xff]  ;;  %v3144_v9 = vcombine.high %v1399_v12, %v1403_v13 }
 0x4be   : > { %3437 = vmatprep.subr.bf16.mxu1 %v3436_v10 }
 0x4bf   : > { %3439 = vmatpush3.bf16.msra.mxu1 %v3436_v10  ;;  %v1404_v10 = vld [vmem:[%s3795_s23 + $0x128] sm:$0xff] }
 0x4c0   : > { %v3590_v15 = vpop.eup %3589  ;;  %1793 = vmatprep.subr.bf16.mxu1 %v3112_v33 }
 0x4c1   : > { %v1223_v16 = vmul.f32 %v3590_v15, %v3582_v61  ;;  %v3143_v15 = vcombine.low %v1399_v12, %v1403_v13  ;;  %v1381_v13 = vld [vmem:[%s3795_s23 + $0x70] sm:$0xff] }
 0x4c3   : > { %3410 = vmatprep.mubr.msk.f32.mxu1 %vm1008_vm3, %v1223_v16  ;;  %v3145_v16 = vcombine.low %v1400_v14, %v1404_v10 }
 0x4c4   : > { %v3592_v17 = vpop.eup %3591 }
 0x4c5   : > { %v1224_v18 = vmul.f32 %v3592_v17, %v3584_v63  ;;  %v3146_v17 = vcombine.high %v1400_v14, %v1404_v10  ;;  %v1378_v14 = vld [vmem:[%s3795_s23 + $0x58] sm:$0xff] }
 0x4c7   : > { %3411 = vmatmul.mubr.msk.f32.vlgmr.msra.gmra.mrb[6].mxu1 %vm1008_vm3, %v1224_v18  ;;  %1844 = vmatprep.subr.bf16.mxu0 %v3146_v17  ;;  %v1407_v18 = vld [vmem:[%s3795_s23 + $0x140] sm:$0xff]  ;;  %v1389_v17 = vld [vmem:[%s3795_s23 + $0xb0] sm:$0xff] }
 0x4c8   : > { %1825 = vmatprep.mubr.bf16.mxu1 %v3668_v32  ;;  %1845 = vmatpush1.bf16.msra.mxu0 %v3145_v16 }
 0x521   : > { %v3398_v19 = vpop.f32.mrb[4].mxu1 }
 0x522   : > { %v1103_v20 = vpop.f32.mrb[5].mxu1 }
 0x59a   : > { %v3412_v21 = vpop.f32.mrb[6].mxu1 }
 0x59b   : > { %1318 = vrot.lane.b32.xlu1 %v3412_v21, %s3670_s19  ;;  %v1305_v22 = vpop.f32.mrb[7].mxu1 }
 0x59c   : > { %1316 = vrot.lane.b32.xlu0 %v1305_v22, %s3670_s19  ;;  %v1412_v22 = vld [vmem:[%s3795_s23 + $0x168] sm:$0xff]  ;;  %s4366_s19 = sld [smem:[#allocation6_spill]] }
 0x60d   : > { %v1319_v23 = vpop.permute.xlu1 %1318 }
 0x60e   : > { %v1323_v24 = vsel %vm920_vm1, %v3398_v19, %v1319_v23  ;;  %v1317_v25 = vpop.permute.xlu0 %1316  ;;  %v1411_v19 = vld [vmem:[%s3795_s23 + $0x160] sm:$0xff] }
 0x60f   : > { %v3940_v26 = vadd.f32 %v1323_v24, %v3823_v3  ;;  %v1322_v27 = vsel %vm920_vm1, %v1103_v20, %v1317_v25  ;;  %v3111_v3 = vcombine.low %v1367_v29, %v1371_v30  ;;  %v1408_v20 = vld [vmem:[%s3795_s23 + $0x148] sm:$0xff]  ;;  %v3152_v21 = vcombine.high %v1407_v18, %v1411_v19  ;;  %v1419_v29 = vld [vmem:[%s3795_s23 + $0x1a0] sm:$0xff] }
 0x610   : > { %v3944_v28 = vadd.f32 %v1322_v27, %v3821_v2  ;;  %v3120_v2 = vcombine.high %v1375_v35, %v1379_v36  ;;  %v3151_v23 = vcombine.low %v1407_v18, %v1411_v19  ;;  %v3153_v24 = vcombine.low %v1408_v20, %v1412_v22  ;;  %v1415_v27 = vld [vmem:[%s3795_s23 + $0x180] sm:$0xff]  ;;  %v1416_v30 = vld [vmem:[%s3795_s23 + $0x188] sm:$0xff]  ;;  %v1386_v18 = vld [vmem:[%s3795_s23 + $0x98] sm:$0xff] }
 0x611   : > { %1330 = vadd.xlane.f32.xlu0 %v3940_v26  ;;  %1794 = vmatpush1.bf16.msra.mxu1 %v3111_v3  ;;  %v3154_v25 = vcombine.high %v1408_v20, %v1412_v22  ;;  %v3160_v31 = vcombine.high %v1415_v27, %v1419_v29  ;;  %v1420_v3 = vld [vmem:[%s3795_s23 + $0x1a8] sm:$0xff]  ;;  %v3159_v33 = vcombine.low %v1415_v27, %v1419_v29  ;;  %v1423_v36 = vld [vmem:[%s3795_s23 + $0x1c0] sm:$0xff]  ;;  %v1390_v19 = vld [vmem:[%s3795_s23 + $0xb8] sm:$0xff] }
 0x612   : > { %1328 = vadd.xlane.f32.xlu1 %v3944_v28  ;;  %1795 = vmatprep.subr.bf16.mxu1 %v3120_v2  ;;  %v3161_v34 = vcombine.low %v1416_v30, %v1420_v3  ;;  %v3162_v35 = vcombine.high %v1416_v30, %v1420_v3  ;;  %v3167_v2 = vcombine.low %v1423_v36, %v1427_v37  ;;  %v1394_v27 = vld [vmem:[%s3795_s23 + $0xd8] sm:$0xff] }
 0x613   : > { %1846 = vmatprep.subr.bf16.mxu0 %v3154_v25  ;;  %v3168_v39 = vcombine.high %v1423_v36, %v1427_v37  ;;  %v3123_v20 = vcombine.low %v1377_v11, %v1381_v13  ;;  %v1397_v25 = vld [vmem:[%s3795_s23 + $0xf0] sm:$0xff]  ;;  %v1398_v29 = vld [vmem:[%s3795_s23 + $0xf8] sm:$0xff] }
 0x614   : > { %1847 = vmatpush1.bf16.msra.mxu0 %v3153_v24  ;;  %v1393_v24 = vld [vmem:[%s3795_s23 + $0xd0] sm:$0xff]  ;;  %v1402_v36 = vld [vmem:[%s3795_s23 + $0x118] sm:$0xff] }
 0x615   : > { %1796 = vmatpush1.bf16.msra.mxu1 %v3119_v46  ;;  %1848 = vmatprep.subr.bf16.mxu0 %v3162_v35  ;;  %v3116_v46 = vcombine.high %v1369_v41, %v1373_v42  ;;  %v3140_v3 = vcombine.high %v1393_v24, %v1397_v25  ;;  %v1405_v35 = vld [vmem:[%s3795_s23 + $0x130] sm:$0xff]  ;;  %v1406_v37 = vld [vmem:[%s3795_s23 + $0x138] sm:$0xff]  ;;  %v3139_v38 = vcombine.low %v1393_v24, %v1397_v25  ;;  %v3525_v24 = vld [vmem:[%s3801_s28 + $0x60] sm:$0xff]  }
 0x616   : > { %1797 = vmatprep.subr.bf16.mxu1 %v3128_v48  ;;  %v1374_v48 = vld [vmem:[%s3795_s23 + $0x38] sm:$0xff]  ;;  %v1413_v41 = vld [vmem:[%s3795_s23 + $0x170] sm:$0xff]  ;;  %v3526_v25 = vld [vmem:[%s3801_s28 + $0xe0] sm:$0xff]  }
 0x617   : > { %v3117_v49 = vcombine.low %v1370_v47, %v1374_v48  ;;  %v1410_v42 = vld [vmem:[%s3795_s23 + $0x158] sm:$0xff] }
 0x618   : > { %1849 = vmatpush1.bf16.msra.mxu0 %v3161_v34  ;;  %v1401_v34 = vld [vmem:[%s3795_s23 + $0x110] sm:$0xff] }
 0x619   : > { %1798 = vmatpush1.bf16.msra.mxu1 %v3127_v50  ;;  %v3118_v50 = vcombine.high %v1370_v47, %v1374_v48  ;;  %1850 = vmatprep.subr.bf16.mxu0 %v3170_v44  ;;  %v3147_v44 = vcombine.low %v1401_v34, %v1405_v35  ;;  %v1417_v48 = vld [vmem:[%s3795_s23 + $0x190] sm:$0xff] }
 0x61a   : > { %1799 = vmatprep.subr.bf16.mxu1 %v3136_v5 }
 0x61c   : > { %1851 = vmatpush1.bf16.msra.mxu0 %v3169_v43  ;;  %v1414_v43 = vld [vmem:[%s3795_s23 + $0x178] sm:$0xff] }
 0x61d   : > { %1800 = vmatpush1.bf16.msra.mxu1 %v3135_v7  ;;  %1922 = vmatprep.subr.bf16.mxu0 %v3118_v50  ;;  %v3158_v47 = vcombine.high %v1410_v42, %v1414_v43  ;;  %v1418_v50 = vld [vmem:[%s3795_s23 + $0x198] sm:$0xff] }
 0x61e   : > { %1801 = vmatprep.subr.bf16.mxu1 %v3144_v9  ;;  %v1382_v9 = vld [vmem:[%s3795_s23 + $0x78] sm:$0xff] }
 0x61f   : > { %v3126_v16 = vcombine.high %v1378_v14, %v1382_v9 }
 0x621   : > { %1802 = vmatpush1.bf16.msra.mxu1 %v3143_v15 }
 0x622   : > { %1803 = vmatprep.subr.bf16.mxu1 %v3152_v21  ;;  %v3125_v21 = vcombine.low %v1378_v14, %v1382_v9  ;;  %v3511_v14 = vld [vmem:[%s3801_s28] sm:$0xff]  }
 0x623   : > { %v3512_v9 = vld [vmem:[%s3801_s28 + $0x80] sm:$0xff]  }
 0x625   : > { %1804 = vmatpush1.bf16.msra.mxu1 %v3151_v23  ;;  %v3134_v23 = vcombine.high %v1386_v18, %v1390_v19 }
 0x626   : > { %1805 = vmatprep.subr.bf16.mxu1 %v3160_v31  ;;  %v3133_v31 = vcombine.low %v1386_v18, %v1390_v19  ;;  %v3519_v18 = vld [vmem:[%s3801_s28 + $0x10] sm:$0xff]  }
 0x627   : > { %v3520_v19 = vld [vmem:[%s3801_s28 + $0x90] sm:$0xff]  }
 0x629   : > { %1806 = vmatpush1.bf16.msra.mxu1 %v3159_v33  ;;  %v3142_v33 = vcombine.high %v1394_v27, %v1398_v29 }
 0x62a   : > { %1807 = vmatprep.subr.bf16.mxu1 %v3168_v39  ;;  %v3150_v39 = vcombine.high %v1402_v36, %v1406_v37 }
 0x62d   : > { %1808 = vmatpush1.bf16.msra.mxu1 %v3167_v2  ;;  %v3148_v2 = vcombine.high %v1401_v34, %v1405_v35  ;;  %v3533_v34 = vld [vmem:[%s3801_s28 + $0x70] sm:$0xff]  }
 0x62e   : > { %1879 = vmatprep.subr.bf16.mxu1 %v3116_v46  ;;  %v3156_v46 = vcombine.high %v1409_v40, %v1413_v41  ;;  %v3534_v35 = vld [vmem:[%s3801_s28 + $0xf0] sm:$0xff]  }
 0x69e   : > { %v1331_v52 = vpop.xlane.xlu0 %1330 }
 0x69f   : > { %v1333_v53 = vmul.f32 0.0078125, %v1331_v52  ;;  %v1329_v54 = vpop.xlane.xlu1 %1328 }
 0x6a0   : > { %v1332_v55 = vmul.f32 0.0078125, %v1329_v54 }
 0x6a1   : > { %v3961_v58 = vsub.f32 %v3940_v26, %v1333_v53 }
 0x6a2   : > { %v3964_v61 = vsub.f32 %v3944_v28, %v1332_v55 }
 0x6a3   : > { %v1337_v62 = vmul.f32 %v3961_v58, %v3961_v58 }
 0x6a4   : > { %v1336_v63 = vmul.f32 %v3964_v61, %v3964_v61 }
 0x6a5   : > { %1340 = vadd.xlane.f32.xlu1 %v1337_v62 }
 0x6a6   : > { %1338 = vadd.xlane.f32.xlu0 %v1336_v63 }
 0x732   : > { %v1341_v51 = vpop.xlane.xlu1 %1340 }
 0x733   : > { %v1343_v52 = vmul.f32 0.0078125, %v1341_v51  ;;  %v1339_v53 = vpop.xlane.xlu0 %1338  ;;  %v1422_v51 = vld [vmem:[%s3795_s23 + $0x1b8] sm:$0xff] }
 0x734   : > { %v1342_v54 = vmul.f32 0.0078125, %v1339_v53  ;;  %v3157_v53 = vcombine.low %v1410_v42, %v1414_v43  ;;  %v4077_v42 = vld [vmem:[%s3806_s17] sm:$0xff]  ;;  %v1447_v43 = vsub.s32 3, %v3883_v56  ;;  %s4365_s17 = sld [smem:[#allocation7_spill]] }
 0x735   : > { %v1345_v55 = vadd.f32 1e-05, %v1343_v52  ;;  %v3155_v52 = vcombine.low %v1409_v40, %v1413_v41  ;;  %v3541_v40 = vld [vmem:[%s3801_s28 + $0x140] sm:$0xff]  }
 0x736   : > { %v1344_v62 = vadd.f32 1e-05, %v1342_v54  ;;  %v3542_v41 = vld [vmem:[%s3801_s28 + $0x1c0] sm:$0xff]  }
 0x737   : > { %3593 = vrsqrt.f32 %v1345_v55  ;;  %v3166_v55 = vcombine.high %v1418_v50, %v1422_v51 }
 0x738   : > { %3595 = vrsqrt.f32 %v1344_v62  ;;  %v1425_v62 = vld [vmem:[%s3795_s23 + $0x1d0] sm:$0xff] }
 0x741   : > { %v3594_v63 = vpop.eup %3593 }
 0x742   : > { %v3596_v1 = vpop.eup %3595  ;;  %v1349_v4 = vmul.f32 %v3594_v63, %v3961_v58  ;;  %v3124_v58 = vcombine.high %v1377_v11, %v1381_v13  ;;  %v1429_v63 = vld [vmem:[%s3795_s23 + $0x1f0] sm:$0xff]  ;;  %v3510_v13 = vld [vmem:[%s3801_s28 + $0xc0] sm:$0xff]  }
 0x743   : > { %v1348_v5 = vmul.f32 %v3596_v1, %v3964_v61  ;;  %v1385_v61 = vld [vmem:[%s3795_s23 + $0x90] sm:$0xff]  ;;  %v1430_v1 = vld [vmem:[%s3795_s23 + $0x1f8] sm:$0xff] }
 0x744   : > { %v1357_v7 = vmul.f32 %v3109_v0, %v1349_v4  ;;  %v3132_v22 = vcombine.high %v1385_v61, %v1389_v17  ;;  %v3131_v30 = vcombine.low %v1385_v61, %v1389_v17  ;;  %v3516_v61 = vld [vmem:[%s3801_s28 + $0x88] sm:$0xff]   ;;  %v3518_v17 = vld [vmem:[%s3801_s28 + $0xd0] sm:$0xff]  }
 0x745   : > { %v1356_v8 = vmul.f32 %v3109_v0, %v1348_v5  ;;  %v1426_v0 = vld [vmem:[%s3795_s23 + $0x1d8] sm:$0xff]  ;;  %v3165_v5 = vcombine.low %v1418_v50, %v1422_v51 }
 0x746   : > { %v1365_v12 = vadd.f32 %v3110_v6, %v1357_v7  ;;  %v3174_v7 = vcombine.high %v1426_v0, %v1430_v1  ;;  %v3173_v11 = vcombine.low %v1426_v0, %v1430_v1 }
 0x747   : > { %v1364_v10 = vadd.f32 %v3110_v6, %v1356_v8  ;;  %v3172_v6 = vcombine.high %v1425_v62, %v1429_v63  ;;  %v3171_v8 = vcombine.low %v1425_v62, %v1429_v63 }
 0x749   : > { %v4010_v15 = vpack.c.bf16 %v1365_v12, %v1364_v10  ;;  %v3509_v12 = vld [vmem:[%s3801_s28 + $0x40] sm:$0xff]   ;;  %v3513_v10 = vld [vmem:[%s3801_s28 + $0x48] sm:$0xff]  }
 0x74b   : > { %1826 = vmatmul.mubr.bf16.vlgmr.msra.gmra.mrb[8].mxu1 %v4010_v15  ;;  %1869 = vmatmul.mubr.bf16.vlgmr.msra.gmra.mrb[8].mxu0 %v4010_v15 }
 0x74c   : > { %1880 = vmatpush1.bf16.msra.mxu1 %v3115_v45  ;;  %1923 = vmatpush1.bf16.msra.mxu0 %v3117_v49  ;;  %v3149_v45 = vcombine.low %v1402_v36, %v1406_v37  ;;  %v1421_v49 = vld [vmem:[%s3795_s23 + $0x1b0] sm:$0xff] }
 0x74d   : > { %1881 = vmatprep.subr.bf16.mxu1 %v3124_v58  ;;  %1924 = vmatprep.subr.bf16.mxu0 %v3126_v16  ;;  %v3164_v54 = vcombine.high %v1417_v48, %v1421_v49  ;;  %v3163_v4 = vcombine.low %v1417_v48, %v1421_v49  ;;  %v3514_v58 = vld [vmem:[%s3801_s28 + $0xc8] sm:$0xff]   ;;  %v3535_v36 = vld [vmem:[%s3801_s28 + $0x30] sm:$0xff]  }
 0x74e   : > { %1911 = vmatprep.mubr.bf16.mxu1 %v3668_v32  ;;  %1954 = vmatprep.mubr.bf16.mxu0 %v3668_v32  ;;  %v3141_v32 = vcombine.low %v1394_v27, %v1398_v29  ;;  %v3515_v16 = vld [vmem:[%s3801_s28 + $0x8] sm:$0xff]   ;;  %v3527_v27 = vld [vmem:[%s3801_s28 + $0x20] sm:$0xff]   ;;  %v3536_v37 = vld [vmem:[%s3801_s28 + $0xb0] sm:$0xff]  }
 0x74f   : > { %v3528_v29 = vld [vmem:[%s3801_s28 + $0xa0] sm:$0xff]  }
 0x750   : > { %1882 = vmatpush1.bf16.msra.mxu1 %v3123_v20  ;;  %1925 = vmatpush1.bf16.msra.mxu0 %v3125_v21  ;;  %v3521_v20 = vld [vmem:[%s3801_s28 + $0x58] sm:$0xff]  }
 0x751   : > { %1883 = vmatprep.subr.bf16.mxu1 %v3132_v22  ;;  %1926 = vmatprep.subr.bf16.mxu0 %v3134_v23  ;;  %v3522_v21 = vld [vmem:[%s3801_s28 + $0xd8] sm:$0xff]  }
 0x752   : > { %v3523_v22 = vld [vmem:[%s3801_s28 + $0x18] sm:$0xff]  }
 0x753   : > { %v3524_v23 = vld [vmem:[%s3801_s28 + $0x98] sm:$0xff]  }
 0x754   : > { %1884 = vmatpush1.bf16.msra.mxu1 %v3131_v30  ;;  %1927 = vmatpush1.bf16.msra.mxu0 %v3133_v31  ;;  %v3529_v30 = vld [vmem:[%s3801_s28 + $0x68] sm:$0xff]  }
 0x755   : > { %1885 = vmatprep.subr.bf16.mxu1 %v3140_v3  ;;  %1928 = vmatprep.subr.bf16.mxu0 %v3142_v33  ;;  %v3530_v31 = vld [vmem:[%s3801_s28 + $0xe8] sm:$0xff]  }
 0x756   : > { %v3531_v3 = vld [vmem:[%s3801_s28 + $0x28] sm:$0xff]  }
 0x757   : > { %v3532_v33 = vld [vmem:[%s3801_s28 + $0xa8] sm:$0xff]  }
 0x758   : > { %1886 = vmatpush1.bf16.msra.mxu1 %v3139_v38  ;;  %1929 = vmatpush1.bf16.msra.mxu0 %v3141_v32  ;;  %v3537_v38 = vld [vmem:[%s3801_s28 + $0x78] sm:$0xff]  }
 0x759   : > { %1887 = vmatprep.subr.bf16.mxu1 %v3148_v2  ;;  %1930 = vmatprep.subr.bf16.mxu0 %v3150_v39  ;;  %v3538_v32 = vld [vmem:[%s3801_s28 + $0xf8] sm:$0xff]  }
 0x75a   : > { %v3539_v2 = vld [vmem:[%s3801_s28 + $0x38] sm:$0xff]  }
 0x75b   : > { %v3540_v39 = vld [vmem:[%s3801_s28 + $0xb8] sm:$0xff]  }
 0x75c   : > { %1888 = vmatpush1.bf16.msra.mxu1 %v3147_v44  ;;  %1931 = vmatpush1.bf16.msra.mxu0 %v3149_v45  ;;  %v1436_v44 = vrot.slane %v4077_v42, %v695_v57  ;;  %v1444_v45 = vrot.slane %v4077_v42, %v703_v59 }
 0x75d   : > { %1889 = vmatprep.subr.bf16.mxu1 %v3156_v46  ;;  %1932 = vmatprep.subr.bf16.mxu0 %v3158_v47  ;;  %v1440_v46 = vrot.slane %v4077_v42, %v699_v60  ;;  %v1448_v47 = vrot.slane %v4077_v42, %v1447_v43 }
 0x760   : > { %1890 = vmatpush1.bf16.msra.mxu1 %v3155_v52  ;;  %1933 = vmatpush1.bf16.msra.mxu0 %v3157_v53 }
 0x761   : > { %1891 = vmatprep.subr.bf16.mxu1 %v3164_v54  ;;  %1934 = vmatprep.subr.bf16.mxu0 %v3166_v55 }
 0x764   : > { %1892 = vmatpush1.bf16.msra.mxu1 %v3163_v4  ;;  %1935 = vmatpush1.bf16.msra.mxu0 %v3165_v5 }
 0x765   : > { %1893 = vmatprep.subr.bf16.mxu1 %v3172_v6  ;;  %1936 = vmatprep.subr.bf16.mxu0 %v3174_v7 }
 0x768   : > { %1894 = vmatpush1.bf16.msra.mxu1 %v3171_v8  ;;  %1937 = vmatpush1.bf16.msra.mxu0 %v3173_v11 }
 0x769   : > { %3273 = vmatprep.subr.bf16.mxu1 %v3509_v12  ;;  %3295 = vmatprep.subr.bf16.mxu0 %v3510_v13 }
 0x76b   : > { %1912 = vmatmul.mubr.bf16.vlgmr.msra.gmra.mrb[12].mxu1 %v4010_v15  ;;  %1955 = vmatmul.mubr.bf16.vlgmr.msra.gmra.mrb[12].mxu0 %v4010_v15  ;;  %v3517_v15 = vld [vmem:[%s3801_s28 + $0x50] sm:$0xff]  }
 0x76c   : > { %3274 = vmatpush3.bf16.msra.mxu1 %v3511_v14  ;;  %3296 = vmatpush3.bf16.msra.mxu0 %v3512_v9 }
 0x76d   : > { %3275 = vmatprep.subr.bf16.mxu1 %v3513_v10  ;;  %3297 = vmatprep.subr.bf16.mxu0 %v3514_v58 }
 0x770   : > { %3276 = vmatpush3.bf16.msra.mxu1 %v3515_v16  ;;  %3298 = vmatpush3.bf16.msra.mxu0 %v3516_v61 }
 0x771   : > { %3277 = vmatprep.subr.bf16.mxu1 %v3517_v15  ;;  %3299 = vmatprep.subr.bf16.mxu0 %v3518_v17 }
 0x774   : > { %3278 = vmatpush3.bf16.msra.mxu1 %v3519_v18  ;;  %3300 = vmatpush3.bf16.msra.mxu0 %v3520_v19 }
 0x775   : > { %3279 = vmatprep.subr.bf16.mxu1 %v3521_v20  ;;  %3301 = vmatprep.subr.bf16.mxu0 %v3522_v21 }
 0x778   : > { %3280 = vmatpush3.bf16.msra.mxu1 %v3523_v22  ;;  %3302 = vmatpush3.bf16.msra.mxu0 %v3524_v23 }
 0x779   : > { %3281 = vmatprep.subr.bf16.mxu1 %v3525_v24  ;;  %3303 = vmatprep.subr.bf16.mxu0 %v3526_v25 }
 0x77c   : > { %3282 = vmatpush3.bf16.msra.mxu1 %v3527_v27  ;;  %3304 = vmatpush3.bf16.msra.mxu0 %v3528_v29 }
 0x77d   : > { %3283 = vmatprep.subr.bf16.mxu1 %v3529_v30  ;;  %3305 = vmatprep.subr.bf16.mxu0 %v3530_v31 }
 0x780   : > { %3284 = vmatpush3.bf16.msra.mxu1 %v3531_v3  ;;  %3306 = vmatpush3.bf16.msra.mxu0 %v3532_v33 }
 0x781   : > { %3285 = vmatprep.subr.bf16.mxu1 %v3533_v34  ;;  %3307 = vmatprep.subr.bf16.mxu0 %v3534_v35 }
 0x784   : > { %3286 = vmatpush3.bf16.msra.mxu1 %v3535_v36  ;;  %3308 = vmatpush3.bf16.msra.mxu0 %v3536_v37 }
 0x785   : > { %3287 = vmatprep.subr.bf16.mxu1 %v3537_v38  ;;  %3309 = vmatprep.subr.bf16.mxu0 %v3538_v32 }
 0x788   : > { %3288 = vmatpush3.bf16.msra.mxu1 %v3539_v2  ;;  %3310 = vmatpush3.bf16.msra.mxu0 %v3540_v39 }
 0x789   : > { %3317 = vmatprep.subr.bf16.mxu1 %v3541_v40  ;;  %3339 = vmatprep.subr.bf16.mxu0 %v3542_v41 }
 0x81e   : > { %v1827_v48 = vpop.f32.mrb[8].mxu1  ;;  %v1870_v49 = vpop.f32.mrb[8].mxu0 }
 0x81f   : > { %v4090_v50 = vadd.f32 %v1827_v48, %v1436_v44  ;;  %v4092_v51 = vadd.f32 %v1870_v49, %v1444_v45  ;;  %v1829_v52 = vpop.f32.mrb[9].mxu1  ;;  %v1872_v53 = vpop.f32.mrb[9].mxu0 }
 0x820   : > { %v4094_v54 = vadd.f32 %v1829_v52, %v1440_v46  ;;  %v4096_v57 = vadd.f32 %v1872_v53, %v1448_v47  ;;  %v1831_v55 = vpop.f32.mrb[10].mxu1  ;;  %v1874_v59 = vpop.f32.mrb[10].mxu0  ;;  %v1455_v53 = vsub.s32 5, %v3883_v56 }
 0x821   : > { %v1981_v62 = vmul.f32 0.044715, %v4090_v50  ;;  %v1983_v60 = vmul.f32 0.044715, %v4092_v51  ;;  %v4102_v1 = vadd.f32 %v1831_v55, %v1436_v44  ;;  %v4104_v4 = vadd.f32 %v1874_v59, %v1444_v45  ;;  %v1833_v5 = vpop.f32.mrb[11].mxu1  ;;  %v1876_v6 = vpop.f32.mrb[11].mxu0 }
 0x822   : > { %v1982_v63 = vmul.f32 0.044715, %v4094_v54  ;;  %v1984_v0 = vmul.f32 0.044715, %v4096_v57  ;;  %v4108_v11 = vadd.f32 %v1833_v5, %v1440_v46  ;;  %v4110_v12 = vadd.f32 %v1876_v6, %v1448_v47 }
 0x823   : > { %v1997_v7 = vmul.f32 %v1981_v62, %v4090_v50  ;;  %v1999_v8 = vmul.f32 %v1983_v60, %v4092_v51  ;;  %v1989_v9 = vmul.f32 0.044715, %v4102_v1  ;;  %v1991_v16 = vmul.f32 0.044715, %v4104_v4 }
 0x824   : > { %v1998_v13 = vmul.f32 %v1982_v63, %v4094_v54  ;;  %v2000_v14 = vmul.f32 %v1984_v0, %v4096_v57  ;;  %v1990_v18 = vmul.f32 0.044715, %v4108_v11  ;;  %v1992_v22 = vmul.f32 0.044715, %v4110_v12 }
 0x825   : > { %v2013_v10 = vmul.f32 %v1997_v7, %v4090_v50  ;;  %v2015_v58 = vmul.f32 %v1999_v8, %v4092_v51  ;;  %v2005_v17 = vmul.f32 %v1989_v9, %v4102_v1  ;;  %v2007_v21 = vmul.f32 %v1991_v16, %v4104_v4 }
 0x826   : > { %v2014_v61 = vmul.f32 %v1998_v13, %v4094_v54  ;;  %v2016_v15 = vmul.f32 %v2000_v14, %v4096_v57  ;;  %v2006_v25 = vmul.f32 %v1990_v18, %v4108_v11  ;;  %v2008_v31 = vmul.f32 %v1992_v22, %v4110_v12 }
 0x827   : > { %v2029_v19 = vadd.f32 %v2013_v10, %v4090_v50  ;;  %v2031_v20 = vadd.f32 %v2015_v58, %v4092_v51  ;;  %v2021_v24 = vmul.f32 %v2005_v17, %v4102_v1  ;;  %v2023_v30 = vmul.f32 %v2007_v21, %v4104_v4 }
 0x828   : > { %v2030_v23 = vadd.f32 %v2014_v61, %v4094_v54  ;;  %v2032_v3 = vadd.f32 %v2016_v15, %v4096_v57  ;;  %v2022_v34 = vmul.f32 %v2006_v25, %v4108_v11  ;;  %v2024_v36 = vmul.f32 %v2008_v31, %v4110_v12  ;;  %v2119_v31 = vld [vmem:[%s4365_s17 + $0x50] sm:$0xff] }
 0x829   : > { %v2045_v27 = vmul.f32 0.7978846, %v2029_v19  ;;  %v2047_v29 = vmul.f32 0.7978846, %v2031_v20  ;;  %v2037_v33 = vadd.f32 %v2021_v24, %v4102_v1  ;;  %v2039_v35 = vadd.f32 %v2023_v30, %v4104_v4 }
 0x82a   : > { %v2046_v37 = vmul.f32 0.7978846, %v2030_v23  ;;  %v2038_v32 = vadd.f32 %v2022_v34, %v4108_v11  ;;  %v2040_v39 = vadd.f32 %v2024_v36, %v4110_v12  ;;  %v2048_v41 = vmul.f32 0.7978846, %v2032_v3 }
 0x82b   : > { %3597 = vtanh.f32 %v2045_v27  ;;  %v2053_v38 = vmul.f32 0.7978846, %v2037_v33  ;;  %v2055_v2 = vmul.f32 0.7978846, %v2039_v35  ;;  %v1451_v44 = vsub.s32 4, %v3883_v56  ;;  %v2118_v27 = vld [vmem:[%s4365_s17 + $0x48] sm:$0xff] }
 0x82c   : > { %3599 = vtanh.f32 %v2047_v29  ;;  %v2054_v40 = vmul.f32 0.7978846, %v2038_v32  ;;  %v2056_v43 = vmul.f32 0.7978846, %v2040_v39  ;;  %v1459_v46 = vsub.s32 6, %v3883_v56 }
 0x82d   : > { %3601 = vtanh.f32 %v2046_v37  ;;  %v1452_v52 = vrot.slane %v4077_v42, %v1451_v44  ;;  %v1965_v62 = vmul.f32 0.5, %v4090_v50  ;;  %v1967_v60 = vmul.f32 0.5, %v4092_v51  ;;  %v2117_v50 = vld [vmem:[%s4365_s17 + $0x40] sm:$0xff] }
 0x82e   : > { %3603 = vtanh.f32 %v2053_v38  ;;  %v1463_v63 = vsub.s32 7, %v3883_v56  ;;  %v1973_v6 = vmul.f32 0.5, %v4102_v1  ;;  %v1460_v7 = vrot.slane %v4077_v42, %v1459_v46 }
 0x82f   : > { %3605 = vtanh.f32 %v2055_v2  ;;  %v1966_v8 = vmul.f32 0.5, %v4094_v54  ;;  %v1975_v9 = vmul.f32 0.5, %v4104_v4  ;;  %v1974_v16 = vmul.f32 0.5, %v4108_v11  ;;  %v2109_v54 = vld [vmem:[%s4365_s17] sm:$0xff]  ;;  %v2111_v4 = vld [vmem:[%s4365_s17 + $0x10] sm:$0xff]  ;;  %v2110_v11 = vld [vmem:[%s4365_s17 + $0x8] sm:$0xff] }
 0x830   : > { %3607 = vtanh.f32 %v2054_v40  ;;  %v1456_v18 = vrot.slane %v4077_v42, %v1455_v53  ;;  %v1464_v19 = vrot.slane %v4077_v42, %v1463_v63  ;;  %v1968_v29 = vmul.f32 0.5, %v4096_v57 }
 0x831   : > { %3609 = vtanh.f32 %v2048_v41  ;;  %v1976_v30 = vmul.f32 0.5, %v4110_v12 }
 0x832   : > { %3611 = vtanh.f32 %v2056_v43 }
 0x835   : > { %v3598_v45 = vpop.eup %3597 }
 0x836   : > { %v3600_v47 = vpop.eup %3599  ;;  %v2077_v48 = vadd.f32 1.0, %v3598_v45  ;;  %v2112_v45 = vld [vmem:[%s4365_s17 + $0x18] sm:$0xff] }
 0x837   : > { %v3602_v49 = vpop.eup %3601  ;;  %v2079_v55 = vadd.f32 1.0, %v3600_v47 }
 0x838   : > { %v3604_v59 = vpop.eup %3603  ;;  %v2078_v0 = vadd.f32 1.0, %v3602_v49  ;;  %v2093_v10 = vmul.f32 %v2077_v48, %v1965_v62 }
 0x839   : > { %v3606_v5 = vpop.eup %3605  ;;  %v2085_v13 = vadd.f32 1.0, %v3604_v59  ;;  %v2095_v58 = vmul.f32 %v2079_v55, %v1967_v60 }
 0x83a   : > { %v3608_v14 = vpop.eup %3607  ;;  %v2087_v51 = vadd.f32 1.0, %v3606_v5  ;;  %v2094_v1 = vmul.f32 %v2078_v0, %v1966_v8  ;;  %v4171_v42 = vmul.f32 %v2109_v54, %v2093_v10 }
 0x83b   : > { %v3610_v56 = vpop.eup %3609  ;;  %v2086_v61 = vadd.f32 1.0, %v3608_v14  ;;  %v2101_v15 = vmul.f32 %v2085_v13, %v1973_v6  ;;  %v4176_v3 = vmul.f32 %v2111_v4, %v2095_v58 }
 0x83c   : > { %v3612_v17 = vpop.eup %3611  ;;  %v2080_v20 = vadd.f32 1.0, %v3610_v56  ;;  %v2103_v23 = vmul.f32 %v2087_v51, %v1975_v9  ;;  %v2126_v37 = vmul.f32 %v2110_v11, %v2094_v1 }
 0x83d   : > { %v2102_v21 = vmul.f32 %v2086_v61, %v1974_v16  ;;  %v4164_v22 = vmul.f32 %v2117_v50, %v2101_v15  ;;  %v2088_v38 = vadd.f32 1.0, %v3612_v17  ;;  %v2120_v15 = vld [vmem:[%s4365_s17 + $0x58] sm:$0xff] }
 0x83e   : > { %v1913_v24 = vpop.f32.mrb[12].mxu1  ;;  %v1956_v25 = vpop.f32.mrb[12].mxu0  ;;  %v2096_v39 = vmul.f32 %v2080_v20, %v1968_v29  ;;  %v4193_v46 = vmul.f32 %v2119_v31, %v2103_v23  ;;  %v3545_v31 = vld [vmem:[%s3801_s28 + $0x148] sm:$0xff]  }
 0x83f   : > { %v4178_v33 = vadd.f32 %v1913_v24, %v1452_v52  ;;  %v4180_v34 = vadd.f32 %v1956_v25, %v1460_v7  ;;  %v1915_v35 = vpop.f32.mrb[13].mxu1  ;;  %v1958_v36 = vpop.f32.mrb[13].mxu0  ;;  %v2141_v40 = vpack.c.bf16 %v4164_v22, %v4171_v42  ;;  %v2134_v44 = vmul.f32 %v2118_v27, %v2102_v21  ;;  %v3543_v27 = vld [vmem:[%s3801_s28 + $0x100] sm:$0xff]  }
 0x840   : > { %v4182_v32 = vadd.f32 %v1915_v35, %v1456_v18  ;;  %v4184_v57 = vadd.f32 %v1958_v36, %v1464_v19  ;;  %v1917_v12 = vpop.f32.mrb[14].mxu1  ;;  %v1960_v2 = vpop.f32.mrb[14].mxu0  ;;  %v2128_v9 = vmul.f32 %v2112_v45, %v2096_v39  ;;  %v2143_v42 = vpack.c.bf16 %v4193_v46, %v4176_v3  ;;  %v3546_v39 = vld [vmem:[%s3801_s28 + $0x1c8] sm:$0xff]  }
 0x841   : > { %v1985_v41 = vmul.f32 0.044715, %v4178_v33  ;;  %v1987_v43 = vmul.f32 0.044715, %v4180_v34  ;;  %v4197_v49 = vadd.f32 %v1917_v12, %v1452_v52  ;;  %v4199_v53 = vadd.f32 %v1960_v2, %v1460_v7  ;;  %v1919_v55 = vpop.f32.mrb[15].mxu1  ;;  %v1962_v59 = vpop.f32.mrb[15].mxu0 }
 0x842   : > { %v1986_v47 = vmul.f32 0.044715, %v4182_v32  ;;  %v1988_v48 = vmul.f32 0.044715, %v4184_v57  ;;  %v4203_v63 = vadd.f32 %v1919_v55, %v1456_v18  ;;  %v4205_v0 = vadd.f32 %v1962_v59, %v1464_v19  ;;  %v3547_v3 = vld [vmem:[%s3801_s28 + $0x108] sm:$0xff]   ;;  %v3553_v55 = vld [vmem:[%s3801_s28 + $0x158] sm:$0xff]  }
 0x843   : > { %v2001_v62 = vmul.f32 %v1985_v41, %v4178_v33  ;;  %v2003_v60 = vmul.f32 %v1987_v43, %v4180_v34  ;;  %v1993_v8 = vmul.f32 0.044715, %v4197_v49  ;;  %v2104_v52 = vmul.f32 %v2088_v38, %v1976_v30  ;;  %v3544_v38 = vld [vmem:[%s3801_s28 + $0x180] sm:$0xff]   ;;  %v3552_v59 = vld [vmem:[%s3801_s28 + $0x190] sm:$0xff]  }
 0x844   : > { %v2002_v5 = vmul.f32 %v1986_v47, %v4182_v32  ;;  %v2004_v6 = vmul.f32 %v1988_v48, %v4184_v57  ;;  %v1995_v14 = vmul.f32 0.044715, %v4199_v53  ;;  %v1994_v58 = vmul.f32 0.044715, %v4203_v63  ;;  %v3550_v47 = vld [vmem:[%s3801_s28 + $0x1d0] sm:$0xff]  }
 0x845   : > { %v2017_v7 = vmul.f32 %v2001_v62, %v4178_v33  ;;  %v2019_v13 = vmul.f32 %v2003_v60, %v4180_v34  ;;  %v2009_v51 = vmul.f32 %v1993_v8, %v4197_v49  ;;  %v1996_v1 = vmul.f32 0.044715, %v4205_v0  ;;  %v3551_v48 = vld [vmem:[%s3801_s28 + $0x110] sm:$0xff]   ;;  %v3554_v60 = vld [vmem:[%s3801_s28 + $0x1d8] sm:$0xff]  }
 0x846   : > { %v2018_v10 = vmul.f32 %v2002_v5, %v4182_v32  ;;  %v2020_v50 = vmul.f32 %v2004_v6, %v4184_v57  ;;  %v2011_v61 = vmul.f32 %v1995_v14, %v4199_v53  ;;  %v2010_v18 = vmul.f32 %v1994_v58, %v4203_v63  ;;  %v3555_v6 = vld [vmem:[%s3801_s28 + $0x118] sm:$0xff]   ;;  %v3558_v58 = vld [vmem:[%s3801_s28 + $0x1e0] sm:$0xff]  }
 0x847   : > { %v2033_v56 = vadd.f32 %v2017_v7, %v4178_v33  ;;  %v2035_v16 = vadd.f32 %v2019_v13, %v4180_v34  ;;  %v2025_v17 = vmul.f32 %v2009_v51, %v4197_v49  ;;  %v2012_v21 = vmul.f32 %v1996_v1, %v4205_v0  ;;  %v3557_v7 = vld [vmem:[%s3801_s28 + $0x160] sm:$0xff]  }
 0x848   : > { %v2034_v54 = vadd.f32 %v2018_v10, %v4182_v32  ;;  %v2036_v4 = vadd.f32 %v2020_v50, %v4184_v57  ;;  %v2027_v20 = vmul.f32 %v2011_v61, %v4199_v53  ;;  %v2026_v23 = vmul.f32 %v2010_v18, %v4203_v63  ;;  %v3556_v10 = vld [vmem:[%s3801_s28 + $0x198] sm:$0xff]   ;;  %v3559_v1 = vld [vmem:[%s3801_s28 + $0x120] sm:$0xff]  }
 0x849   : > { %v2049_v19 = vmul.f32 0.7978846, %v2033_v56  ;;  %v2051_v11 = vmul.f32 0.7978846, %v2035_v16  ;;  %v2041_v22 = vadd.f32 %v2025_v17, %v4197_v49  ;;  %v2142_v24 = vpack.c.bf16 %v2134_v44, %v2126_v37  ;;  %v3549_v44 = vld [vmem:[%s3801_s28 + $0x150] sm:$0xff]   ;;  %v3561_v17 = vld [vmem:[%s3801_s28 + $0x168] sm:$0xff]  }
 0x84a   : > { %v2136_v25 = vmul.f32 %v2120_v15, %v2104_v52  ;;  %v2043_v29 = vadd.f32 %v2027_v20, %v4199_v53  ;;  %v2028_v30 = vmul.f32 %v2012_v21, %v4205_v0  ;;  %v2042_v36 = vadd.f32 %v2026_v23, %v4203_v63  ;;  %v2121_v15 = vld [vmem:[%s4365_s17 + $0x60] sm:$0xff]  ;;  %v2115_v20 = vld [vmem:[%s4365_s17 + $0x30] sm:$0xff] }
 0x84b   : > { %3613 = vtanh.f32 %v2049_v19  ;;  %v2057_v35 = vmul.f32 0.7978846, %v2041_v22  ;;  %2695 = vmatprep.mubr.bf16.mxu1 %v2142_v24  ;;  %v2050_v41 = vmul.f32 0.7978846, %v2034_v54  ;;  %v2052_v45 = vmul.f32 0.7978846, %v2036_v4 }
 0x84c   : > { %3615 = vtanh.f32 %v2051_v11  ;;  %v2144_v37 = vpack.c.bf16 %v2136_v25, %v2128_v9  ;;  %v2059_v12 = vmul.f32 0.7978846, %v2043_v29  ;;  %v2044_v2 = vadd.f32 %v2028_v30, %v4205_v0  ;;  %2696 = vmatmul.mubr.bf16.vlgmr.msra.gmra.mrb[16].mxu1 %v2141_v40  ;;  %v3548_v40 = vld [vmem:[%s3801_s28 + $0x188] sm:$0xff]   ;;  %v2123_v21 = vld [vmem:[%s4365_s17 + $0x70] sm:$0xff]  ;;  %v3560_v23 = vld [vmem:[%s3801_s28 + $0x1a0] sm:$0xff]  }
 0x84d   : > { %3617 = vtanh.f32 %v2057_v35  ;;  %3318 = vmatpush3.bf16.msra.mxu1 %v3543_v27  ;;  %v2058_v43 = vmul.f32 0.7978846, %v2042_v36  ;;  %v1969_v52 = vmul.f32 0.5, %v4178_v33  ;;  %v1971_v9 = vmul.f32 0.5, %v4180_v34  ;;  %v2113_v34 = vld [vmem:[%s4365_s17 + $0x20] sm:$0xff]  ;;  %v3562_v29 = vld [vmem:[%s3801_s28 + $0x1e8] sm:$0xff]  }
 0x84e   : > { %2736 = vmatprep.mubr.bf16.mxu0 %v2144_v37  ;;  %3619 = vtanh.f32 %v2059_v12  ;;  %3319 = vmatprep.subr.bf16.mxu1 %v3545_v31  ;;  %v2060_v46 = vmul.f32 0.7978846, %v2044_v2  ;;  %v1977_v51 = vmul.f32 0.5, %v4197_v49  ;;  %v1979_v33 = vmul.f32 0.5, %v4199_v53  ;;  %v2122_v31 = vld [vmem:[%s4365_s17 + $0x68] sm:$0xff] }
 0x84f   : > { %2737 = vmatmul.mubr.bf16.vlgmr.msra.gmra.mrb[16].mxu0 %v2143_v42  ;;  %3621 = vtanh.f32 %v2050_v41  ;;  %v1970_v18 = vmul.f32 0.5, %v4182_v32  ;;  %v1978_v53 = vmul.f32 0.5, %v4203_v63  ;;  %v1972_v25 = vmul.f32 0.5, %v4184_v57  ;;  %v2114_v42 = vld [vmem:[%s4365_s17 + $0x28] sm:$0xff]  ;;  %v2116_v41 = vld [vmem:[%s4365_s17 + $0x38] sm:$0xff] }
 0x850   : > { %3340 = vmatpush3.bf16.msra.mxu0 %v3544_v38  ;;  %3623 = vtanh.f32 %v2058_v43  ;;  %v1980_v32 = vmul.f32 0.5, %v4205_v0  ;;  %v3563_v0 = vld [vmem:[%s3801_s28 + $0x128] sm:$0xff]   ;;  %v2124_v43 = vld [vmem:[%s4365_s17 + $0x78] sm:$0xff] }
 0x851   : > { %3341 = vmatprep.subr.bf16.mxu0 %v3546_v39  ;;  %3320 = vmatpush3.bf16.msra.mxu1 %v3547_v3  ;;  %3625 = vtanh.f32 %v2052_v45  ;;  %v3565_v39 = vld [vmem:[%s3801_s28 + $0x170] sm:$0xff]   ;;  %v3564_v45 = vld [vmem:[%s3801_s28 + $0x1a8] sm:$0xff]  }
 0x852   : > { %3321 = vmatprep.subr.bf16.mxu1 %v3549_v44  ;;  %3627 = vtanh.f32 %v2060_v46 }
 0x854   : > { %3342 = vmatpush3.bf16.msra.mxu0 %v3548_v40 }
 0x855   : > { %v3614_v62 = vpop.eup %3613  ;;  %3343 = vmatprep.subr.bf16.mxu0 %v3550_v47  ;;  %3322 = vmatpush3.bf16.msra.mxu1 %v3551_v48 }
 0x856   : > { %v3616_v5 = vpop.eup %3615  ;;  %v2081_v8 = vadd.f32 1.0, %v3614_v62  ;;  %3323 = vmatprep.subr.bf16.mxu1 %v3553_v55  ;;  %v3566_v55 = vld [vmem:[%s3801_s28 + $0x1f0] sm:$0xff]  }
 0x857   : > { %v2083_v13 = vadd.f32 1.0, %v3616_v5  ;;  %v3618_v14 = vpop.eup %3617 }
 0x858   : > { %3344 = vmatpush3.bf16.msra.mxu0 %v3552_v59  ;;  %v3620_v50 = vpop.eup %3619  ;;  %v2089_v56 = vadd.f32 1.0, %v3618_v14  ;;  %v2097_v16 = vmul.f32 %v2081_v8, %v1969_v52  ;;  %v3567_v59 = vld [vmem:[%s3801_s28 + $0x130] sm:$0xff]   ;;  %v3572_v14 = vld [vmem:[%s3801_s28 + $0x1b8] sm:$0xff]  }
 0x859   : > { %3345 = vmatprep.subr.bf16.mxu0 %v3554_v60  ;;  %v3622_v61 = vpop.eup %3621  ;;  %3324 = vmatpush3.bf16.msra.mxu1 %v3555_v6  ;;  %v2091_v54 = vadd.f32 1.0, %v3620_v50  ;;  %v2099_v49 = vmul.f32 %v2083_v13, %v1971_v9  ;;  %v3569_v6 = vld [vmem:[%s3801_s28 + $0x178] sm:$0xff]   ;;  %v3568_v8 = vld [vmem:[%s3801_s28 + $0x1b0] sm:$0xff]   ;;  %v2829_v9 = vld [vmem:[%s4366_s19] sm:$0xff] }
 0x85a   : > { %v3624_v4 = vpop.eup %3623  ;;  %3325 = vmatprep.subr.bf16.mxu1 %v3557_v7  ;;  %v2082_v19 = vadd.f32 1.0, %v3622_v61  ;;  %v2105_v11 = vmul.f32 %v2089_v56, %v1977_v51  ;;  %v2129_v36 = vmul.f32 %v2113_v34, %v2097_v16  ;;  %v3570_v7 = vld [vmem:[%s3801_s28 + $0x1f8] sm:$0xff]   ;;  %v2277_v50 = vld [vmem:[%s3812_s26] sm:$0xff] }
 0x85b   : > { %v3626_v22 = vpop.eup %3625  ;;  %v2090_v24 = vadd.f32 1.0, %v3624_v4  ;;  %v2107_v63 = vmul.f32 %v2091_v54, %v1979_v33  ;;  %v2131_v12 = vmul.f32 %v2115_v20, %v2099_v49  ;;  %v3571_v13 = vld [vmem:[%s3801_s28 + $0x138] sm:$0xff]   ;;  %v2278_v33 = vld [vmem:[%s3812_s26 + $0x8] sm:$0xff] }
 0x85c   : > { %3346 = vmatpush3.bf16.msra.mxu0 %v3556_v10  ;;  %v3628_v27 = vpop.eup %3627  ;;  %v2098_v30 = vmul.f32 %v2082_v19, %v1970_v18  ;;  %v2084_v35 = vadd.f32 1.0, %v3626_v22  ;;  %v2137_v57 = vmul.f32 %v2121_v15, %v2105_v11 }
 0x85d   : > { %3347 = vmatprep.subr.bf16.mxu0 %v3558_v58  ;;  %3326 = vmatpush3.bf16.msra.mxu1 %v3559_v1  ;;  %v2106_v37 = vmul.f32 %v2090_v24, %v1978_v53  ;;  %v2092_v38 = vadd.f32 1.0, %v3628_v27  ;;  %v2139_v2 = vmul.f32 %v2123_v21, %v2107_v63 }
 0x85e   : > { %3327 = vmatprep.subr.bf16.mxu1 %v3561_v17  ;;  %v2100_v3 = vmul.f32 %v2084_v35, %v1972_v25  ;;  %v2145_v44 = vpack.c.bf16 %v2137_v57, %v2129_v36  ;;  %v2130_v46 = vmul.f32 %v2114_v42, %v2098_v30 }
 0x85f   : > { %v2138_v40 = vmul.f32 %v2122_v31, %v2106_v37  ;;  %v2108_v47 = vmul.f32 %v2092_v38, %v1980_v32  ;;  %v2147_v48 = vpack.c.bf16 %v2139_v2, %v2131_v12  ;;  %v2830_v38 = vld [vmem:[%s4366_s19 + $0x8] sm:$0xff] }
 0x860   : > { %3348 = vmatpush3.bf16.msra.mxu0 %v3560_v23  ;;  %v2132_v60 = vmul.f32 %v2116_v41, %v2100_v3 }
 0x861   : > { %3349 = vmatprep.subr.bf16.mxu0 %v3562_v29  ;;  %3328 = vmatpush3.bf16.msra.mxu1 %v3563_v0  ;;  %v2146_v62 = vpack.c.bf16 %v2138_v40, %v2130_v46  ;;  %v2140_v5 = vmul.f32 %v2124_v43, %v2108_v47 }
 0x862   : > { %3329 = vmatprep.subr.bf16.mxu1 %v3565_v39 }
 0x863   : > { %2777 = vmatprep.mubr.bf16.mxu1 %v2146_v62  ;;  %v2148_v52 = vpack.c.bf16 %v2140_v5, %v2132_v60 }
 0x864   : > { %3350 = vmatpush3.bf16.msra.mxu0 %v3564_v45 }
 0x865   : > { %3351 = vmatprep.subr.bf16.mxu0 %v3566_v55  ;;  %3330 = vmatpush3.bf16.msra.mxu1 %v3567_v59 }
 0x866   : > { %2818 = vmatprep.mubr.bf16.mxu0 %v2148_v52  ;;  %3331 = vmatprep.subr.bf16.mxu1 %v3569_v6 }
 0x868   : > { %3352 = vmatpush3.bf16.msra.mxu0 %v3568_v8 }
 0x869   : > { %3353 = vmatprep.subr.bf16.mxu0 %v3570_v7  ;;  %3332 = vmatpush3.bf16.msra.mxu1 %v3571_v13 }
 0x86c   : > { %3354 = vmatpush3.bf16.msra.mxu0 %v3572_v14  ;;  %2778 = vmatmul.mubr.bf16.vlgmr.msra.gmra.mrb[20].mxu1 %v2145_v44 }
 0x86d   : > { %3417 = vmatprep.mubr.msk.f32.mxu1 %vm1008_vm3, %v2829_v9 }
 0x86f   : > { %2819 = vmatmul.mubr.bf16.vlgmr.msra.gmra.mrb[20].mxu0 %v2147_v48 }
 0x91f   : > { %v3289_v10 = vpop.f32.mrb[16].mxu1 }
 0x920   : > { %v3290_v51 = vpop.f32.mrb[17].mxu1 }
 0x921   : > { %v3291_v56 = vadd.f32 %v3290_v51, %v3289_v10  ;;  %v3292_v16 = vpop.f32.mrb[18].mxu1 }
 0x922   : > { %v3311_v58 = vpop.f32.mrb[16].mxu0  ;;  %v3293_v1 = vpop.f32.mrb[19].mxu1 }
 0x923   : > { %v3312_v61 = vpop.f32.mrb[17].mxu0  ;;  %v2698_v34 = vadd.f32 %v3291_v56, %v2277_v50  ;;  %v3294_v49 = vadd.f32 %v3293_v1, %v3292_v16 }
 0x924   : > { %v3313_v15 = vadd.f32 %v3312_v61, %v3311_v58  ;;  %v3314_v54 = vpop.f32.mrb[18].mxu0 }
 0x925   : > { %v3315_v4 = vpop.f32.mrb[19].mxu0  ;;  %v2701_v18 = vadd.f32 %v3294_v49, %v2278_v33 }
 0x926   : > { %v2739_v17 = vadd.f32 %v3313_v15, %v2698_v34  ;;  %v3316_v53 = vadd.f32 %v3315_v4, %v3314_v54 }
 0x928   : > { %v2742_v19 = vadd.f32 %v3316_v53, %v2701_v18 }
 0x93f   : > { %v3333_v11 = vpop.f32.mrb[20].mxu1 }
 0x940   : > { %v3334_v20 = vpop.f32.mrb[21].mxu1 }
 0x941   : > { %v3335_v22 = vadd.f32 %v3334_v20, %v3333_v11  ;;  %v3336_v23 = vpop.f32.mrb[22].mxu1 }
 0x942   : > { %v3355_v21 = vpop.f32.mrb[20].mxu0  ;;  %v3337_v25 = vpop.f32.mrb[23].mxu1 }
 0x943   : > { %v3356_v24 = vpop.f32.mrb[21].mxu0  ;;  %v2780_v32 = vadd.f32 %v3335_v22, %v2739_v17  ;;  %v3338_v29 = vadd.f32 %v3337_v25, %v3336_v23 }
 0x944   : > { %v3357_v63 = vadd.f32 %v3356_v24, %v3355_v21  ;;  %v3358_v27 = vpop.f32.mrb[22].mxu0 }
 0x945   : > { %v3359_v30 = vpop.f32.mrb[23].mxu0  ;;  %v2783_v31 = vadd.f32 %v3338_v29, %v2742_v19 }
 0x946   : > { %v2821_v42 = vadd.f32 %v3357_v63, %v2780_v32  ;;  %v3360_v35 = vadd.f32 %v3359_v30, %v3358_v27 }
 0x948   : > { %v2824_v36 = vadd.f32 %v3360_v35, %v2783_v31  ;;  %v2827_v57 = vadd.f32 %v2821_v42, %v3944_v28 }
 0x94a   : > { %v2828_v0 = vadd.f32 %v2824_v36, %v3940_v26 }
 0x94c   : > { %v3440_v37 = vpack.c.bf16 %v2828_v0, %v2827_v57 }
 0x94e   : > { %3441 = vmatprep.subr.bf16.mxu1 %v3440_v37 }
 0x94f   : > { %3443 = vmatpush3.bf16.msra.mxu1 %v3440_v37 }
 0x952   : > { %3418 = vmatmul.mubr.msk.f32.vlgmr.msra.gmra.mrb[24].mxu1 %vm1008_vm3, %v2830_v38 }
 0xa25   : > { %v3419_v12 = vpop.f32.mrb[24].mxu1 }
 0xa26   : > { %2913 = vst [vmem:[#allocation2 + $0x8] sm:$0xff] %v3419_v12  ;;  %v2903_v2 = vpop.f32.mrb[25].mxu1 }
 0xa27   : > { %2912 = vst [vmem:[#allocation2] sm:$0xff] %v2903_v2 }
 0xa28   : > { %3642 = shalt.err (!%p3639_p12)
}
 0xa29   : > { %s4367_s25 = sld [smem:[#allocation8_spill]] }
 0xa2f   : > { %s3643_s16 = scalar_lea.hbm %s4367_s25, 256 }
 0xa30   : > { %p3644_p13 = scmp.ne.s32.totalorder %s4367_s25, %s3643_s16  ;;  %p3649_p2 = scmp.lt.u32.totalorder %s3643_s16, %s4367_s25 }
 0xa32   : > { %p3645_p0 = pnand %p3644_p13, %p3450_p5 }
 0xa34   : > { %p3646_p1 = pneg %p3645_p0 }
 0xa36   : > { %p3651_p3 = pnand %p3649_p2, %p3646_p1 }
 0xa38   : > { %3654 = shalt.err (!%p3651_p3)
}
 0xa39   : > { %s3672_s23 = smov 128   ;;  %s3673_s29 = smov 8  }
 0xa3a   : > { %3447 = dma.vmem_to_hbm [thread:$0]  (%p3450_p5), %s2921_s3, 256, %s4367_s25, [#allocation3], %s3672_s23, %s3672_s23, %s3673_s29  }
 0xa3b   : > { %3660 = dma.done.wait (%p3450_p5), [#allocation3], 256  }
 0xa3c   : > { %3662 = vsyncadd (%p3450_p5), [#allocation3], 4294967040 }
 0xa3d PF: > { %s4368_s26 = sld [smem:[#allocation5_spill]] }
 0xa43   : > { %s25_s29 = sadd.s32 1, %s4368_s26  }
 0xa44   : > { %p22_p4 = scmp.ge.s32.totalorder %s25_s29, 4  }
 0xa46   :  { %24 = sbr.rel (!%p22_p4) target bundleno = 5 (0x5), region = 134 }
 0xa4d   :  { %2936 = vsyncpa [#allocation3], 1 }
 0xa4e   :  { %2938 = vsyncpa [#allocation3 + $0x1], 1 }

</bundles_post_ra>
